<compile_context>
chip_gen: v5e
topology: v5e:2x2
jax: 0.10.0
libtpu: 0.0.40
codegen_flags: <defaults>
</compile_context>

<pallas_src>
import functools

import jax
import jax.numpy as jnp
from jax import lax
from jax.experimental import pallas as pl
from jax.experimental.pallas import tpu as pltpu

MM_DTYPE = jnp.bfloat16   # MXU input dtype (accumulation is always f32)


def _pick_tile(m, max_tile, mult):
    """Largest multiple of `mult` <= max_tile that divides m, else m (full)."""
    t = (min(m, max_tile) // mult) * mult
    while t >= mult:
        if m % t == 0:
            return t
        t -= mult
    return m


# --------------------------------------------------------------------------
# Pallas kernels
# --------------------------------------------------------------------------
def _conv_dwmtj_kernel(p_ref, w_ref, b_ref, x_ref, s_ref, xo_ref, *,
                       scale, vel, leak, x_th, x_reset):
    # conv (im2col matmul) + bias + scale, fused with the DWMTJ cell epilogue
    acc = jnp.dot(p_ref[...], w_ref[...], preferred_element_type=jnp.float32)
    z = scale * (acc + b_ref[...])
    x_prev = x_ref[...]
    x = x_prev + vel * z - leak * x_prev
    spike = (x >= x_th).astype(jnp.float32)
    s_ref[...] = spike.astype(s_ref.dtype)
    xo_ref[...] = spike * x_reset + (1.0 - spike) * x


def conv_dwmtj(patches, w, b, x_state, dw, *, scale=1.0):
    """spikes, x_new = DWMTJ(scale * (patches @ w + b), x_state)."""
    M, K = patches.shape
    _, N = w.shape
    tm = _pick_tile(M, 512, 128)
    kernel = functools.partial(
        _conv_dwmtj_kernel, scale=scale, vel=dw["vel"], leak=dw["leak"],
        x_th=dw["x_th"], x_reset=dw["x_reset"])
    spikes, x_new = pl.pallas_call(
        kernel,
        out_shape=(jax.ShapeDtypeStruct((M, N), MM_DTYPE),
                   jax.ShapeDtypeStruct((M, N), jnp.float32)),
        grid=(M // tm,),
        in_specs=[
            pl.BlockSpec((tm, K), lambda g: (g, 0)),
            pl.BlockSpec((K, N), lambda g: (0, 0)),
            pl.BlockSpec((1, N), lambda g: (0, 0)),
            pl.BlockSpec((tm, N), lambda g: (g, 0)),
        ],
        out_specs=(pl.BlockSpec((tm, N), lambda g: (g, 0)),
                   pl.BlockSpec((tm, N), lambda g: (g, 0))),
        compiler_params=pltpu.CompilerParams(
            dimension_semantics=("parallel",)),
    )(patches, w, b, x_state)
    return spikes, x_new


def _max4_kernel(a_ref, b_ref, c_ref, d_ref, o_ref):
    o_ref[...] = jnp.maximum(jnp.maximum(a_ref[...], b_ref[...]),
                             jnp.maximum(c_ref[...], d_ref[...]))


def max_pool_2x2(z):
    """max_pool2d(z, 2, 2) on an NHWC tensor with a lane-dense Pallas max."""
    B, H, W, C = z.shape
    Ho, Wo = H // 2, W // 2
    views = [z[:, di::2, dj::2, :].reshape(B * Ho, Wo * C)
             for di in (0, 1) for dj in (0, 1)]
    rows, cols = B * Ho, Wo * C
    tr = _pick_tile(rows, 512, 8)
    out = pl.pallas_call(
        _max4_kernel,
        out_shape=jax.ShapeDtypeStruct((rows, cols), z.dtype),
        grid=(rows // tr,),
        in_specs=[pl.BlockSpec((tr, cols), lambda g: (g, 0))] * 4,
        out_specs=pl.BlockSpec((tr, cols), lambda g: (g, 0)),
        compiler_params=pltpu.CompilerParams(
            dimension_semantics=("parallel",)),
    )(*views)
    return out.reshape(B, Ho, Wo, C)


def _fc_dwmtj_li_kernel(z_ref, w1_ref, b1_ref, x_ref, w2_ref, v_ref, i_ref,
                        xo_ref, vo_ref, io_ref, *,
                        vel, leak, x_th, x_reset,
                        dt, tau_syn_inv, tau_mem_inv, v_leak):
    # fc1 + DWMTJ + relu + LILinearCell (linear, no bias) in one kernel
    z = jnp.dot(z_ref[...], w1_ref[...], preferred_element_type=jnp.float32)
    z = z + b1_ref[...]
    x_prev = x_ref[...]
    x = x_prev + vel * z - leak * x_prev
    spike = (x >= x_th).astype(jnp.float32)
    xo_ref[...] = spike * x_reset + (1.0 - spike) * x
    zr = jnp.maximum(spike, 0.0)                       # relu before the LI cell
    i_jump = i_ref[...] + jnp.dot(zr.astype(MM_DTYPE), w2_ref[...],
                                  preferred_element_type=jnp.float32)
    v = v_ref[...]
    vo_ref[...] = v + dt * tau_mem_inv * ((v_leak - v) + i_jump)
    io_ref[...] = i_jump - dt * tau_syn_inv * i_jump


def fc_dwmtj_li(z, w1, b1, x_state, w2, v, i_syn, dw, li):
    B, K = z.shape
    _, N1 = w1.shape
    _, N2 = w2.shape
    kernel = functools.partial(
        _fc_dwmtj_li_kernel, vel=dw["vel"], leak=dw["leak"],
        x_th=dw["x_th"], x_reset=dw["x_reset"],
        dt=li["dt"], tau_syn_inv=li["tau_syn_inv"],
        tau_mem_inv=li["tau_mem_inv"], v_leak=li["v_leak"])
    x_new, v_new, i_new = pl.pallas_call(
        kernel,
        out_shape=(jax.ShapeDtypeStruct((B, N1), jnp.float32),
                   jax.ShapeDtypeStruct((B, N2), jnp.float32),
                   jax.ShapeDtypeStruct((B, N2), jnp.float32)),
        grid=(1,),
        in_specs=[pl.BlockSpec((B, K), lambda g: (0, 0)),
                  pl.BlockSpec((K, N1), lambda g: (0, 0)),
                  pl.BlockSpec((1, N1), lambda g: (0, 0)),
                  pl.BlockSpec((B, N1), lambda g: (0, 0)),
                  pl.BlockSpec((N1, N2), lambda g: (0, 0)),
                  pl.BlockSpec((B, N2), lambda g: (0, 0)),
                  pl.BlockSpec((B, N2), lambda g: (0, 0))],
        out_specs=(pl.BlockSpec((B, N1), lambda g: (0, 0)),
                   pl.BlockSpec((B, N2), lambda g: (0, 0)),
                   pl.BlockSpec((B, N2), lambda g: (0, 0))),
    )(z, w1, b1, x_state, w2, v, i_syn)
    return x_new, v_new, i_new


# --------------------------------------------------------------------------
# JAX glue (im2col, parameter prep, jit + scan time loop)
# --------------------------------------------------------------------------
def im2col_nhwc(x, kh, kw):
    """NHWC x -> (B*Ho*Wo, kh*kw*C) patches; column order is (kh, kw, C)."""
    B, H, W, C = x.shape
    Ho, Wo = H - kh + 1, W - kw + 1
    cols = [x[:, i:i + Ho, j:j + Wo, :] for i in range(kh) for j in range(kw)]
    patches = jnp.concatenate(cols, axis=-1)              # (B, Ho, Wo, kh*kw*C)
    return patches.reshape(B * Ho * Wo, kh * kw * C), (B, Ho, Wo)


def init_params(key):
    ks = jax.random.split(key, 7)
    return {
        "conv1_w": 0.1 * jax.random.normal(ks[0], (20, 1, 5, 5), jnp.float32),
        "conv1_b": 0.1 * jax.random.normal(ks[1], (20,), jnp.float32),
        "conv2_w": 0.1 * jax.random.normal(ks[2], (50, 20, 5, 5), jnp.float32),
        "conv2_b": 0.1 * jax.random.normal(ks[3], (50,), jnp.float32),
        "fc1_w": 0.05 * jax.random.normal(ks[4], (500, 800), jnp.float32),   # (out, in)
        "fc1_b": 0.05 * jax.random.normal(ks[5], (500,), jnp.float32),
        "out_w": 0.05 * jax.random.normal(ks[6], (10, 500), jnp.float32),    # LILinearCell
    }


def build_forward(dwmtj_p, li_p=None):
    if li_p is None:
        li_p = dict(dt=1e-3, tau_syn_inv=200.0, tau_mem_inv=100.0, v_leak=0.0)
    dw = dict(
        vel=float(dwmtj_p["dt"] * dwmtj_p["I"] / (dwmtj_p["w1"] * dwmtj_p["w2"])),
        leak=float(dwmtj_p["dt"] * dwmtj_p["alpha"] * dwmtj_p["H"]),
        x_th=float(dwmtj_p["x_th"]),
        x_reset=float(dwmtj_p["x_reset"]),
    )
    li = {k: float(v) for k, v in li_p.items()}

    @jax.jit
    def forward(params, x):
        # x: (seq, B, C, H, W) NCHW at the module boundary, feature_size=28
        B = x.shape[1]
        x_nhwc = jnp.transpose(x, (0, 1, 3, 4, 2)).astype(MM_DTYPE)

        # ---- weight prep, hoisted out of the time loop ------------------
        def conv_wmat(w):
            cout, cin, kh, kw = w.shape
            return (jnp.transpose(w, (2, 3, 1, 0))
                    .reshape(kh * kw * cin, cout).astype(MM_DTYPE))

        w1m = conv_wmat(params["conv1_w"])                        # (25, 20)
        w2m = conv_wmat(params["conv2_w"])                        # (500, 50)
        b1 = params["conv1_b"].reshape(1, -1).astype(jnp.float32)
        b2 = params["conv2_b"].reshape(1, -1).astype(jnp.float32)
        # torch fc1 flattens (C, h, w); our activations flatten as (h, w, C)
        fc1m = (params["fc1_w"].reshape(500, 50, 4, 4)
                .transpose(0, 2, 3, 1).reshape(500, 800).T.astype(MM_DTYPE))  # (800,500)
        fc1b = params["fc1_b"].reshape(1, -1).astype(jnp.float32)
        outm = params["out_w"].T.astype(MM_DTYPE)                 # (500, 10)

        s0 = jnp.zeros((B * 24 * 24, 20), jnp.float32)
        s1 = jnp.zeros((B * 8 * 8, 50), jnp.float32)
        s2 = jnp.zeros((B, 500), jnp.float32)
        v0 = jnp.zeros((B, 10), jnp.float32)
        i0 = jnp.zeros((B, 10), jnp.float32)

        def step(carry, x_t):
            s0, s1, s2, v, i_syn = carry
            p1, (Bn, Ho, Wo) = im2col_nhwc(x_t, 5, 5)                 # (B*576, 25)
            spk, s0 = conv_dwmtj(p1, w1m, b1, s0, dw, scale=1.0)       # (B*576, 20)
            z = max_pool_2x2(spk.reshape(Bn, Ho, Wo, 20))              # (B,12,12,20)
            p2, (_, Ho2, Wo2) = im2col_nhwc(z, 5, 5)                   # (B*64, 500)
            spk, s1 = conv_dwmtj(p2, w2m, b2, s1, dw, scale=10.0)      # (B*64, 50)
            z = max_pool_2x2(spk.reshape(Bn, Ho2, Wo2, 50))            # (B,4,4,50)
            z = z.reshape(Bn, 4 * 4 * 50)                              # (B, 800)
            s2, v, i_syn = fc_dwmtj_li(z, fc1m, fc1b, s2, outm, v, i_syn, dw, li)
            return (s0, s1, s2, v, i_syn), v

        _, voltages = lax.scan(step, (s0, s1, s2, v0, i0), x_nhwc)
        return voltages                                                # (seq, B, 10)

    return forward


if __name__ == "__main__":
    key = jax.random.PRNGKey(0)
    kx, kp = jax.random.split(key)

    seq, B, C, H = 3, 2, 1, 28   # feature_size must be 28 (fc1 uses 4*4*50)
    x = jax.random.normal(kx, (seq, B, C, H, H), jnp.float32)
    params = init_params(kp)
    dwmtj_params = dict(dt=1e-9, I=8e-5, w1=2.5e-8, w2=2.5e-8,
                        alpha=100.0, H=0.0, x_th=2e-7, x_reset=0.0)

    forward = build_forward(dwmtj_params)
    voltages = forward(params, x)
    jax.block_until_ready(voltages)
    assert voltages.shape == (seq, B, 10)
    assert voltages.dtype == jnp.float32
    print("KERNEL_OK")
</pallas_src>

<mosaic_0001>
module attributes {stable_mosaic.version = 11 : i64} {
  func.func @_conv_dwmtj_kernel(%arg0: i32, %arg1: memref<384x25xbf16, #tpu.memory_space<vmem>>, %arg2: memref<25x20xbf16, #tpu.memory_space<vmem>>, %arg3: memref<1x20xf32, #tpu.memory_space<vmem>>, %arg4: memref<384x20xf32, #tpu.memory_space<vmem>>, %arg5: memref<384x20xbf16, #tpu.memory_space<vmem>>, %arg6: memref<384x20xf32, #tpu.memory_space<vmem>>) attributes {dimension_semantics = [#tpu.dimension_semantics<parallel>], iteration_bounds = array<i64: 3>, scalar_prefetch = 0 : i64, scratch_operands = 0 : i64, tpu.core_type = #tpu.core_type<tc>, window_params = [{transform_indices = @transform_0, window_bounds = array<i64: 384, 25>}, {pipeline_mode = #tpu.pipeline_mode<synchronous>, transform_indices = @transform_1, window_bounds = array<i64: 25, 20>}, {pipeline_mode = #tpu.pipeline_mode<synchronous>, transform_indices = @transform_2, window_bounds = array<i64: 1, 20>}, {transform_indices = @transform_3, window_bounds = array<i64: 384, 20>}, {transform_indices = @transform_4, window_bounds = array<i64: 384, 20>}, {transform_indices = @transform_5, window_bounds = array<i64: 384, 20>}]} {
    %c0 = arith.constant 0 : index
    %c0_0 = arith.constant 0 : index
    %0 = vector.load %arg1[%c0, %c0_0] : memref<384x25xbf16, #tpu.memory_space<vmem>>, vector<384x25xbf16>
    %c0_1 = arith.constant 0 : index
    %c0_2 = arith.constant 0 : index
    %1 = vector.load %arg2[%c0_1, %c0_2] : memref<25x20xbf16, #tpu.memory_space<vmem>>, vector<25x20xbf16>
    %cst = arith.constant dense<0.000000e+00> : vector<384x20xf32>
    %2 = tpu.matmul %0, %1, %cst {dimension_numbers = #tpu.dot_dimension_numbers<[1], [0], [0], [1], [0, 0, 1, 1], [], []>} : vector<384x25xbf16>, vector<25x20xbf16>, vector<384x20xf32> -> vector<384x20xf32>
    %c0_3 = arith.constant 0 : index
    %c0_4 = arith.constant 0 : index
    %3 = vector.load %arg3[%c0_3, %c0_4] : memref<1x20xf32, #tpu.memory_space<vmem>>, vector<1x20xf32>
    %4 = vector.broadcast %3 : vector<1x20xf32> to vector<384x20xf32>
    %5 = arith.addf %2, %4 : vector<384x20xf32>
    %cst_5 = arith.constant 1.000000e+00 : f32
    %6 = vector.broadcast %cst_5 : f32 to vector<384x20xf32>
    %7 = arith.mulf %6, %5 : vector<384x20xf32>
    %c0_6 = arith.constant 0 : index
    %c0_7 = arith.constant 0 : index
    %8 = vector.load %arg4[%c0_6, %c0_7] : memref<384x20xf32, #tpu.memory_space<vmem>>, vector<384x20xf32>
    %cst_8 = arith.constant 1.280000e+02 : f32
    %9 = vector.broadcast %cst_8 : f32 to vector<384x20xf32>
    %10 = arith.mulf %9, %7 : vector<384x20xf32>
    %11 = arith.addf %8, %10 : vector<384x20xf32>
    %cst_9 = arith.constant 0.000000e+00 : f32
    %12 = vector.broadcast %cst_9 : f32 to vector<384x20xf32>
    %13 = arith.mulf %12, %8 : vector<384x20xf32>
    %14 = arith.subf %11, %13 : vector<384x20xf32>
    %cst_10 = arith.constant 2.000000e-07 : f32
    %15 = vector.broadcast %cst_10 : f32 to vector<384x20xf32>
    %16 = arith.cmpf oge, %14, %15 : vector<384x20xf32>
    %17 = arith.extui %16 : vector<384x20xi1> to vector<384x20xi32>
    %18 = arith.sitofp %17 : vector<384x20xi32> to vector<384x20xf32>
    %19 = arith.truncf %18 : vector<384x20xf32> to vector<384x20xbf16>
    %c0_11 = arith.constant 0 : index
    %c0_12 = arith.constant 0 : index
    %20 = vector.load %arg5[%c0_11, %c0_12] : memref<384x20xbf16, #tpu.memory_space<vmem>>, vector<384x20xbf16>
    tpu.vector_store %arg5[%c0_11, %c0_12], %19 {strides = array<i32>} : memref<384x20xbf16, #tpu.memory_space<vmem>>, vector<384x20xbf16>,
    %cst_13 = arith.constant 0.000000e+00 : f32
    %21 = vector.broadcast %cst_13 : f32 to vector<384x20xf32>
    %22 = arith.mulf %18, %21 : vector<384x20xf32>
    %cst_14 = arith.constant 1.000000e+00 : f32
    %23 = vector.broadcast %cst_14 : f32 to vector<384x20xf32>
    %24 = arith.subf %23, %18 : vector<384x20xf32>
    %25 = arith.mulf %24, %14 : vector<384x20xf32>
    %26 = arith.addf %22, %25 : vector<384x20xf32>
    %c0_15 = arith.constant 0 : index
    %c0_16 = arith.constant 0 : index
    %27 = vector.load %arg6[%c0_15, %c0_16] : memref<384x20xf32, #tpu.memory_space<vmem>>, vector<384x20xf32>
    tpu.vector_store %arg6[%c0_15, %c0_16], %26 {strides = array<i32>} : memref<384x20xf32, #tpu.memory_space<vmem>>, vector<384x20xf32>,
    return
  }
  func.func @transform_0(%arg0: i32) -> (i32, i32) {
    %c0_i32 = arith.constant 0 : i32
    %c0_i32_0 = arith.constant 0 : i32
    return %arg0, %c0_i32 : i32, i32
  }
  func.func @transform_1(%arg0: i32) -> (i32, i32) {
    %c0_i32 = arith.constant 0 : i32
    %c0_i32_0 = arith.constant 0 : i32
    %c0_i32_1 = arith.constant 0 : i32
    return %c0_i32, %c0_i32_0 : i32, i32
  }
  func.func @transform_2(%arg0: i32) -> (i32, i32) {
    %c0_i32 = arith.constant 0 : i32
    %c0_i32_0 = arith.constant 0 : i32
    %c0_i32_1 = arith.constant 0 : i32
    return %c0_i32, %c0_i32_0 : i32, i32
  }
  func.func @transform_3(%arg0: i32) -> (i32, i32) {
    %c0_i32 = arith.constant 0 : i32
    %c0_i32_0 = arith.constant 0 : i32
    return %arg0, %c0_i32 : i32, i32
  }
  func.func @transform_4(%arg0: i32) -> (i32, i32) {
    %c0_i32 = arith.constant 0 : i32
    %c0_i32_0 = arith.constant 0 : i32
    return %arg0, %c0_i32 : i32, i32
  }
  func.func @transform_5(%arg0: i32) -> (i32, i32) {
    %c0_i32 = arith.constant 0 : i32
    %c0_i32_0 = arith.constant 0 : i32
    return %arg0, %c0_i32 : i32, i32
  }
}

module attributes {stable_mosaic.version = 11 : i64} {
  func.func @_max4_kernel(%arg0: i32, %arg1: memref<24x240xbf16, #tpu.memory_space<vmem>>, %arg2: memref<24x240xbf16, #tpu.memory_space<vmem>>, %arg3: memref<24x240xbf16, #tpu.memory_space<vmem>>, %arg4: memref<24x240xbf16, #tpu.memory_space<vmem>>, %arg5: memref<24x240xbf16, #tpu.memory_space<vmem>>) attributes {dimension_semantics = [#tpu.dimension_semantics<parallel>], iteration_bounds = array<i64: 1>, scalar_prefetch = 0 : i64, scratch_operands = 0 : i64, tpu.core_type = #tpu.core_type<tc>, window_params = [{transform_indices = @transform_0, window_bounds = array<i64: 24, 240>}, {transform_indices = @transform_1, window_bounds = array<i64: 24, 240>}, {transform_indices = @transform_2, window_bounds = array<i64: 24, 240>}, {transform_indices = @transform_3, window_bounds = array<i64: 24, 240>}, {transform_indices = @transform_4, window_bounds = array<i64: 24, 240>}]} {
    %c0 = arith.constant 0 : index
    %c0_0 = arith.constant 0 : index
    %0 = vector.load %arg1[%c0, %c0_0] : memref<24x240xbf16, #tpu.memory_space<vmem>>, vector<24x240xbf16>
    %c0_1 = arith.constant 0 : index
    %c0_2 = arith.constant 0 : index
    %1 = vector.load %arg2[%c0_1, %c0_2] : memref<24x240xbf16, #tpu.memory_space<vmem>>, vector<24x240xbf16>
    %2 = arith.maximumf %0, %1 : vector<24x240xbf16>
    %c0_3 = arith.constant 0 : index
    %c0_4 = arith.constant 0 : index
    %3 = vector.load %arg3[%c0_3, %c0_4] : memref<24x240xbf16, #tpu.memory_space<vmem>>, vector<24x240xbf16>
    %c0_5 = arith.constant 0 : index
    %c0_6 = arith.constant 0 : index
    %4 = vector.load %arg4[%c0_5, %c0_6] : memref<24x240xbf16, #tpu.memory_space<vmem>>, vector<24x240xbf16>
    %5 = arith.maximumf %3, %4 : vector<24x240xbf16>
    %6 = arith.maximumf %2, %5 : vector<24x240xbf16>
    %c0_7 = arith.constant 0 : index
    %c0_8 = arith.constant 0 : index
    %7 = vector.load %arg5[%c0_7, %c0_8] : memref<24x240xbf16, #tpu.memory_space<vmem>>, vector<24x240xbf16>
    tpu.vector_store %arg5[%c0_7, %c0_8], %6 {strides = array<i32>} : memref<24x240xbf16, #tpu.memory_space<vmem>>, vector<24x240xbf16>,
    return
  }
  func.func @transform_0(%arg0: i32) -> (i32, i32) {
    %c0_i32 = arith.constant 0 : i32
    %c0_i32_0 = arith.constant 0 : i32
    return %arg0, %c0_i32 : i32, i32
  }
  func.func @transform_1(%arg0: i32) -> (i32, i32) {
    %c0_i32 = arith.constant 0 : i32
    %c0_i32_0 = arith.constant 0 : i32
    return %arg0, %c0_i32 : i32, i32
  }
  func.func @transform_2(%arg0: i32) -> (i32, i32) {
    %c0_i32 = arith.constant 0 : i32
    %c0_i32_0 = arith.constant 0 : i32
    return %arg0, %c0_i32 : i32, i32
  }
  func.func @transform_3(%arg0: i32) -> (i32, i32) {
    %c0_i32 = arith.constant 0 : i32
    %c0_i32_0 = arith.constant 0 : i32
    return %arg0, %c0_i32 : i32, i32
  }
  func.func @transform_4(%arg0: i32) -> (i32, i32) {
    %c0_i32 = arith.constant 0 : i32
    %c0_i32_0 = arith.constant 0 : i32
    return %arg0, %c0_i32 : i32, i32
  }
}

module attributes {stable_mosaic.version = 11 : i64} {
  func.func @_conv_dwmtj_kernel(%arg0: i32, %arg1: memref<128x500xbf16, #tpu.memory_space<vmem>>, %arg2: memref<500x50xbf16, #tpu.memory_space<vmem>>, %arg3: memref<1x50xf32, #tpu.memory_space<vmem>>, %arg4: memref<128x50xf32, #tpu.memory_space<vmem>>, %arg5: memref<128x50xbf16, #tpu.memory_space<vmem>>, %arg6: memref<128x50xf32, #tpu.memory_space<vmem>>) attributes {dimension_semantics = [#tpu.dimension_semantics<parallel>], iteration_bounds = array<i64: 1>, scalar_prefetch = 0 : i64, scratch_operands = 0 : i64, tpu.core_type = #tpu.core_type<tc>, window_params = [{transform_indices = @transform_0, window_bounds = array<i64: 128, 500>}, {pipeline_mode = #tpu.pipeline_mode<synchronous>, transform_indices = @transform_1, window_bounds = array<i64: 500, 50>}, {pipeline_mode = #tpu.pipeline_mode<synchronous>, transform_indices = @transform_2, window_bounds = array<i64: 1, 50>}, {transform_indices = @transform_3, window_bounds = array<i64: 128, 50>}, {transform_indices = @transform_4, window_bounds = array<i64: 128, 50>}, {transform_indices = @transform_5, window_bounds = array<i64: 128, 50>}]} {
    %c0 = arith.constant 0 : index
    %c0_0 = arith.constant 0 : index
    %0 = vector.load %arg1[%c0, %c0_0] : memref<128x500xbf16, #tpu.memory_space<vmem>>, vector<128x500xbf16>
    %c0_1 = arith.constant 0 : index
    %c0_2 = arith.constant 0 : index
    %1 = vector.load %arg2[%c0_1, %c0_2] : memref<500x50xbf16, #tpu.memory_space<vmem>>, vector<500x50xbf16>
    %cst = arith.constant dense<0.000000e+00> : vector<128x50xf32>
    %2 = tpu.matmul %0, %1, %cst {dimension_numbers = #tpu.dot_dimension_numbers<[1], [0], [0], [1], [0, 0, 1, 1], [], []>} : vector<128x500xbf16>, vector<500x50xbf16>, vector<128x50xf32> -> vector<128x50xf32>
    %c0_3 = arith.constant 0 : index
    %c0_4 = arith.constant 0 : index
    %3 = vector.load %arg3[%c0_3, %c0_4] : memref<1x50xf32, #tpu.memory_space<vmem>>, vector<1x50xf32>
    %4 = vector.broadcast %3 : vector<1x50xf32> to vector<128x50xf32>
    %5 = arith.addf %2, %4 : vector<128x50xf32>
    %cst_5 = arith.constant 1.000000e+01 : f32
    %6 = vector.broadcast %cst_5 : f32 to vector<128x50xf32>
    %7 = arith.mulf %6, %5 : vector<128x50xf32>
    %c0_6 = arith.constant 0 : index
    %c0_7 = arith.constant 0 : index
    %8 = vector.load %arg4[%c0_6, %c0_7] : memref<128x50xf32, #tpu.memory_space<vmem>>, vector<128x50xf32>
    %cst_8 = arith.constant 1.280000e+02 : f32
    %9 = vector.broadcast %cst_8 : f32 to vector<128x50xf32>
    %10 = arith.mulf %9, %7 : vector<128x50xf32>
    %11 = arith.addf %8, %10 : vector<128x50xf32>
    %cst_9 = arith.constant 0.000000e+00 : f32
    %12 = vector.broadcast %cst_9 : f32 to vector<128x50xf32>
    %13 = arith.mulf %12, %8 : vector<128x50xf32>
    %14 = arith.subf %11, %13 : vector<128x50xf32>
    %cst_10 = arith.constant 2.000000e-07 : f32
    %15 = vector.broadcast %cst_10 : f32 to vector<128x50xf32>
    %16 = arith.cmpf oge, %14, %15 : vector<128x50xf32>
    %17 = arith.extui %16 : vector<128x50xi1> to vector<128x50xi32>
    %18 = arith.sitofp %17 : vector<128x50xi32> to vector<128x50xf32>
    %19 = arith.truncf %18 : vector<128x50xf32> to vector<128x50xbf16>
    %c0_11 = arith.constant 0 : index
    %c0_12 = arith.constant 0 : index
    %20 = vector.load %arg5[%c0_11, %c0_12] : memref<128x50xbf16, #tpu.memory_space<vmem>>, vector<128x50xbf16>
    tpu.vector_store %arg5[%c0_11, %c0_12], %19 {strides = array<i32>} : memref<128x50xbf16, #tpu.memory_space<vmem>>, vector<128x50xbf16>,
    %cst_13 = arith.constant 0.000000e+00 : f32
    %21 = vector.broadcast %cst_13 : f32 to vector<128x50xf32>
    %22 = arith.mulf %18, %21 : vector<128x50xf32>
    %cst_14 = arith.constant 1.000000e+00 : f32
    %23 = vector.broadcast %cst_14 : f32 to vector<128x50xf32>
    %24 = arith.subf %23, %18 : vector<128x50xf32>
    %25 = arith.mulf %24, %14 : vector<128x50xf32>
    %26 = arith.addf %22, %25 : vector<128x50xf32>
    %c0_15 = arith.constant 0 : index
    %c0_16 = arith.constant 0 : index
    %27 = vector.load %arg6[%c0_15, %c0_16] : memref<128x50xf32, #tpu.memory_space<vmem>>, vector<128x50xf32>
    tpu.vector_store %arg6[%c0_15, %c0_16], %26 {strides = array<i32>} : memref<128x50xf32, #tpu.memory_space<vmem>>, vector<128x50xf32>,
    return
  }
  func.func @transform_0(%arg0: i32) -> (i32, i32) {
    %c0_i32 = arith.constant 0 : i32
    %c0_i32_0 = arith.constant 0 : i32
    return %arg0, %c0_i32 : i32, i32
  }
  func.func @transform_1(%arg0: i32) -> (i32, i32) {
    %c0_i32 = arith.constant 0 : i32
    %c0_i32_0 = arith.constant 0 : i32
    %c0_i32_1 = arith.constant 0 : i32
    return %c0_i32, %c0_i32_0 : i32, i32
  }
  func.func @transform_2(%arg0: i32) -> (i32, i32) {
    %c0_i32 = arith.constant 0 : i32
    %c0_i32_0 = arith.constant 0 : i32
    %c0_i32_1 = arith.constant 0 : i32
    return %c0_i32, %c0_i32_0 : i32, i32
  }
  func.func @transform_3(%arg0: i32) -> (i32, i32) {
    %c0_i32 = arith.constant 0 : i32
    %c0_i32_0 = arith.constant 0 : i32
    return %arg0, %c0_i32 : i32, i32
  }
  func.func @transform_4(%arg0: i32) -> (i32, i32) {
    %c0_i32 = arith.constant 0 : i32
    %c0_i32_0 = arith.constant 0 : i32
    return %arg0, %c0_i32 : i32, i32
  }
  func.func @transform_5(%arg0: i32) -> (i32, i32) {
    %c0_i32 = arith.constant 0 : i32
    %c0_i32_0 = arith.constant 0 : i32
    return %arg0, %c0_i32 : i32, i32
  }
}

module attributes {stable_mosaic.version = 11 : i64} {
  func.func @_max4_kernel(%arg0: i32, %arg1: memref<8x200xbf16, #tpu.memory_space<vmem>>, %arg2: memref<8x200xbf16, #tpu.memory_space<vmem>>, %arg3: memref<8x200xbf16, #tpu.memory_space<vmem>>, %arg4: memref<8x200xbf16, #tpu.memory_space<vmem>>, %arg5: memref<8x200xbf16, #tpu.memory_space<vmem>>) attributes {dimension_semantics = [#tpu.dimension_semantics<parallel>], iteration_bounds = array<i64: 1>, scalar_prefetch = 0 : i64, scratch_operands = 0 : i64, tpu.core_type = #tpu.core_type<tc>, window_params = [{transform_indices = @transform_0, window_bounds = array<i64: 8, 200>}, {transform_indices = @transform_1, window_bounds = array<i64: 8, 200>}, {transform_indices = @transform_2, window_bounds = array<i64: 8, 200>}, {transform_indices = @transform_3, window_bounds = array<i64: 8, 200>}, {transform_indices = @transform_4, window_bounds = array<i64: 8, 200>}]} {
    %c0 = arith.constant 0 : index
    %c0_0 = arith.constant 0 : index
    %0 = vector.load %arg1[%c0, %c0_0] : memref<8x200xbf16, #tpu.memory_space<vmem>>, vector<8x200xbf16>
    %c0_1 = arith.constant 0 : index
    %c0_2 = arith.constant 0 : index
    %1 = vector.load %arg2[%c0_1, %c0_2] : memref<8x200xbf16, #tpu.memory_space<vmem>>, vector<8x200xbf16>
    %2 = arith.maximumf %0, %1 : vector<8x200xbf16>
    %c0_3 = arith.constant 0 : index
    %c0_4 = arith.constant 0 : index
    %3 = vector.load %arg3[%c0_3, %c0_4] : memref<8x200xbf16, #tpu.memory_space<vmem>>, vector<8x200xbf16>
    %c0_5 = arith.constant 0 : index
    %c0_6 = arith.constant 0 : index
    %4 = vector.load %arg4[%c0_5, %c0_6] : memref<8x200xbf16, #tpu.memory_space<vmem>>, vector<8x200xbf16>
    %5 = arith.maximumf %3, %4 : vector<8x200xbf16>
    %6 = arith.maximumf %2, %5 : vector<8x200xbf16>
    %c0_7 = arith.constant 0 : index
    %c0_8 = arith.constant 0 : index
    %7 = vector.load %arg5[%c0_7, %c0_8] : memref<8x200xbf16, #tpu.memory_space<vmem>>, vector<8x200xbf16>
    tpu.vector_store %arg5[%c0_7, %c0_8], %6 {strides = array<i32>} : memref<8x200xbf16, #tpu.memory_space<vmem>>, vector<8x200xbf16>,
    return
  }
  func.func @transform_0(%arg0: i32) -> (i32, i32) {
    %c0_i32 = arith.constant 0 : i32
    %c0_i32_0 = arith.constant 0 : i32
    return %arg0, %c0_i32 : i32, i32
  }
  func.func @transform_1(%arg0: i32) -> (i32, i32) {
    %c0_i32 = arith.constant 0 : i32
    %c0_i32_0 = arith.constant 0 : i32
    return %arg0, %c0_i32 : i32, i32
  }
  func.func @transform_2(%arg0: i32) -> (i32, i32) {
    %c0_i32 = arith.constant 0 : i32
    %c0_i32_0 = arith.constant 0 : i32
    return %arg0, %c0_i32 : i32, i32
  }
  func.func @transform_3(%arg0: i32) -> (i32, i32) {
    %c0_i32 = arith.constant 0 : i32
    %c0_i32_0 = arith.constant 0 : i32
    return %arg0, %c0_i32 : i32, i32
  }
  func.func @transform_4(%arg0: i32) -> (i32, i32) {
    %c0_i32 = arith.constant 0 : i32
    %c0_i32_0 = arith.constant 0 : i32
    return %arg0, %c0_i32 : i32, i32
  }
}

module attributes {stable_mosaic.version = 11 : i64} {
  func.func @_fc_dwmtj_li_kernel(%arg0: i32, %arg1: memref<2x800xbf16, #tpu.memory_space<vmem>>, %arg2: memref<800x500xbf16, #tpu.memory_space<vmem>>, %arg3: memref<1x500xf32, #tpu.memory_space<vmem>>, %arg4: memref<2x500xf32, #tpu.memory_space<vmem>>, %arg5: memref<500x10xbf16, #tpu.memory_space<vmem>>, %arg6: memref<2x10xf32, #tpu.memory_space<vmem>>, %arg7: memref<2x10xf32, #tpu.memory_space<vmem>>, %arg8: memref<2x500xf32, #tpu.memory_space<vmem>>, %arg9: memref<2x10xf32, #tpu.memory_space<vmem>>, %arg10: memref<2x10xf32, #tpu.memory_space<vmem>>) attributes {dimension_semantics = [#tpu.dimension_semantics<arbitrary>], iteration_bounds = array<i64: 1>, scalar_prefetch = 0 : i64, scratch_operands = 0 : i64, tpu.core_type = #tpu.core_type<tc>, window_params = [{pipeline_mode = #tpu.pipeline_mode<synchronous>, transform_indices = @transform_0, window_bounds = array<i64: 2, 800>}, {pipeline_mode = #tpu.pipeline_mode<synchronous>, transform_indices = @transform_1, window_bounds = array<i64: 800, 500>}, {pipeline_mode = #tpu.pipeline_mode<synchronous>, transform_indices = @transform_2, window_bounds = array<i64: 1, 500>}, {pipeline_mode = #tpu.pipeline_mode<synchronous>, transform_indices = @transform_3, window_bounds = array<i64: 2, 500>}, {pipeline_mode = #tpu.pipeline_mode<synchronous>, transform_indices = @transform_4, window_bounds = array<i64: 500, 10>}, {pipeline_mode = #tpu.pipeline_mode<synchronous>, transform_indices = @transform_5, window_bounds = array<i64: 2, 10>}, {pipeline_mode = #tpu.pipeline_mode<synchronous>, transform_indices = @transform_6, window_bounds = array<i64: 2, 10>}, {pipeline_mode = #tpu.pipeline_mode<synchronous>, transform_indices = @transform_7, window_bounds = array<i64: 2, 500>}, {pipeline_mode = #tpu.pipeline_mode<synchronous>, transform_indices = @transform_8, window_bounds = array<i64: 2, 10>}, {pipeline_mode = #tpu.pipeline_mode<synchronous>, transform_indices = @transform_9, window_bounds = array<i64: 2, 10>}]} {
    %c0 = arith.constant 0 : index
    %c0_0 = arith.constant 0 : index
    %0 = vector.load %arg1[%c0, %c0_0] : memref<2x800xbf16, #tpu.memory_space<vmem>>, vector<2x800xbf16>
    %c0_1 = arith.constant 0 : index
    %c0_2 = arith.constant 0 : index
    %1 = vector.load %arg2[%c0_1, %c0_2] : memref<800x500xbf16, #tpu.memory_space<vmem>>, vector<800x500xbf16>
    %cst = arith.constant dense<0.000000e+00> : vector<2x500xf32>
    %2 = tpu.matmul %0, %1, %cst {dimension_numbers = #tpu.dot_dimension_numbers<[1], [0], [0], [1], [0, 0, 1, 1], [], []>} : vector<2x800xbf16>, vector<800x500xbf16>, vector<2x500xf32> -> vector<2x500xf32>
    %c0_3 = arith.constant 0 : index
    %c0_4 = arith.constant 0 : index
    %3 = vector.load %arg3[%c0_3, %c0_4] : memref<1x500xf32, #tpu.memory_space<vmem>>, vector<1x500xf32>
    %4 = vector.broadcast %3 : vector<1x500xf32> to vector<2x500xf32>
    %5 = arith.addf %2, %4 : vector<2x500xf32>
    %c0_5 = arith.constant 0 : index
    %c0_6 = arith.constant 0 : index
    %6 = vector.load %arg4[%c0_5, %c0_6] : memref<2x500xf32, #tpu.memory_space<vmem>>, vector<2x500xf32>
    %cst_7 = arith.constant 1.280000e+02 : f32
    %7 = vector.broadcast %cst_7 : f32 to vector<2x500xf32>
    %8 = arith.mulf %7, %5 : vector<2x500xf32>
    %9 = arith.addf %6, %8 : vector<2x500xf32>
    %cst_8 = arith.constant 0.000000e+00 : f32
    %10 = vector.broadcast %cst_8 : f32 to vector<2x500xf32>
    %11 = arith.mulf %10, %6 : vector<2x500xf32>
    %12 = arith.subf %9, %11 : vector<2x500xf32>
    %cst_9 = arith.constant 2.000000e-07 : f32
    %13 = vector.broadcast %cst_9 : f32 to vector<2x500xf32>
    %14 = arith.cmpf oge, %12, %13 : vector<2x500xf32>
    %15 = arith.extui %14 : vector<2x500xi1> to vector<2x500xi32>
    %16 = arith.sitofp %15 : vector<2x500xi32> to vector<2x500xf32>
    %cst_10 = arith.constant 0.000000e+00 : f32
    %17 = vector.broadcast %cst_10 : f32 to vector<2x500xf32>
    %18 = arith.mulf %16, %17 : vector<2x500xf32>
    %cst_11 = arith.constant 1.000000e+00 : f32
    %19 = vector.broadcast %cst_11 : f32 to vector<2x500xf32>
    %20 = arith.subf %19, %16 : vector<2x500xf32>
    %21 = arith.mulf %20, %12 : vector<2x500xf32>
    %22 = arith.addf %18, %21 : vector<2x500xf32>
    %c0_12 = arith.constant 0 : index
    %c0_13 = arith.constant 0 : index
    %23 = vector.load %arg8[%c0_12, %c0_13] : memref<2x500xf32, #tpu.memory_space<vmem>>, vector<2x500xf32>
    tpu.vector_store %arg8[%c0_12, %c0_13], %22 {strides = array<i32>} : memref<2x500xf32, #tpu.memory_space<vmem>>, vector<2x500xf32>,
    %cst_14 = arith.constant 0.000000e+00 : f32
    %24 = vector.broadcast %cst_14 : f32 to vector<2x500xf32>
    %25 = arith.maximumf %16, %24 : vector<2x500xf32>
    %c0_15 = arith.constant 0 : index
    %c0_16 = arith.constant 0 : index
    %26 = vector.load %arg7[%c0_15, %c0_16] : memref<2x10xf32, #tpu.memory_space<vmem>>, vector<2x10xf32>
    %27 = arith.truncf %25 : vector<2x500xf32> to vector<2x500xbf16>
    %c0_17 = arith.constant 0 : index
    %c0_18 = arith.constant 0 : index
    %28 = vector.load %arg5[%c0_17, %c0_18] : memref<500x10xbf16, #tpu.memory_space<vmem>>, vector<500x10xbf16>
    %cst_19 = arith.constant dense<0.000000e+00> : vector<2x10xf32>
    %29 = tpu.matmul %27, %28, %cst_19 {dimension_numbers = #tpu.dot_dimension_numbers<[1], [0], [0], [1], [0, 0, 1, 1], [], []>} : vector<2x500xbf16>, vector<500x10xbf16>, vector<2x10xf32> -> vector<2x10xf32>
    %30 = arith.addf %26, %29 : vector<2x10xf32>
    %c0_20 = arith.constant 0 : index
    %c0_21 = arith.constant 0 : index
    %31 = vector.load %arg6[%c0_20, %c0_21] : memref<2x10xf32, #tpu.memory_space<vmem>>, vector<2x10xf32>
    %cst_22 = arith.constant 0.000000e+00 : f32
    %32 = vector.broadcast %cst_22 : f32 to vector<2x10xf32>
    %33 = arith.subf %32, %31 : vector<2x10xf32>
    %34 = arith.addf %33, %30 : vector<2x10xf32>
    %cst_23 = arith.constant 1.000000e-01 : f32
    %35 = vector.broadcast %cst_23 : f32 to vector<2x10xf32>
    %36 = arith.mulf %35, %34 : vector<2x10xf32>
    %37 = arith.addf %31, %36 : vector<2x10xf32>
    %c0_24 = arith.constant 0 : index
    %c0_25 = arith.constant 0 : index
    %38 = vector.load %arg9[%c0_24, %c0_25] : memref<2x10xf32, #tpu.memory_space<vmem>>, vector<2x10xf32>
    tpu.vector_store %arg9[%c0_24, %c0_25], %37 {strides = array<i32>} : memref<2x10xf32, #tpu.memory_space<vmem>>, vector<2x10xf32>,
    %cst_26 = arith.constant 2.000000e-01 : f32
    %39 = vector.broadcast %cst_26 : f32 to vector<2x10xf32>
    %40 = arith.mulf %39, %30 : vector<2x10xf32>
    %41 = arith.subf %30, %40 : vector<2x10xf32>
    %c0_27 = arith.constant 0 : index
    %c0_28 = arith.constant 0 : index
    %42 = vector.load %arg10[%c0_27, %c0_28] : memref<2x10xf32, #tpu.memory_space<vmem>>, vector<2x10xf32>
    tpu.vector_store %arg10[%c0_27, %c0_28], %41 {strides = array<i32>} : memref<2x10xf32, #tpu.memory_space<vmem>>, vector<2x10xf32>,
    return
  }
  func.func @transform_0(%arg0: i32) -> (i32, i32) {
    %c0_i32 = arith.constant 0 : i32
    %c0_i32_0 = arith.constant 0 : i32
    %c0_i32_1 = arith.constant 0 : i32
    return %c0_i32, %c0_i32_0 : i32, i32
  }
  func.func @transform_1(%arg0: i32) -> (i32, i32) {
    %c0_i32 = arith.constant 0 : i32
    %c0_i32_0 = arith.constant 0 : i32
    %c0_i32_1 = arith.constant 0 : i32
    return %c0_i32, %c0_i32_0 : i32, i32
  }
  func.func @transform_2(%arg0: i32) -> (i32, i32) {
    %c0_i32 = arith.constant 0 : i32
    %c0_i32_0 = arith.constant 0 : i32
    %c0_i32_1 = arith.constant 0 : i32
    return %c0_i32, %c0_i32_0 : i32, i32
  }
  func.func @transform_3(%arg0: i32) -> (i32, i32) {
    %c0_i32 = arith.constant 0 : i32
    %c0_i32_0 = arith.constant 0 : i32
    %c0_i32_1 = arith.constant 0 : i32
    return %c0_i32, %c0_i32_0 : i32, i32
  }
  func.func @transform_4(%arg0: i32) -> (i32, i32) {
    %c0_i32 = arith.constant 0 : i32
    %c0_i32_0 = arith.constant 0 : i32
    %c0_i32_1 = arith.constant 0 : i32
    return %c0_i32, %c0_i32_0 : i32, i32
  }
  func.func @transform_5(%arg0: i32) -> (i32, i32) {
    %c0_i32 = arith.constant 0 : i32
    %c0_i32_0 = arith.constant 0 : i32
    %c0_i32_1 = arith.constant 0 : i32
    return %c0_i32, %c0_i32_0 : i32, i32
  }
  func.func @transform_6(%arg0: i32) -> (i32, i32) {
    %c0_i32 = arith.constant 0 : i32
    %c0_i32_0 = arith.constant 0 : i32
    %c0_i32_1 = arith.constant 0 : i32
    return %c0_i32, %c0_i32_0 : i32, i32
  }
  func.func @transform_7(%arg0: i32) -> (i32, i32) {
    %c0_i32 = arith.constant 0 : i32
    %c0_i32_0 = arith.constant 0 : i32
    %c0_i32_1 = arith.constant 0 : i32
    return %c0_i32, %c0_i32_0 : i32, i32
  }
  func.func @transform_8(%arg0: i32) -> (i32, i32) {
    %c0_i32 = arith.constant 0 : i32
    %c0_i32_0 = arith.constant 0 : i32
    %c0_i32_1 = arith.constant 0 : i32
    return %c0_i32, %c0_i32_0 : i32, i32
  }
  func.func @transform_9(%arg0: i32) -> (i32, i32) {
    %c0_i32 = arith.constant 0 : i32
    %c0_i32_0 = arith.constant 0 : i32
    %c0_i32_1 = arith.constant 0 : i32
    return %c0_i32, %c0_i32_0 : i32, i32
  }
}

</mosaic_0001>

<bundles_post_ra>
// kernel: custom-call.1
= control target key start
LH: loop header
LB: loop body
LE: loop exit
PB: predicated region body
PF: predicated region fallthrough
CT: control target
= control target key end

     0   :  { %s6_s0 = inlined_call_operand.vmem [shape: f32[3,2,10], index: 0, kind: output, shape index: {}]  }

// kernel: closed_call.28
= control target key start
LH: loop header
LB: loop body
LE: loop exit
PB: predicated region body
PF: predicated region fallthrough
CT: control target
= control target key end

     0   :  { %vm92_vm0 = vcmask 1043456   ;;  %vm93_vm1 = vcmask 916484   ;;  %s184_s0 = inlined_call_operand.vmem [shape: bf16[24,240], index: 0, kind: input, shape index: {}]   ;;  %s185_s1 = inlined_call_operand.vmem [shape: bf16[24,240], index: 1, kind: input, shape index: {}]   ;;  %s186_s2 = inlined_call_operand.vmem [shape: bf16[24,240], index: 2, kind: input, shape index: {}]   ;;  %s187_s3 = inlined_call_operand.vmem [shape: bf16[24,240], index: 3, kind: input, shape index: {}]   ;;  %s188_s4 = inlined_call_operand.vmem [shape: bf16[24,240], index: 4, kind: output, shape index: {}]  }
   0x1   :  { %v17_v0 = vld [vmem:[%s184_s0] sm:$0xff]  ;;  %v18_v8 = vld [vmem:[%s184_s0 + $0x8] sm:$0xff]  ;;  %v19_v24 = vld [vmem:[%s184_s0 + $0x10] sm:$0xff] }
   0x2   :  { %v20_v1 = vld [vmem:[%s185_s1] sm:$0xff]  ;;  %v23_v3 = vunpack.c.l.bf16 %v17_v0  ;;  %v24_v4 = vunpack.c.h.bf16 %v17_v0  ;;  %v21_v13 = vld [vmem:[%s185_s1 + $0x8] sm:$0xff]  ;;  %v25_v18 = vunpack.c.l.bf16 %v18_v8  ;;  %v26_v19 = vunpack.c.h.bf16 %v18_v8  ;;  %v22_v29 = vld [vmem:[%s185_s1 + $0x10] sm:$0xff] }
   0x3   :  { %v44_v2 = vld [vmem:[%s186_s2] sm:$0xff]  ;;  %v29_v5 = vunpack.c.l.bf16 %v20_v1  ;;  %v30_v6 = vunpack.c.h.bf16 %v20_v1  ;;  %v45_v14 = vld [vmem:[%s186_s2 + $0x8] sm:$0xff]  ;;  %v31_v22 = vunpack.c.l.bf16 %v21_v13  ;;  %v32_v23 = vunpack.c.h.bf16 %v21_v13  ;;  %v46_v30 = vld [vmem:[%s186_s2 + $0x10] sm:$0xff] }
   0x4   :  { %v47_v7 = vld [vmem:[%s187_s3] sm:$0xff]  ;;  %v50_v9 = vunpack.c.l.bf16 %v44_v2  ;;  %v51_v10 = vunpack.c.h.bf16 %v44_v2  ;;  %v48_v15 = vld [vmem:[%s187_s3 + $0x8] sm:$0xff]  ;;  %v52_v25 = vunpack.c.l.bf16 %v45_v14  ;;  %v53_v26 = vunpack.c.h.bf16 %v45_v14  ;;  %v49_v35 = vld [vmem:[%s187_s3 + $0x10] sm:$0xff] }
   0x5   :  { %v56_v11 = vunpack.c.l.bf16 %v47_v7  ;;  %v57_v12 = vunpack.c.h.bf16 %v47_v7  ;;  %v35_v16 = vmax.f32 %v23_v3, %v29_v5  ;;  %v36_v17 = vmax.f32 %v24_v4, %v30_v6  ;;  %vm165_vm2 = vmor %vm93_vm1, %vm92_vm0 }
   0x6   :  { %v58_v27 = vunpack.c.l.bf16 %v48_v15  ;;  %v59_v28 = vunpack.c.h.bf16 %v48_v15  ;;  %v37_v33 = vmax.f32 %v25_v18, %v31_v22  ;;  %v38_v34 = vmax.f32 %v26_v19, %v32_v23 }
   0x7   :  { %v62_v20 = vmax.f32 %v50_v9, %v56_v11  ;;  %v63_v21 = vmax.f32 %v51_v10, %v57_v12  ;;  %v27_v39 = vunpack.c.l.bf16 %v19_v24  ;;  %v28_v40 = vunpack.c.h.bf16 %v19_v24 }
   0x8   :  { %v64_v37 = vmax.f32 %v52_v25, %v58_v27  ;;  %v65_v38 = vmax.f32 %v53_v26, %v59_v28  ;;  %v33_v42 = vunpack.c.l.bf16 %v22_v29  ;;  %v34_v43 = vunpack.c.h.bf16 %v22_v29 }
   0x9   :  { %v83_v31 = vmax.f32 %v35_v16, %v62_v20  ;;  %v84_v32 = vmax.f32 %v36_v17, %v63_v21  ;;  %v54_v44 = vunpack.c.l.bf16 %v46_v30  ;;  %v55_v47 = vunpack.c.h.bf16 %v46_v30 }
   0xa   :  { %v85_v45 = vmax.f32 %v37_v33, %v64_v37  ;;  %v86_v46 = vmax.f32 %v38_v34, %v65_v38  ;;  %v60_v48 = vunpack.c.l.bf16 %v49_v35  ;;  %v39_v49 = vmax.f32 %v27_v39, %v33_v42 }
   0xb   :  { %v89_v41 = vpack.c.bf16 %v84_v32, %v83_v31  ;;  %v40_v50 = vmax.f32 %v28_v40, %v34_v43  ;;  %v61_v51 = vunpack.c.h.bf16 %v49_v35 }
   0xc   :  { %v90_v52 = vpack.c.bf16 %v86_v46, %v85_v45  ;;  %v66_v53 = vmax.f32 %v54_v44, %v60_v48 }
   0xd   :  { %95 = vst.msk [vmem:[%s188_s4] sm:$0xff] %vm165_vm2, %v89_v41  ;;  %v67_v54 = vmax.f32 %v55_v47, %v61_v51 }
   0xe   :  { %96 = vst.msk [vmem:[%s188_s4 + $0x8] sm:$0xff] %vm165_vm2, %v90_v52  ;;  %v87_v55 = vmax.f32 %v39_v49, %v66_v53 }
   0xf   :  { %v88_v56 = vmax.f32 %v40_v50, %v67_v54 }
  0x11   :  { %v91_v57 = vpack.c.bf16 %v88_v56, %v87_v55 }
  0x13   :  { %97 = vst.msk [vmem:[%s188_s4 + $0x10] sm:$0xff] %vm165_vm2, %v91_v57 }

// kernel: closed_call.27
= control target key start
LH: loop header
LB: loop body
LE: loop exit
PB: predicated region body
PF: predicated region fallthrough
CT: control target
= control target key end

     0   :  { %s1756_s18 = smov 0   ;;  %s2259_s0 = inlined_call_operand.vmem [shape: bf16[1152,25], index: 0, kind: input, shape index: {}]   ;;  %s2260_s1 = inlined_call_operand.vmem [shape: bf16[25,20], index: 1, kind: input, shape index: {}]   ;;  %s2261_s2 = inlined_call_operand.vmem [shape: f32[1,20], index: 2, kind: input, shape index: {}]   ;;  %s2262_s3 = inlined_call_operand.vmem [shape: f32[1152,20], index: 3, kind: input, shape index: {}]   ;;  %s2263_s4 = inlined_call_operand.vmem [shape: bf16[1152,20], index: 4, kind: output, shape index: {0}]   ;;  %s2264_s5 = inlined_call_operand.vmem [shape: f32[1152,20], index: 5, kind: output, shape index: {1}]  }
   0x1 LB: > { %s1485_s19 = sadd.s32 4294967295, %s1722_s18   ;;  %p1489_p0 = scmp.ge.s32.totalorder %s1722_s18, 1  ;;  %s1722_s18 = sphi %s1756_s18, %s16_s18  }
   0x2   : > { %p202_p1 = scmp.lt.s32.totalorder %s1722_s18, 4 }
   0x4   : > { %p203_p2 = pnand %p1489_p0, %p202_p1 }
   0x5   : > { %s240_s24 = smul.u32 (!%p203_p2), 48, %s1485_s19 }
   0x6   : > { %206 = sbr.rel (%p203_p2) target bundleno = 305 (0x131), region = 36 }
   0x7   : > { %p241_p3 = scmp.lt.s32.totalorder (!%p203_p2), %s240_s24, 143 }
   0xb   : > { %v1596_v0 = vld [vmem:[%s2260_s1 + $0x8] sm:$0xf]  ;;  %v1697_v1 = vld [vmem:[%s2260_s1 + $0x8] sm:$0x10]  ;;  %vm525_vm0 = vcmask 1043456   ;;  %vm526_vm1 = vcmask 1044480  }
   0xc   : > { %v1597_v2 = vor.u32 %v1697_v1, %v1596_v0  ;;  %v1724_v3 = vmov 65535   ;;  %s2266_s24 = smov (!%p241_p3, %s240_s24), 143  ;;  %v1696_v7 = vld [vmem:[%s2260_s1] sm:$0xff]  ;;  %vm452_vm2 = vcmask 203776   ;;  %vm1093_vm3 = vcmask 158720  }
   0xd   : > { %v527_v4 = vsel %vm525_vm0, 4294967295, %v1724_v3  ;;  %s1490_s27 = sshll.u32 %s2266_s24, 2  ;;  %s1491_s6 = sshll.u32 %s2266_s24, 3  ;;  %v1842_v32 = vld [vmem:[%s2261_s2] ss:$0 sm:$0xff]  ;;  %vm1334_vm4 = vcmask 162816  }
   0xe   : > { %v528_v5 = vsel %vm526_vm1, %v527_v4, 0  ;;  %s1781_s30 = scalar_lea.vmem %s2259_s0, %s1490_s27  ;;  %s1837_s9 = scalar_lea.vmem %s2262_s3, %s1491_s6 }
   0xf   : > { %v530_v6 = vand.u32 %v1597_v2, %v528_v5  ;;  %v1672_v8 = vld [vmem:[%s1781_s30] sm:$0xff]  ;;  %v1678_v9 = vld [vmem:[%s1781_s30 + $0x30] sm:$0xff]  ;;  %v1673_v12 = vld [vmem:[%s1781_s30 + $0x8] sm:$0xff]  ;;  %s1891_s14 = scalar_lea.vmem %s2263_s4, %s1490_s27  ;;  %s1914_s17 = scalar_lea.vmem %s2264_s5, %s1491_s6 }
  0x10   : > { %v1684_v10 = vld [vmem:[%s1781_s30 + $0x60] sm:$0xff]  ;;  %v1690_v11 = vld [vmem:[%s1781_s30 + $0x90] sm:$0xff]  ;;  %v1679_v13 = vld [vmem:[%s1781_s30 + $0x38] sm:$0xff] }
  0x11   : > { %538 = vmatpush.bf16.msra.mxu0 %v530_v6  ;;  %1698 = vmatpush.bf16.msra.mxu1 %v530_v6  ;;  %v1685_v14 = vld [vmem:[%s1781_s30 + $0x68] sm:$0xff]  ;;  %v1691_v15 = vld [vmem:[%s1781_s30 + $0x98] sm:$0xff]  ;;  %v1674_v16 = vld [vmem:[%s1781_s30 + $0x10] sm:$0xff] }
  0x12   : > { %1699 = vmatpush.bf16.msra.mxu2 %v530_v6  ;;  %1700 = vmatpush.bf16.msra.mxu3 %v530_v6  ;;  %v1680_v17 = vld [vmem:[%s1781_s30 + $0x40] sm:$0xff]  ;;  %v1686_v18 = vld [vmem:[%s1781_s30 + $0x70] sm:$0xff]  ;;  %v1675_v20 = vld [vmem:[%s1781_s30 + $0x18] sm:$0xff] }
  0x13   : > { %v1692_v19 = vld [vmem:[%s1781_s30 + $0xa0] sm:$0xff]  ;;  %v1681_v21 = vld [vmem:[%s1781_s30 + $0x48] sm:$0xff]  ;;  %v1687_v22 = vld [vmem:[%s1781_s30 + $0x78] sm:$0xff] }
  0x14   : > { %v1693_v23 = vld [vmem:[%s1781_s30 + $0xa8] sm:$0xff]  ;;  %v1676_v24 = vld [vmem:[%s1781_s30 + $0x20] sm:$0xff]  ;;  %v1682_v25 = vld [vmem:[%s1781_s30 + $0x50] sm:$0xff] }
  0x15   : > { %539 = vmatpush.bf16.msra.mxu0 %v1696_v7  ;;  %1701 = vmatpush.bf16.msra.mxu1 %v1696_v7  ;;  %v1688_v26 = vld [vmem:[%s1781_s30 + $0x80] sm:$0xff]  ;;  %v1694_v27 = vld [vmem:[%s1781_s30 + $0xb0] sm:$0xff]  ;;  %v1677_v28 = vld [vmem:[%s1781_s30 + $0x28] sm:$0xff] }
  0x16   : > { %1702 = vmatpush.bf16.msra.mxu2 %v1696_v7  ;;  %1703 = vmatpush.bf16.msra.mxu3 %v1696_v7  ;;  %v1683_v29 = vld [vmem:[%s1781_s30 + $0x58] sm:$0xff]  ;;  %v1689_v30 = vld [vmem:[%s1781_s30 + $0x88] sm:$0xff]  ;;  %v661_v33 = vld [vmem:[%s1837_s9] sm:$0xff] }
  0x17   : > { %v1695_v31 = vld [vmem:[%s1781_s30 + $0xb8] sm:$0xff]  ;;  %v673_v36 = vld [vmem:[%s1837_s9 + $0x60] sm:$0xff]  ;;  %v805_v39 = vmul.f32 0.0, %v661_v33  ;;  %v662_v45 = vld [vmem:[%s1837_s9 + $0x8] sm:$0xff] }
  0x18   : > { %1598 = vmatmul.msk.bf16.vlgmr.msra.gmra.mxu0 %vm452_vm2, %v1672_v8  ;;  %1604 = vmatmul.msk.bf16.vlgmr.msra.gmra.mxu1 %vm452_vm2, %v1678_v9  ;;  %v685_v40 = vld [vmem:[%s1837_s9 + $0xc0] sm:$0xff]  ;;  %v817_v44 = vmul.f32 0.0, %v673_v36  ;;  %v674_v46 = vld [vmem:[%s1837_s9 + $0x68] sm:$0xff]  ;;  %v1859_v49 = vld [vmem:[%s1837_s9 + $0x10] sm:$0xff]  ;;  %v806_v56 = vmul.f32 0.0, %v662_v45  ;;  %v1725_v9 = vmov 0.0  }
  0x19   : > { %1610 = vmatmul.msk.bf16.vlgmr.msra.gmra.mxu2 %vm452_vm2, %v1684_v10  ;;  %1616 = vmatmul.msk.bf16.vlgmr.msra.gmra.mxu3 %vm452_vm2, %v1690_v11  ;;  %v697_v41 = vld [vmem:[%s1837_s9 + $0x120] sm:$0xff]  ;;  %v1853_v47 = vld [vmem:[%s1837_s9 + $0xc8] sm:$0xff]  ;;  %v829_v52 = vmul.f32 0.0, %v685_v40  ;;  %v1862_v54 = vld [vmem:[%s1837_s9 + $0x70] sm:$0xff]  ;;  %v818_v57 = vmul.f32 0.0, %v674_v46  ;;  %v1874_v0 = vmul.f32 0.0, %v1859_v49 }
  0x1a   : > { %v1856_v48 = vld [vmem:[%s1837_s9 + $0x128] sm:$0xff]  ;;  %v841_v53 = vmul.f32 0.0, %v697_v41  ;;  %v1865_v55 = vld [vmem:[%s1837_s9 + $0xd0] sm:$0xff]  ;;  %v1868_v58 = vmul.f32 0.0, %v1853_v47  ;;  %v1879_v5 = vmul.f32 0.0, %v1862_v54 }
  0x1b   : > { %v1871_v63 = vmul.f32 0.0, %v1856_v48  ;;  %v1882_v6 = vmul.f32 0.0, %v1865_v55 }
  0x28   : > { %1599 = vmatmul.msk.bf16.gmra.mxu0 %vm452_vm2, %v1673_v12  ;;  %1605 = vmatmul.msk.bf16.gmra.mxu1 %vm452_vm2, %v1679_v13 }
  0x29   : > { %1611 = vmatmul.msk.bf16.gmra.mxu2 %vm452_vm2, %v1685_v14  ;;  %1617 = vmatmul.msk.bf16.gmra.mxu3 %vm452_vm2, %v1691_v15  ;;  %v1896_v14 = vld [vmem:[%s1837_s9 + $0x130] sm:$0xff] }
  0x38   : > { %1600 = vmatmul.msk.bf16.gmra.mxu0 %vm452_vm2, %v1674_v16  ;;  %1606 = vmatmul.msk.bf16.gmra.mxu1 %vm452_vm2, %v1680_v17 }
  0x39   : > { %1612 = vmatmul.msk.bf16.gmra.mxu2 %vm452_vm2, %v1686_v18  ;;  %1618 = vmatmul.msk.bf16.gmra.mxu3 %vm452_vm2, %v1692_v19  ;;  %v1899_v19 = vld [vmem:[%s1837_s9 + $0x18] sm:$0xff] }
  0x48   : > { %1601 = vmatmul.msk.bf16.gmra.mxu0 %vm452_vm2, %v1675_v20  ;;  %1607 = vmatmul.msk.bf16.gmra.mxu1 %vm452_vm2, %v1681_v21 }
  0x49   : > { %1613 = vmatmul.msk.bf16.gmra.mxu2 %vm452_vm2, %v1687_v22  ;;  %1619 = vmatmul.msk.bf16.gmra.mxu3 %vm452_vm2, %v1693_v23 }
  0x58   : > { %1602 = vmatmul.msk.bf16.gmra.mxu0 %vm452_vm2, %v1676_v24  ;;  %1608 = vmatmul.msk.bf16.gmra.mxu1 %vm452_vm2, %v1682_v25  ;;  %v1902_v24 = vld [vmem:[%s1837_s9 + $0x78] sm:$0xff] }
  0x59   : > { %1614 = vmatmul.msk.bf16.gmra.mxu2 %vm452_vm2, %v1688_v26  ;;  %1620 = vmatmul.msk.bf16.gmra.mxu3 %vm452_vm2, %v1694_v27 }
  0x68   : > { %1603 = vmatmul.msk.bf16.gmra.mxu0 %vm452_vm2, %v1677_v28  ;;  %1609 = vmatmul.msk.bf16.gmra.mxu1 %vm452_vm2, %v1683_v29  ;;  %v1907_v28 = vmul.f32 0.0, %v1896_v14 }
  0x69   : > { %1615 = vmatmul.msk.bf16.gmra.mxu2 %vm452_vm2, %v1689_v30  ;;  %1621 = vmatmul.msk.bf16.gmra.mxu3 %vm452_vm2, %v1695_v31 }
  0x95   : > { %v541_v34 = vpop.f32.mrf.mxu0  ;;  %v571_v35 = vpop.f32.mrf.mxu1 }
  0x96   : > { %v542_v37 = vadd.f32 %v1842_v32, %v541_v34  ;;  %v572_v38 = vadd.f32 %v1842_v32, %v571_v35 }
  0x98   : > { %v709_v42 = vmul.f32 128.0, %v542_v37  ;;  %v721_v43 = vmul.f32 128.0, %v572_v38 }
  0x9a   : > { %v757_v50 = vadd.f32 %v709_v42, %v661_v33  ;;  %v769_v51 = vadd.f32 %v721_v43, %v673_v36  ;;  %v1919_v33 = vmul.f32 0.0, %v1899_v19 }
  0x9c   : > { %v853_v59 = vsub.f32 %v757_v50, %v805_v39  ;;  %v865_v60 = vsub.f32 %v769_v51, %v817_v44  ;;  %v601_v61 = vpop.f32.mrf.mxu2  ;;  %v631_v62 = vpop.f32.mrf.mxu3  ;;  %v1922_v39 = vmul.f32 0.0, %v1902_v24 }
  0x9d   : > { %v602_v1 = vadd.f32 %v1842_v32, %v601_v61  ;;  %v632_v2 = vadd.f32 %v1842_v32, %v631_v62  ;;  %v543_v3 = vpop.f32.mrf.mxu0  ;;  %v573_v4 = vpop.f32.mrf.mxu1 }
  0x9e   : > { %vm901_vm5 = vcmp.ge.f32.partialorder %v853_v59, 2e-07  ;;  %vm913_vm6 = vcmp.ge.f32.partialorder %v865_v60, 2e-07  ;;  %v544_v7 = vadd.f32 %v1842_v32, %v543_v3  ;;  %v574_v8 = vadd.f32 %v1842_v32, %v573_v4 }
  0x9f   : > { %v1622_v10 = vsel %vm901_vm5, 1.0, %v1725_v9  ;;  %v1634_v11 = vsel %vm913_vm6, 1.0, %v1725_v9  ;;  %v733_v12 = vmul.f32 128.0, %v602_v1  ;;  %v745_v13 = vmul.f32 128.0, %v632_v2 }
  0xa0   : > { %v1045_v15 = vpack.c.bf16 %v1622_v10, %v1622_v10  ;;  %v1142_v16 = vmul.f32 0.0, %v1622_v10  ;;  %v1190_v17 = vsub.f32 1.0, %v1622_v10  ;;  %v1057_v18 = vpack.c.bf16 %v1634_v11, %v1634_v11 }
  0xa1   : > { %v1154_v20 = vmul.f32 0.0, %v1634_v11  ;;  %v1202_v21 = vsub.f32 1.0, %v1634_v11  ;;  %v781_v22 = vadd.f32 %v733_v12, %v685_v40  ;;  %v793_v23 = vadd.f32 %v745_v13, %v697_v41 }
  0xa2   : > { %1094 = vst.msk [vmem:[%s1891_s14] sm:$0xf] %vm1093_vm3, %v1045_v15  ;;  %v1238_v25 = vmul.f32 %v1190_v17, %v853_v59  ;;  %v710_v26 = vmul.f32 128.0, %v544_v7  ;;  %v722_v27 = vmul.f32 128.0, %v574_v8 }
  0xa3   : > { %1106 = vst.msk [vmem:[%s1891_s14 + $0x30] sm:$0xf] %vm1093_vm3, %v1057_v18  ;;  %v1250_v29 = vmul.f32 %v1202_v21, %v865_v60  ;;  %v877_v30 = vsub.f32 %v781_v22, %v829_v52  ;;  %v889_v31 = vsub.f32 %v793_v23, %v841_v53 }
  0xa4   : > { %v1286_v34 = vadd.f32 %v1238_v25, %v1142_v16  ;;  %v758_v35 = vadd.f32 %v710_v26, %v662_v45  ;;  %v770_v36 = vadd.f32 %v722_v27, %v674_v46  ;;  %v603_v37 = vpop.f32.mrf.mxu2  ;;  %v633_v38 = vpop.f32.mrf.mxu3 }
  0xa5   : > { %v1298_v40 = vadd.f32 %v1250_v29, %v1154_v20  ;;  %vm925_vm7 = vcmp.ge.f32.partialorder %v877_v30, 2e-07  ;;  %vm937_vm8 = vcmp.ge.f32.partialorder %v889_v31, 2e-07  ;;  %v604_v41 = vadd.f32 %v1842_v32, %v603_v37  ;;  %v546_v42 = vpop.f32.mrf.mxu0  ;;  %v576_v59 = vpop.f32.mrf.mxu1 }
  0xa6   : > { %1335 = vst.msk [vmem:[%s1914_s17] sm:$0xff] %vm1334_vm4, %v1286_v34  ;;  %v1646_v43 = vsel %vm925_vm7, 1.0, %v1725_v9  ;;  %v1658_v44 = vsel %vm937_vm8, 1.0, %v1725_v9  ;;  %v854_v45 = vsub.f32 %v758_v35, %v806_v56  ;;  %v866_v46 = vsub.f32 %v770_v36, %v818_v57 }
  0xa7   : > { %1347 = vst.msk [vmem:[%s1914_s17 + $0x60] sm:$0xff] %vm1334_vm4, %v1298_v40  ;;  %v1069_v50 = vpack.c.bf16 %v1646_v43, %v1646_v43  ;;  %v1166_v51 = vmul.f32 0.0, %v1646_v43  ;;  %v1214_v52 = vsub.f32 1.0, %v1646_v43  ;;  %v1081_v53 = vpack.c.bf16 %v1658_v44, %v1658_v44 }
  0xa8   : > { %v1178_v60 = vmul.f32 0.0, %v1658_v44  ;;  %v1226_v61 = vsub.f32 1.0, %v1658_v44  ;;  %vm902_vm9 = vcmp.ge.f32.partialorder %v854_v45, 2e-07  ;;  %vm914_vm10 = vcmp.ge.f32.partialorder %v866_v46, 2e-07 }
  0xa9   : > { %1118 = vst.msk [vmem:[%s1891_s14 + $0x60] sm:$0xf] %vm1093_vm3, %v1069_v50  ;;  %v1262_v62 = vmul.f32 %v1214_v52, %v877_v30  ;;  %v1623_v1 = vsel %vm902_vm9, 1.0, %v1725_v9  ;;  %v1635_v56 = vsel %vm914_vm10, 1.0, %v1725_v9  ;;  %v734_v57 = vmul.f32 128.0, %v604_v41 }
  0xaa   : > { %1130 = vst.msk [vmem:[%s1891_s14 + $0x90] sm:$0xf] %vm1093_vm3, %v1081_v53  ;;  %v1274_v2 = vmul.f32 %v1226_v61, %v889_v31  ;;  %v1046_v3 = vpack.c.bf16 %v1623_v1, %v1623_v1  ;;  %v1143_v4 = vmul.f32 0.0, %v1623_v1  ;;  %v1191_v7 = vsub.f32 1.0, %v1623_v1 }
  0xab   : > { %v1310_v8 = vadd.f32 %v1262_v62, %v1166_v51  ;;  %v1058_v10 = vpack.c.bf16 %v1635_v56, %v1635_v56  ;;  %v1155_v11 = vmul.f32 0.0, %v1635_v56  ;;  %v1203_v12 = vsub.f32 1.0, %v1635_v56 }
  0xac   : > { %v1322_v13 = vadd.f32 %v1274_v2, %v1178_v60  ;;  %1095 = vst.msk [vmem:[%s1891_s14 + $0x4] sm:$0xf] %vm1093_vm3, %v1046_v3  ;;  %v1239_v15 = vmul.f32 %v1191_v7, %v854_v45  ;;  %v782_v16 = vadd.f32 %v734_v57, %v1853_v47  ;;  %v634_v17 = vadd.f32 %v1842_v32, %v633_v38  ;;  %v606_v18 = vpop.f32.mrf.mxu2  ;;  %v636_v20 = vpop.f32.mrf.mxu3 }
  0xad   : > { %1359 = vst.msk [vmem:[%s1914_s17 + $0xc0] sm:$0xff] %vm1334_vm4, %v1310_v8  ;;  %v1251_v21 = vmul.f32 %v1203_v12, %v866_v46  ;;  %v547_v22 = vadd.f32 %v1842_v32, %v546_v42  ;;  %v577_v23 = vadd.f32 %v1842_v32, %v576_v59  ;;  %v607_v25 = vadd.f32 %v1842_v32, %v606_v18  ;;  %v548_v26 = vpop.f32.mrf.mxu0  ;;  %v578_v44 = vpop.f32.mrf.mxu1 }
  0xae   : > { %1371 = vst.msk [vmem:[%s1914_s17 + $0x120] sm:$0xff] %vm1334_vm4, %v1322_v13  ;;  %v1287_v27 = vadd.f32 %v1239_v15, %v1143_v4  ;;  %v878_v47 = vsub.f32 %v782_v16, %v1868_v58  ;;  %v746_v29 = vmul.f32 128.0, %v634_v17  ;;  %v637_v30 = vadd.f32 %v1842_v32, %v636_v20  ;;  %v688_v20 = vld [vmem:[%s1837_s9 + $0xd8] sm:$0xff] }
  0xaf   : > { %1107 = vst.msk [vmem:[%s1891_s14 + $0x34] sm:$0xf] %vm1093_vm3, %v1058_v10  ;;  %v1299_v31 = vadd.f32 %v1251_v21, %v1155_v11  ;;  %v711_v34 = vmul.f32 128.0, %v547_v22  ;;  %v723_v35 = vmul.f32 128.0, %v577_v23  ;;  %v735_v36 = vmul.f32 128.0, %v607_v25 }
  0xb0   : > { %1336 = vst.msk [vmem:[%s1914_s17 + $0x8] sm:$0xff] %vm1334_vm4, %v1287_v27  ;;  %vm926_vm11 = vcmp.ge.f32.partialorder %v878_v47, 2e-07  ;;  %v794_v37 = vadd.f32 %v746_v29, %v1856_v48  ;;  %v747_v38 = vmul.f32 128.0, %v637_v30  ;;  %v549_v40 = vadd.f32 %v1842_v32, %v548_v26  ;;  %v700_v27 = vld [vmem:[%s1837_s9 + $0x138] sm:$0xff] }
  0xb1   : > { %1348 = vst.msk [vmem:[%s1914_s17 + $0x68] sm:$0xff] %vm1334_vm4, %v1299_v31  ;;  %v1647_v58 = vsel %vm926_vm11, 1.0, %v1725_v9  ;;  %v759_v41 = vadd.f32 %v711_v34, %v1859_v49  ;;  %v771_v42 = vadd.f32 %v723_v35, %v1862_v54  ;;  %v783_v43 = vadd.f32 %v735_v36, %v1865_v55 }
  0xb2   : > { %v1070_v45 = vpack.c.bf16 %v1647_v58, %v1647_v58  ;;  %v1167_v46 = vmul.f32 0.0, %v1647_v58  ;;  %v1215_v50 = vsub.f32 1.0, %v1647_v58  ;;  %v890_v48 = vsub.f32 %v794_v37, %v1871_v63 }
  0xb3   : > { %v855_v51 = vsub.f32 %v759_v41, %v1874_v0  ;;  %v867_v52 = vsub.f32 %v771_v42, %v1879_v5  ;;  %v879_v53 = vsub.f32 %v783_v43, %v1882_v6  ;;  %v795_v59 = vadd.f32 %v747_v38, %v1896_v14 }
  0xb4   : > { %1119 = vst.msk [vmem:[%s1891_s14 + $0x64] sm:$0xf] %vm1093_vm3, %v1070_v45  ;;  %v1263_v49 = vmul.f32 %v1215_v50, %v878_v47  ;;  %vm938_vm12 = vcmp.ge.f32.partialorder %v890_v48, 2e-07  ;;  %v712_v54 = vmul.f32 128.0, %v549_v40  ;;  %v579_v55 = vadd.f32 %v1842_v32, %v578_v44  ;;  %v608_v13 = vpop.f32.mrf.mxu2  ;;  %v638_v21 = vpop.f32.mrf.mxu3  ;;  %v677_v44 = vld [vmem:[%s1837_s9 + $0x80] sm:$0xff] }
  0xb5   : > { %v1659_v60 = vsel %vm938_vm12, 1.0, %v1725_v9  ;;  %vm903_vm13 = vcmp.ge.f32.partialorder %v855_v51, 2e-07  ;;  %vm915_vm14 = vcmp.ge.f32.partialorder %v867_v52, 2e-07  ;;  %v891_v63 = vsub.f32 %v795_v59, %v1907_v28 }
  0xb6   : > { %v1311_v0 = vadd.f32 %v1263_v49, %v1167_v46  ;;  %v1082_v5 = vpack.c.bf16 %v1659_v60, %v1659_v60  ;;  %v1179_v6 = vmul.f32 0.0, %v1659_v60  ;;  %v1227_v61 = vsub.f32 1.0, %v1659_v60  ;;  %v581_v49 = vpop.f32.mrf.mxu1 }
  0xb7   : > { %v1624_v14 = vsel %vm903_vm13, 1.0, %v1725_v9  ;;  %v1636_v62 = vsel %vm915_vm14, 1.0, %v1725_v9  ;;  %vm927_vm15 = vcmp.ge.f32.partialorder %v879_v53, 2e-07  ;;  %vm939_vm0 = vcmp.ge.f32.partialorder %v891_v63, 2e-07 }
  0xb8   : > { %1360 = vst.msk [vmem:[%s1914_s17 + $0xc8] sm:$0xff] %vm1334_vm4, %v1311_v0  ;;  %v1275_v1 = vmul.f32 %v1227_v61, %v890_v48  ;;  %v1047_v56 = vpack.c.bf16 %v1624_v14, %v1624_v14  ;;  %v1144_v57 = vmul.f32 0.0, %v1624_v14  ;;  %v1192_v2 = vsub.f32 1.0, %v1624_v14 }
  0xb9   : > { %1131 = vst.msk [vmem:[%s1891_s14 + $0x94] sm:$0xf] %vm1093_vm3, %v1082_v5  ;;  %v1059_v28 = vpack.c.bf16 %v1636_v62, %v1636_v62  ;;  %v1156_v3 = vmul.f32 0.0, %v1636_v62  ;;  %v1204_v4 = vsub.f32 1.0, %v1636_v62  ;;  %v1648_v7 = vsel %vm927_vm15, 1.0, %v1725_v9 }
  0xba   : > { %v1323_v8 = vadd.f32 %v1275_v1, %v1179_v6  ;;  %1096 = vst.msk [vmem:[%s1891_s14 + $0x8] sm:$0xf] %vm1093_vm3, %v1047_v56  ;;  %v1240_v10 = vmul.f32 %v1192_v2, %v855_v51  ;;  %v1071_v11 = vpack.c.bf16 %v1648_v7, %v1648_v7  ;;  %v1168_v12 = vmul.f32 0.0, %v1648_v7  ;;  %v551_v51 = vpop.f32.mrf.mxu0 }
  0xbb   : > { %1108 = vst.msk [vmem:[%s1891_s14 + $0x38] sm:$0xf] %vm1093_vm3, %v1059_v28  ;;  %v1252_v15 = vmul.f32 %v1204_v4, %v867_v52  ;;  %v1216_v16 = vsub.f32 1.0, %v1648_v7  ;;  %v1660_v17 = vsel %vm939_vm0, 1.0, %v1725_v9  ;;  %v760_v18 = vadd.f32 %v712_v54, %v1899_v19  ;;  %v689_v7 = vld [vmem:[%s1837_s9 + $0xe0] sm:$0xff] }
  0xbc   : > { %1372 = vst.msk [vmem:[%s1914_s17 + $0x128] sm:$0xff] %vm1334_vm4, %v1323_v8  ;;  %v1288_v22 = vadd.f32 %v1240_v10, %v1144_v57  ;;  %v1083_v23 = vpack.c.bf16 %v1660_v17, %v1660_v17  ;;  %v1180_v25 = vmul.f32 0.0, %v1660_v17  ;;  %v1228_v26 = vsub.f32 1.0, %v1660_v17  ;;  %v611_v6 = vpop.f32.mrf.mxu2 }
  0xbd   : > { %v1300_v47 = vadd.f32 %v1252_v15, %v1156_v3  ;;  %1120 = vst.msk [vmem:[%s1891_s14 + $0x68] sm:$0xf] %vm1093_vm3, %v1071_v11  ;;  %v1264_v29 = vmul.f32 %v1216_v16, %v879_v53  ;;  %v856_v30 = vsub.f32 %v760_v18, %v1919_v33  ;;  %v724_v31 = vmul.f32 128.0, %v579_v55  ;;  %v665_v33 = vld [vmem:[%s1837_s9 + $0x20] sm:$0xff] }
  0xbe   : > { %1337 = vst.msk [vmem:[%s1914_s17 + $0x10] sm:$0xff] %vm1334_vm4, %v1288_v22  ;;  %v1276_v19 = vmul.f32 %v1228_v26, %v891_v63  ;;  %v609_v34 = vadd.f32 %v1842_v32, %v608_v13  ;;  %v832_v35 = vmul.f32 0.0, %v688_v20  ;;  %v639_v36 = vadd.f32 %v1842_v32, %v638_v21  ;;  %v641_v13 = vpop.f32.mrf.mxu3  ;;  %v701_v15 = vld [vmem:[%s1837_s9 + $0x140] sm:$0xff] }
  0xbf   : > { %1349 = vst.msk [vmem:[%s1914_s17 + $0x70] sm:$0xff] %vm1334_vm4, %v1300_v47  ;;  %v1312_v37 = vadd.f32 %v1264_v29, %v1168_v12  ;;  %vm904_vm1 = vcmp.ge.f32.partialorder %v856_v30, 2e-07  ;;  %v772_v38 = vadd.f32 %v724_v31, %v1902_v24  ;;  %v844_v40 = vmul.f32 0.0, %v700_v27 }
  0xc0   : > { %1132 = vst.msk [vmem:[%s1891_s14 + $0x98] sm:$0xf] %vm1093_vm3, %v1083_v23  ;;  %v1324_v58 = vadd.f32 %v1276_v19, %v1180_v25  ;;  %v1625_v41 = vsel %vm904_vm1, 1.0, %v1725_v9  ;;  %v736_v42 = vmul.f32 128.0, %v609_v34  ;;  %v748_v43 = vmul.f32 128.0, %v639_v36  ;;  %v583_v36 = vpop.f32.mrf.mxu1 }
  0xc1   : > { %1361 = vst.msk [vmem:[%s1914_s17 + $0xd0] sm:$0xff] %vm1334_vm4, %v1312_v37  ;;  %v1048_v45 = vpack.c.bf16 %v1625_v41, %v1625_v41  ;;  %v1145_v46 = vmul.f32 0.0, %v1625_v41  ;;  %v1193_v50 = vsub.f32 1.0, %v1625_v41  ;;  %v868_v48 = vsub.f32 %v772_v38, %v1922_v39 }
  0xc2   : > { %1373 = vst.msk [vmem:[%s1914_s17 + $0x130] sm:$0xff] %vm1334_vm4, %v1324_v58  ;;  %v784_v24 = vadd.f32 %v736_v42, %v688_v20  ;;  %v796_v52 = vadd.f32 %v748_v43, %v700_v27  ;;  %v552_v53 = vadd.f32 %v1842_v32, %v551_v51  ;;  %v809_v59 = vmul.f32 0.0, %v665_v33  ;;  %v553_v29 = vpop.f32.mrf.mxu0 }
  0xc3   : > { %1097 = vst.msk [vmem:[%s1891_s14 + $0xc] sm:$0xf] %vm1093_vm3, %v1048_v45  ;;  %v1241_v54 = vmul.f32 %v1193_v50, %v856_v30  ;;  %vm916_vm2 = vcmp.ge.f32.partialorder %v868_v48, 2e-07  ;;  %v582_v55 = vadd.f32 %v1842_v32, %v581_v49  ;;  %v821_v60 = vmul.f32 0.0, %v677_v44  ;;  %v678_v50 = vld [vmem:[%s1837_s9 + $0x88] sm:$0xff] }
  0xc4   : > { %v1637_v63 = vsel %vm916_vm2, 1.0, %v1725_v9  ;;  %v880_v39 = vsub.f32 %v784_v24, %v832_v35  ;;  %v892_v0 = vsub.f32 %v796_v52, %v844_v40  ;;  %v713_v5 = vmul.f32 128.0, %v552_v53  ;;  %v666_v35 = vld [vmem:[%s1837_s9 + $0x28] sm:$0xff] }
  0xc5   : > { %v1289_v61 = vadd.f32 %v1241_v54, %v1145_v46  ;;  %v1060_v14 = vpack.c.bf16 %v1637_v63, %v1637_v63  ;;  %v1157_v62 = vmul.f32 0.0, %v1637_v63  ;;  %v1205_v1 = vsub.f32 1.0, %v1637_v63  ;;  %v613_v54 = vpop.f32.mrf.mxu2 }
  0xc6   : > { %vm928_vm5 = vcmp.ge.f32.partialorder %v880_v39, 2e-07  ;;  %vm940_vm6 = vcmp.ge.f32.partialorder %v892_v0, 2e-07  ;;  %v761_v56 = vadd.f32 %v713_v5, %v665_v33  ;;  %v725_v57 = vmul.f32 128.0, %v582_v55  ;;  %v690_v55 = vld [vmem:[%s1837_s9 + $0xe8] sm:$0xff]  ;;  %v643_v5 = vpop.f32.mrf.mxu3 }
  0xc7   : > { %1338 = vst.msk [vmem:[%s1914_s17 + $0x18] sm:$0xff] %vm1334_vm4, %v1289_v61  ;;  %v1253_v2 = vmul.f32 %v1205_v1, %v868_v48  ;;  %v1649_v28 = vsel %vm928_vm5, 1.0, %v1725_v9  ;;  %v1661_v3 = vsel %vm940_vm6, 1.0, %v1725_v9  ;;  %v612_v4 = vadd.f32 %v1842_v32, %v611_v6  ;;  %v702_v1 = vld [vmem:[%s1837_s9 + $0x148] sm:$0xff] }
  0xc8   : > { %1109 = vst.msk [vmem:[%s1891_s14 + $0x3c] sm:$0xf] %vm1093_vm3, %v1060_v14  ;;  %v1072_v8 = vpack.c.bf16 %v1649_v28, %v1649_v28  ;;  %v1169_v10 = vmul.f32 0.0, %v1649_v28  ;;  %v1217_v11 = vsub.f32 1.0, %v1649_v28  ;;  %v1084_v12 = vpack.c.bf16 %v1661_v3, %v1661_v3 }
  0xc9   : > { %v1301_v16 = vadd.f32 %v1253_v2, %v1157_v62  ;;  %v1181_v17 = vmul.f32 0.0, %v1661_v3  ;;  %v1229_v18 = vsub.f32 1.0, %v1661_v3  ;;  %v857_v20 = vsub.f32 %v761_v56, %v809_v59 }
  0xca   : > { %1121 = vst.msk [vmem:[%s1891_s14 + $0x6c] sm:$0xf] %vm1093_vm3, %v1072_v8  ;;  %v1265_v21 = vmul.f32 %v1217_v11, %v880_v39  ;;  %v773_v22 = vadd.f32 %v725_v57, %v677_v44  ;;  %v737_v23 = vmul.f32 128.0, %v612_v4  ;;  %v833_v25 = vmul.f32 0.0, %v689_v7 }
  0xcb   : > { %1350 = vst.msk [vmem:[%s1914_s17 + $0x78] sm:$0xff] %vm1334_vm4, %v1301_v16  ;;  %v1277_v26 = vmul.f32 %v1229_v18, %v892_v0  ;;  %vm905_vm7 = vcmp.ge.f32.partialorder %v857_v20, 2e-07  ;;  %v642_v27 = vadd.f32 %v1842_v32, %v641_v13  ;;  %v845_v47 = vmul.f32 0.0, %v701_v15 }
  0xcc   : > { %v1313_v30 = vadd.f32 %v1265_v21, %v1169_v10  ;;  %1133 = vst.msk [vmem:[%s1891_s14 + $0x9c] sm:$0xf] %vm1093_vm3, %v1084_v12  ;;  %v1626_v31 = vsel %vm905_vm7, 1.0, %v1725_v9  ;;  %v869_v19 = vsub.f32 %v773_v22, %v821_v60  ;;  %v785_v34 = vadd.f32 %v737_v23, %v689_v7  ;;  %v667_v23 = vld [vmem:[%s1837_s9 + $0x30] sm:$0xff] }
  0xcd   : > { %v1325_v37 = vadd.f32 %v1277_v26, %v1181_v17  ;;  %v1049_v38 = vpack.c.bf16 %v1626_v31, %v1626_v31  ;;  %v1146_v40 = vmul.f32 0.0, %v1626_v31  ;;  %v1194_v33 = vsub.f32 1.0, %v1626_v31  ;;  %v556_v17 = vpop.f32.mrf.mxu0 }
  0xce   : > { %1362 = vst.msk [vmem:[%s1914_s17 + $0xd8] sm:$0xff] %vm1334_vm4, %v1313_v30  ;;  %vm917_vm8 = vcmp.ge.f32.partialorder %v869_v19, 2e-07  ;;  %v881_v58 = vsub.f32 %v785_v34, %v833_v25  ;;  %v749_v41 = vmul.f32 128.0, %v642_v27  ;;  %v554_v42 = vadd.f32 %v1842_v32, %v553_v29 }
  0xcf   : > { %1374 = vst.msk [vmem:[%s1914_s17 + $0x138] sm:$0xff] %vm1334_vm4, %v1325_v37  ;;  %v1242_v43 = vmul.f32 %v1194_v33, %v857_v20  ;;  %v1638_v44 = vsel %vm917_vm8, 1.0, %v1725_v9  ;;  %v810_v45 = vmul.f32 0.0, %v666_v35  ;;  %v584_v46 = vadd.f32 %v1842_v32, %v583_v36 }
  0xd0   : > { %1098 = vst.msk [vmem:[%s1891_s14 + $0x10] sm:$0xf] %vm1093_vm3, %v1049_v38  ;;  %v1061_v48 = vpack.c.bf16 %v1638_v44, %v1638_v44  ;;  %v1158_v51 = vmul.f32 0.0, %v1638_v44  ;;  %v1206_v24 = vsub.f32 1.0, %v1638_v44  ;;  %vm929_vm9 = vcmp.ge.f32.partialorder %v881_v58, 2e-07 }
  0xd1   : > { %v1290_v52 = vadd.f32 %v1242_v43, %v1146_v40  ;;  %v1650_v53 = vsel %vm929_vm9, 1.0, %v1725_v9  ;;  %v797_v59 = vadd.f32 %v749_v41, %v701_v15  ;;  %v714_v49 = vmul.f32 128.0, %v554_v42 }
  0xd2   : > { %1110 = vst.msk [vmem:[%s1891_s14 + $0x40] sm:$0xf] %vm1093_vm3, %v1061_v48  ;;  %v1254_v60 = vmul.f32 %v1206_v24, %v869_v19  ;;  %v1073_v63 = vpack.c.bf16 %v1650_v53, %v1650_v53  ;;  %v1170_v39 = vmul.f32 0.0, %v1650_v53  ;;  %v1218_v0 = vsub.f32 1.0, %v1650_v53  ;;  %v586_v19 = vpop.f32.mrf.mxu1 }
  0xd3   : > { %1339 = vst.msk [vmem:[%s1914_s17 + $0x20] sm:$0xff] %vm1334_vm4, %v1290_v52  ;;  %v893_v6 = vsub.f32 %v797_v59, %v845_v47  ;;  %v762_v61 = vadd.f32 %v714_v49, %v666_v35  ;;  %v726_v14 = vmul.f32 128.0, %v584_v46  ;;  %v822_v62 = vmul.f32 0.0, %v678_v50  ;;  %v691_v59 = vld [vmem:[%s1837_s9 + $0xf0] sm:$0xff] }
  0xd4   : > { %v1302_v56 = vadd.f32 %v1254_v60, %v1158_v51  ;;  %1122 = vst.msk [vmem:[%s1891_s14 + $0x70] sm:$0xf] %vm1093_vm3, %v1073_v63  ;;  %v1266_v57 = vmul.f32 %v1218_v0, %v881_v58  ;;  %v614_v2 = vadd.f32 %v1842_v32, %v613_v54  ;;  %v834_v28 = vmul.f32 0.0, %v690_v55  ;;  %v679_v58 = vld [vmem:[%s1837_s9 + $0x90] sm:$0xff]  ;;  %v646_v63 = vpop.f32.mrf.mxu3 }
  0xd5   : > { %vm941_vm10 = vcmp.ge.f32.partialorder %v893_v6, 2e-07  ;;  %v858_v3 = vsub.f32 %v762_v61, %v810_v45  ;;  %v774_v4 = vadd.f32 %v726_v14, %v678_v50  ;;  %v644_v7 = vadd.f32 %v1842_v32, %v643_v5  ;;  %v616_v45 = vpop.f32.mrf.mxu2  ;;  %v558_v14 = vpop.f32.mrf.mxu0 }
  0xd6   : > { %1351 = vst.msk [vmem:[%s1914_s17 + $0x80] sm:$0xff] %vm1334_vm4, %v1302_v56  ;;  %v1314_v8 = vadd.f32 %v1266_v57, %v1170_v39  ;;  %v1662_v10 = vsel %vm941_vm10, 1.0, %v1725_v9  ;;  %v738_v11 = vmul.f32 128.0, %v614_v2  ;;  %v846_v12 = vmul.f32 0.0, %v702_v1  ;;  %v703_v39 = vld [vmem:[%s1837_s9 + $0x150] sm:$0xff] }
  0xd7   : > { %v1085_v13 = vpack.c.bf16 %v1662_v10, %v1662_v10  ;;  %v1182_v15 = vmul.f32 0.0, %v1662_v10  ;;  %v1230_v16 = vsub.f32 1.0, %v1662_v10  ;;  %vm906_vm11 = vcmp.ge.f32.partialorder %v858_v3, 2e-07 }
  0xd8   : > { %1363 = vst.msk [vmem:[%s1914_s17 + $0xe0] sm:$0xff] %vm1334_vm4, %v1314_v8  ;;  %v1627_v18 = vsel %vm906_vm11, 1.0, %v1725_v9  ;;  %v870_v20 = vsub.f32 %v774_v4, %v822_v62  ;;  %v786_v21 = vadd.f32 %v738_v11, %v690_v55  ;;  %v750_v22 = vmul.f32 128.0, %v644_v7  ;;  %v668_v11 = vld [vmem:[%s1837_s9 + $0x38] sm:$0xff] }
  0xd9   : > { %1134 = vst.msk [vmem:[%s1891_s14 + $0xa0] sm:$0xf] %vm1093_vm3, %v1085_v13  ;;  %v1278_v25 = vmul.f32 %v1230_v16, %v893_v6  ;;  %v1050_v26 = vpack.c.bf16 %v1627_v18, %v1627_v18  ;;  %v1147_v27 = vmul.f32 0.0, %v1627_v18  ;;  %v1195_v47 = vsub.f32 1.0, %v1627_v18  ;;  %v680_v13 = vld [vmem:[%s1837_s9 + $0x98] sm:$0xff] }
  0xda   : > { %vm918_vm12 = vcmp.ge.f32.partialorder %v870_v20, 2e-07  ;;  %v882_v29 = vsub.f32 %v786_v21, %v834_v28  ;;  %v798_v30 = vadd.f32 %v750_v22, %v702_v1  ;;  %v557_v31 = vadd.f32 %v1842_v32, %v556_v17 }
  0xdb   : > { %v1326_v34 = vadd.f32 %v1278_v25, %v1182_v15  ;;  %1099 = vst.msk [vmem:[%s1891_s14 + $0x14] sm:$0xf] %vm1093_vm3, %v1050_v26  ;;  %v1243_v35 = vmul.f32 %v1195_v47, %v858_v3  ;;  %v1639_v36 = vsel %vm918_vm12, 1.0, %v1725_v9  ;;  %v811_v37 = vmul.f32 0.0, %v667_v23 }
  0xdc   : > { %v1062_v38 = vpack.c.bf16 %v1639_v36, %v1639_v36  ;;  %v1159_v40 = vmul.f32 0.0, %v1639_v36  ;;  %v1207_v33 = vsub.f32 1.0, %v1639_v36  ;;  %vm930_vm13 = vcmp.ge.f32.partialorder %v882_v29, 2e-07 }
  0xdd   : > { %1375 = vst.msk [vmem:[%s1914_s17 + $0x140] sm:$0xff] %vm1334_vm4, %v1326_v34  ;;  %v1291_v41 = vadd.f32 %v1243_v35, %v1147_v27  ;;  %v1651_v42 = vsel %vm930_vm13, 1.0, %v1725_v9  ;;  %v894_v43 = vsub.f32 %v798_v30, %v846_v12  ;;  %v715_v44 = vmul.f32 128.0, %v557_v31  ;;  %v588_v12 = vpop.f32.mrf.mxu1  ;;  %v618_v36 = vpop.f32.mrf.mxu2 }
  0xde   : > { %1111 = vst.msk [vmem:[%s1891_s14 + $0x44] sm:$0xf] %vm1093_vm3, %v1062_v38  ;;  %v1255_v46 = vmul.f32 %v1207_v33, %v870_v20  ;;  %v1074_v50 = vpack.c.bf16 %v1651_v42, %v1651_v42  ;;  %v1171_v48 = vmul.f32 0.0, %v1651_v42  ;;  %v1219_v51 = vsub.f32 1.0, %v1651_v42 }
  0xdf   : > { %1340 = vst.msk [vmem:[%s1914_s17 + $0x28] sm:$0xff] %vm1334_vm4, %v1291_v41  ;;  %vm942_vm14 = vcmp.ge.f32.partialorder %v894_v43, 2e-07  ;;  %v763_v24 = vadd.f32 %v715_v44, %v667_v23  ;;  %v587_v52 = vadd.f32 %v1842_v32, %v586_v19  ;;  %v823_v53 = vmul.f32 0.0, %v679_v58  ;;  %v648_v41 = vpop.f32.mrf.mxu3 }
  0xe0   : > { %v1303_v49 = vadd.f32 %v1255_v46, %v1159_v40  ;;  %1123 = vst.msk [vmem:[%s1891_s14 + $0x74] sm:$0xf] %vm1093_vm3, %v1074_v50  ;;  %v1267_v54 = vmul.f32 %v1219_v51, %v882_v29  ;;  %v1663_v55 = vsel %vm942_vm14, 1.0, %v1725_v9  ;;  %v617_v60 = vadd.f32 %v1842_v32, %v616_v45 }
  0xe1   : > { %v1086_v0 = vpack.c.bf16 %v1663_v55, %v1663_v55  ;;  %v1183_v5 = vmul.f32 0.0, %v1663_v55  ;;  %v1231_v6 = vsub.f32 1.0, %v1663_v55  ;;  %v859_v61 = vsub.f32 %v763_v24, %v811_v37  ;;  %v692_v37 = vld [vmem:[%s1837_s9 + $0xf8] sm:$0xff] }
  0xe2   : > { %1352 = vst.msk [vmem:[%s1914_s17 + $0x88] sm:$0xff] %vm1334_vm4, %v1303_v49  ;;  %v1315_v62 = vadd.f32 %v1267_v54, %v1171_v48  ;;  %v727_v1 = vmul.f32 128.0, %v587_v52  ;;  %v739_v56 = vmul.f32 128.0, %v617_v60  ;;  %v835_v57 = vmul.f32 0.0, %v691_v59 }
  0xe3   : > { %1135 = vst.msk [vmem:[%s1891_s14 + $0xa4] sm:$0xf] %vm1093_vm3, %v1086_v0  ;;  %v1279_v2 = vmul.f32 %v1231_v6, %v894_v43  ;;  %vm907_vm15 = vcmp.ge.f32.partialorder %v859_v61, 2e-07  ;;  %v647_v28 = vadd.f32 %v1842_v32, %v646_v63  ;;  %v847_v3 = vmul.f32 0.0, %v703_v39  ;;  %v561_v0 = vpop.f32.mrf.mxu0 }
  0xe4   : > { %1364 = vst.msk [vmem:[%s1914_s17 + $0xe8] sm:$0xff] %vm1334_vm4, %v1315_v62  ;;  %v1628_v4 = vsel %vm907_vm15, 1.0, %v1725_v9  ;;  %v775_v7 = vadd.f32 %v727_v1, %v679_v58  ;;  %v787_v8 = vadd.f32 %v739_v56, %v691_v59  ;;  %v559_v10 = vadd.f32 %v1842_v32, %v558_v14  ;;  %v704_v14 = vld [vmem:[%s1837_s9 + $0x158] sm:$0xff] }
  0xe5   : > { %v1327_v15 = vadd.f32 %v1279_v2, %v1183_v5  ;;  %v1051_v16 = vpack.c.bf16 %v1628_v4, %v1628_v4  ;;  %v1148_v17 = vmul.f32 0.0, %v1628_v4  ;;  %v1196_v18 = vsub.f32 1.0, %v1628_v4  ;;  %v669_v2 = vld [vmem:[%s1837_s9 + $0x40] sm:$0xff] }
  0xe6   : > { %v871_v20 = vsub.f32 %v775_v7, %v823_v53  ;;  %v883_v21 = vsub.f32 %v787_v8, %v835_v57  ;;  %v751_v22 = vmul.f32 128.0, %v647_v28  ;;  %v716_v23 = vmul.f32 128.0, %v559_v10  ;;  %v681_v8 = vld [vmem:[%s1837_s9 + $0xa0] sm:$0xff] }
  0xe7   : > { %1376 = vst.msk [vmem:[%s1914_s17 + $0x148] sm:$0xff] %vm1334_vm4, %v1327_v15  ;;  %v1244_v25 = vmul.f32 %v1196_v18, %v859_v61  ;;  %v812_v26 = vmul.f32 0.0, %v668_v11  ;;  %v589_v27 = vadd.f32 %v1842_v32, %v588_v12  ;;  %v824_v47 = vmul.f32 0.0, %v680_v13  ;;  %v621_v15 = vpop.f32.mrf.mxu2 }
  0xe8   : > { %1100 = vst.msk [vmem:[%s1891_s14 + $0x18] sm:$0xf] %vm1093_vm3, %v1051_v16  ;;  %vm919_vm0 = vcmp.ge.f32.partialorder %v871_v20, 2e-07  ;;  %vm931_vm1 = vcmp.ge.f32.partialorder %v883_v21, 2e-07  ;;  %v799_v29 = vadd.f32 %v751_v22, %v703_v39  ;;  %v764_v30 = vadd.f32 %v716_v23, %v668_v11  ;;  %v591_v22 = vpop.f32.mrf.mxu1  ;;  %v651_v23 = vpop.f32.mrf.mxu3 }
  0xe9   : > { %v1292_v31 = vadd.f32 %v1244_v25, %v1148_v17  ;;  %v1640_v19 = vsel %vm919_vm0, 1.0, %v1725_v9  ;;  %v1652_v34 = vsel %vm931_vm1, 1.0, %v1725_v9  ;;  %v728_v35 = vmul.f32 128.0, %v589_v27  ;;  %v693_v16 = vld [vmem:[%s1837_s9 + $0x100] sm:$0xff] }
  0xea   : > { %v1063_v38 = vpack.c.bf16 %v1640_v19, %v1640_v19  ;;  %v1160_v40 = vmul.f32 0.0, %v1640_v19  ;;  %v1208_v33 = vsub.f32 1.0, %v1640_v19  ;;  %v1075_v58 = vpack.c.bf16 %v1652_v34, %v1652_v34 }
  0xeb   : > { %1341 = vst.msk [vmem:[%s1914_s17 + $0x30] sm:$0xff] %vm1334_vm4, %v1292_v31  ;;  %v1172_v42 = vmul.f32 0.0, %v1652_v34  ;;  %v1220_v43 = vsub.f32 1.0, %v1652_v34  ;;  %v895_v44 = vsub.f32 %v799_v29, %v847_v3  ;;  %v860_v45 = vsub.f32 %v764_v30, %v812_v26 }
  0xec   : > { %1112 = vst.msk [vmem:[%s1891_s14 + $0x48] sm:$0xf] %vm1093_vm3, %v1063_v38  ;;  %v1256_v46 = vmul.f32 %v1208_v33, %v871_v20  ;;  %v776_v50 = vadd.f32 %v728_v35, %v680_v13  ;;  %v619_v48 = vadd.f32 %v1842_v32, %v618_v36  ;;  %v836_v51 = vmul.f32 0.0, %v692_v37  ;;  %v2136_v35 = vld [vmem:[%s2261_s2] ss:$0 sm:$0xff] }
  0xed   : > { %1124 = vst.msk [vmem:[%s1891_s14 + $0x78] sm:$0xf] %vm1093_vm3, %v1075_v58  ;;  %v1268_v24 = vmul.f32 %v1220_v43, %v883_v21  ;;  %vm943_vm2 = vcmp.ge.f32.partialorder %v895_v44, 2e-07  ;;  %vm908_vm5 = vcmp.ge.f32.partialorder %v860_v45, 2e-07  ;;  %v649_v52 = vadd.f32 %v1842_v32, %v648_v41 }
  0xee   : > { %v1304_v53 = vadd.f32 %v1256_v46, %v1160_v40  ;;  %v1664_v59 = vsel %vm943_vm2, 1.0, %v1725_v9  ;;  %v1629_v49 = vsel %vm908_vm5, 1.0, %v1725_v9  ;;  %v872_v54 = vsub.f32 %v776_v50, %v824_v47  ;;  %v705_v33 = vld [vmem:[%s1837_s9 + $0x160] sm:$0xff] }
  0xef   : > { %v1316_v55 = vadd.f32 %v1268_v24, %v1172_v42  ;;  %v1087_v60 = vpack.c.bf16 %v1664_v59, %v1664_v59  ;;  %v1184_v63 = vmul.f32 0.0, %v1664_v59  ;;  %v1232_v39 = vsub.f32 1.0, %v1664_v59 }
  0xf0   : > { %1353 = vst.msk [vmem:[%s1914_s17 + $0x90] sm:$0xff] %vm1334_vm4, %v1304_v53  ;;  %v1052_v5 = vpack.c.bf16 %v1629_v49, %v1629_v49  ;;  %v1149_v6 = vmul.f32 0.0, %v1629_v49  ;;  %v1197_v61 = vsub.f32 1.0, %v1629_v49  ;;  %vm920_vm6 = vcmp.ge.f32.partialorder %v872_v54, 2e-07 }
  0xf1   : > { %1365 = vst.msk [vmem:[%s1914_s17 + $0xf0] sm:$0xff] %vm1334_vm4, %v1316_v55  ;;  %v1280_v62 = vmul.f32 %v1232_v39, %v895_v44  ;;  %v1641_v1 = vsel %vm920_vm6, 1.0, %v1725_v9  ;;  %v740_v56 = vmul.f32 128.0, %v619_v48  ;;  %v752_v57 = vmul.f32 128.0, %v649_v52  ;;  %v563_v44 = vpop.f32.mrf.mxu0 }
  0xf2   : > { %1136 = vst.msk [vmem:[%s1891_s14 + $0xa8] sm:$0xf] %vm1093_vm3, %v1087_v60  ;;  %v1245_v28 = vmul.f32 %v1197_v61, %v860_v45  ;;  %v1064_v3 = vpack.c.bf16 %v1641_v1, %v1641_v1  ;;  %v1161_v4 = vmul.f32 0.0, %v1641_v1  ;;  %v1209_v7 = vsub.f32 1.0, %v1641_v1 }
  0xf3   : > { %v1328_v10 = vadd.f32 %v1280_v62, %v1184_v63  ;;  %1101 = vst.msk [vmem:[%s1891_s14 + $0x1c] sm:$0xf] %vm1093_vm3, %v1052_v5  ;;  %v788_v11 = vadd.f32 %v740_v56, %v692_v37  ;;  %v800_v12 = vadd.f32 %v752_v57, %v704_v14  ;;  %v848_v13 = vmul.f32 0.0, %v704_v14 }
  0xf4   : > { %v1293_v17 = vadd.f32 %v1245_v28, %v1149_v6  ;;  %1113 = vst.msk [vmem:[%s1891_s14 + $0x4c] sm:$0xf] %vm1093_vm3, %v1064_v3  ;;  %v1257_v18 = vmul.f32 %v1209_v7, %v872_v54  ;;  %v562_v20 = vadd.f32 %v1842_v32, %v561_v0  ;;  %v813_v21 = vmul.f32 0.0, %v669_v2  ;;  %v670_v0 = vld [vmem:[%s1837_s9 + $0x48] sm:$0xff]  ;;  %v593_v3 = vpop.f32.mrf.mxu1 }
  0xf5   : > { %1377 = vst.msk [vmem:[%s1914_s17 + $0x150] sm:$0xff] %vm1334_vm4, %v1328_v10  ;;  %v884_v25 = vsub.f32 %v788_v11, %v836_v51  ;;  %v896_v26 = vsub.f32 %v800_v12, %v848_v13  ;;  %v592_v27 = vadd.f32 %v1842_v32, %v591_v22  ;;  %v825_v47 = vmul.f32 0.0, %v681_v8  ;;  %v694_v22 = vld [vmem:[%s1837_s9 + $0x108] sm:$0xff] }
  0xf6   : > { %1342 = vst.msk [vmem:[%s1914_s17 + $0x38] sm:$0xff] %vm1334_vm4, %v1293_v17  ;;  %v1305_v29 = vadd.f32 %v1257_v18, %v1161_v4  ;;  %v717_v30 = vmul.f32 128.0, %v562_v20  ;;  %v622_v31 = vadd.f32 %v1842_v32, %v621_v15  ;;  %v837_v19 = vmul.f32 0.0, %v693_v16  ;;  %v682_v15 = vld [vmem:[%s1837_s9 + $0xa8] sm:$0xff] }
  0xf7   : > { %vm932_vm7 = vcmp.ge.f32.partialorder %v884_v25, 2e-07  ;;  %vm944_vm8 = vcmp.ge.f32.partialorder %v896_v26, 2e-07  ;;  %v729_v34 = vmul.f32 128.0, %v592_v27  ;;  %v652_v36 = vadd.f32 %v2136_v35, %v651_v23 }
  0xf8   : > { %1354 = vst.msk [vmem:[%s1914_s17 + $0x98] sm:$0xff] %vm1334_vm4, %v1305_v29  ;;  %v1653_v37 = vsel %vm932_vm7, 1.0, %v1725_v9  ;;  %v1665_v38 = vsel %vm944_vm8, 1.0, %v1725_v9  ;;  %v765_v40 = vadd.f32 %v717_v30, %v669_v2  ;;  %v741_v32 = vmul.f32 128.0, %v622_v31  ;;  %v706_v29 = vld [vmem:[%s1837_s9 + $0x168] sm:$0xff] }
  0xf9   : > { %v1076_v58 = vpack.c.bf16 %v1653_v37, %v1653_v37  ;;  %v1173_v41 = vmul.f32 0.0, %v1653_v37  ;;  %v1221_v42 = vsub.f32 1.0, %v1653_v37  ;;  %v1088_v43 = vpack.c.bf16 %v1665_v38, %v1665_v38 }
  0xfa   : > { %v1185_v45 = vmul.f32 0.0, %v1665_v38  ;;  %v1233_v46 = vsub.f32 1.0, %v1665_v38  ;;  %v861_v50 = vsub.f32 %v765_v40, %v813_v21  ;;  %v777_v48 = vadd.f32 %v729_v34, %v681_v8 }
  0xfb   : > { %1125 = vst.msk [vmem:[%s1891_s14 + $0x7c] sm:$0xf] %vm1093_vm3, %v1076_v58  ;;  %v1269_v51 = vmul.f32 %v1221_v42, %v884_v25  ;;  %v789_v24 = vadd.f32 %v741_v32, %v693_v16  ;;  %v753_v52 = vmul.f32 128.0, %v652_v36  ;;  %v849_v53 = vmul.f32 0.0, %v705_v33  ;;  %v623_v16 = vpop.f32.mrf.mxu2  ;;  %v671_v42 = vld [vmem:[%s1837_s9 + $0x50] sm:$0xff] }
  0xfc   : > { %1137 = vst.msk [vmem:[%s1891_s14 + $0xac] sm:$0xf] %vm1093_vm3, %v1088_v43  ;;  %v1281_v59 = vmul.f32 %v1233_v46, %v896_v26  ;;  %vm909_vm9 = vcmp.ge.f32.partialorder %v861_v50, 2e-07  ;;  %v873_v49 = vsub.f32 %v777_v48, %v825_v47  ;;  %v564_v54 = vadd.f32 %v2136_v35, %v563_v44  ;;  %v653_v47 = vpop.f32.mrf.mxu3 }
  0xfd   : > { %v1317_v55 = vadd.f32 %v1269_v51, %v1173_v41  ;;  %v1630_v60 = vsel %vm909_vm9, 1.0, %v1725_v9  ;;  %v885_v63 = vsub.f32 %v789_v24, %v837_v19  ;;  %v801_v39 = vadd.f32 %v753_v52, %v705_v33  ;;  %v566_v41 = vpop.f32.mrf.mxu0 }
  0xfe   : > { %v1329_v5 = vadd.f32 %v1281_v59, %v1185_v45  ;;  %v1053_v6 = vpack.c.bf16 %v1630_v60, %v1630_v60  ;;  %v1150_v61 = vmul.f32 0.0, %v1630_v60  ;;  %v1198_v14 = vsub.f32 1.0, %v1630_v60 }
  0xff   : > { %1366 = vst.msk [vmem:[%s1914_s17 + $0xf8] sm:$0xff] %vm1334_vm4, %v1317_v55  ;;  %vm921_vm10 = vcmp.ge.f32.partialorder %v873_v49, 2e-07  ;;  %vm933_vm11 = vcmp.ge.f32.partialorder %v885_v63, 2e-07  ;;  %v897_v62 = vsub.f32 %v801_v39, %v849_v53  ;;  %v718_v1 = vmul.f32 128.0, %v564_v54  ;;  %v596_v55 = vpop.f32.mrf.mxu1 }
 0x100   : > { %1378 = vst.msk [vmem:[%s1914_s17 + $0x158] sm:$0xff] %vm1334_vm4, %v1329_v5  ;;  %v1246_v56 = vmul.f32 %v1198_v14, %v861_v50  ;;  %v1642_v57 = vsel %vm921_vm10, 1.0, %v1725_v9  ;;  %v1654_v2 = vsel %vm933_vm11, 1.0, %v1725_v9  ;;  %v814_v28 = vmul.f32 0.0, %v670_v0  ;;  %v683_v50 = vld [vmem:[%s1837_s9 + $0xb0] sm:$0xff] }
 0x101   : > { %1102 = vst.msk [vmem:[%s1891_s14 + $0x20] sm:$0xf] %vm1093_vm3, %v1053_v6  ;;  %v1065_v4 = vpack.c.bf16 %v1642_v57, %v1642_v57  ;;  %v1162_v7 = vmul.f32 0.0, %v1642_v57  ;;  %v1210_v8 = vsub.f32 1.0, %v1642_v57  ;;  %v1077_v10 = vpack.c.bf16 %v1654_v2, %v1654_v2 }
 0x102   : > { %v1294_v11 = vadd.f32 %v1246_v56, %v1150_v61  ;;  %v1174_v12 = vmul.f32 0.0, %v1654_v2  ;;  %v1222_v13 = vsub.f32 1.0, %v1654_v2  ;;  %vm945_vm12 = vcmp.ge.f32.partialorder %v897_v62, 2e-07 }
 0x103   : > { %1114 = vst.msk [vmem:[%s1891_s14 + $0x50] sm:$0xf] %vm1093_vm3, %v1065_v4  ;;  %v1258_v17 = vmul.f32 %v1210_v8, %v873_v49  ;;  %v1666_v18 = vsel %vm945_vm12, 1.0, %v1725_v9  ;;  %v766_v20 = vadd.f32 %v718_v1, %v670_v0  ;;  %v594_v21 = vadd.f32 %v2136_v35, %v593_v3  ;;  %v626_v14 = vpop.f32.mrf.mxu2 }
 0x104   : > { %1343 = vst.msk [vmem:[%s1914_s17 + $0x40] sm:$0xff] %vm1334_vm4, %v1294_v11  ;;  %v1270_v23 = vmul.f32 %v1222_v13, %v885_v63  ;;  %v1089_v25 = vpack.c.bf16 %v1666_v18, %v1666_v18  ;;  %v1186_v26 = vmul.f32 0.0, %v1666_v18  ;;  %v1234_v27 = vsub.f32 1.0, %v1666_v18 }
 0x105   : > { %v1306_v30 = vadd.f32 %v1258_v17, %v1162_v7  ;;  %1126 = vst.msk [vmem:[%s1891_s14 + $0x80] sm:$0xf] %vm1093_vm3, %v1077_v10  ;;  %v862_v31 = vsub.f32 %v766_v20, %v814_v28  ;;  %v730_v19 = vmul.f32 128.0, %v594_v21  ;;  %v826_v34 = vmul.f32 0.0, %v682_v15 }
 0x106   : > { %v1318_v36 = vadd.f32 %v1270_v23, %v1174_v12  ;;  %1138 = vst.msk [vmem:[%s1891_s14 + $0xb0] sm:$0xf] %vm1093_vm3, %v1089_v25  ;;  %v1282_v37 = vmul.f32 %v1234_v27, %v897_v62  ;;  %v624_v38 = vadd.f32 %v2136_v35, %v623_v16  ;;  %v838_v40 = vmul.f32 0.0, %v694_v22  ;;  %v695_v62 = vld [vmem:[%s1837_s9 + $0x110] sm:$0xff]  ;;  %v656_v16 = vpop.f32.mrf.mxu3 }
 0x107   : > { %1355 = vst.msk [vmem:[%s1914_s17 + $0xa0] sm:$0xff] %vm1334_vm4, %v1306_v30  ;;  %vm910_vm13 = vcmp.ge.f32.partialorder %v862_v31, 2e-07  ;;  %v778_v32 = vadd.f32 %v730_v19, %v682_v15  ;;  %v654_v33 = vadd.f32 %v2136_v35, %v653_v47  ;;  %v850_v58 = vmul.f32 0.0, %v706_v29  ;;  %v707_v30 = vld [vmem:[%s1837_s9 + $0x170] sm:$0xff] }
 0x108   : > { %1367 = vst.msk [vmem:[%s1914_s17 + $0x100] sm:$0xff] %vm1334_vm4, %v1318_v36  ;;  %v1330_v43 = vadd.f32 %v1282_v37, %v1186_v26  ;;  %v1631_v44 = vsel %vm910_vm13, 1.0, %v1725_v9  ;;  %v742_v45 = vmul.f32 128.0, %v624_v38  ;;  %v567_v46 = vadd.f32 %v2136_v35, %v566_v41 }
 0x109   : > { %v1054_v48 = vpack.c.bf16 %v1631_v44, %v1631_v44  ;;  %v1151_v51 = vmul.f32 0.0, %v1631_v44  ;;  %v1199_v24 = vsub.f32 1.0, %v1631_v44  ;;  %v874_v52 = vsub.f32 %v778_v32, %v826_v34  ;;  %v598_v44 = vpop.f32.mrf.mxu1 }
 0x10a   : > { %1379 = vst.msk [vmem:[%s1914_s17 + $0x160] sm:$0xff] %vm1334_vm4, %v1330_v43  ;;  %v790_v53 = vadd.f32 %v742_v45, %v694_v22  ;;  %v754_v59 = vmul.f32 128.0, %v654_v33  ;;  %v719_v49 = vmul.f32 128.0, %v567_v46  ;;  %v815_v54 = vmul.f32 0.0, %v671_v42  ;;  %v672_v43 = vld [vmem:[%s1837_s9 + $0x58] sm:$0xff] }
 0x10b   : > { %1103 = vst.msk [vmem:[%s1891_s14 + $0x24] sm:$0xf] %vm1093_vm3, %v1054_v48  ;;  %v1247_v60 = vmul.f32 %v1199_v24, %v862_v31  ;;  %vm922_vm14 = vcmp.ge.f32.partialorder %v874_v52, 2e-07  ;;  %v597_v63 = vadd.f32 %v2136_v35, %v596_v55  ;;  %v827_v39 = vmul.f32 0.0, %v683_v50  ;;  %v568_v31 = vpop.f32.mrf.mxu0 }
 0x10c   : > { %v1643_v0 = vsel %vm922_vm14, 1.0, %v1725_v9  ;;  %v886_v5 = vsub.f32 %v790_v53, %v838_v40  ;;  %v802_v6 = vadd.f32 %v754_v59, %v706_v29  ;;  %v767_v61 = vadd.f32 %v719_v49, %v671_v42  ;;  %v684_v59 = vld [vmem:[%s1837_s9 + $0xb8] sm:$0xff] }
 0x10d   : > { %v1295_v1 = vadd.f32 %v1247_v60, %v1151_v51  ;;  %v1066_v56 = vpack.c.bf16 %v1643_v0, %v1643_v0  ;;  %v1163_v57 = vmul.f32 0.0, %v1643_v0  ;;  %v1211_v2 = vsub.f32 1.0, %v1643_v0  ;;  %v628_v51 = vpop.f32.mrf.mxu2 }
 0x10e   : > { %vm934_vm15 = vcmp.ge.f32.partialorder %v886_v5, 2e-07  ;;  %v898_v28 = vsub.f32 %v802_v6, %v850_v58  ;;  %v863_v3 = vsub.f32 %v767_v61, %v815_v54  ;;  %v731_v4 = vmul.f32 128.0, %v597_v63  ;;  %v696_v63 = vld [vmem:[%s1837_s9 + $0x118] sm:$0xff] }
 0x10f   : > { %1344 = vst.msk [vmem:[%s1914_s17 + $0x48] sm:$0xff] %vm1334_vm4, %v1295_v1  ;;  %v1259_v7 = vmul.f32 %v1211_v2, %v874_v52  ;;  %v1655_v8 = vsel %vm934_vm15, 1.0, %v1725_v9  ;;  %v627_v10 = vadd.f32 %v2136_v35, %v626_v14  ;;  %v839_v11 = vmul.f32 0.0, %v695_v62  ;;  %v658_v2 = vpop.f32.mrf.mxu3 }
 0x110   : > { %1115 = vst.msk [vmem:[%s1891_s14 + $0x54] sm:$0xf] %vm1093_vm3, %v1066_v56  ;;  %v1078_v12 = vpack.c.bf16 %v1655_v8, %v1655_v8  ;;  %v1175_v13 = vmul.f32 0.0, %v1655_v8  ;;  %v1223_v15 = vsub.f32 1.0, %v1655_v8  ;;  %vm946_vm0 = vcmp.ge.f32.partialorder %v898_v28, 2e-07 }
 0x111   : > { %v1307_v17 = vadd.f32 %v1259_v7, %v1163_v57  ;;  %v1667_v18 = vsel %vm946_vm0, 1.0, %v1725_v9  ;;  %vm911_vm1 = vcmp.ge.f32.partialorder %v863_v3, 2e-07  ;;  %v779_v20 = vadd.f32 %v731_v4, %v683_v50 }
 0x112   : > { %1127 = vst.msk [vmem:[%s1891_s14 + $0x84] sm:$0xf] %vm1093_vm3, %v1078_v12  ;;  %v1271_v21 = vmul.f32 %v1223_v15, %v886_v5  ;;  %v1090_v22 = vpack.c.bf16 %v1667_v18, %v1667_v18  ;;  %v1187_v23 = vmul.f32 0.0, %v1667_v18  ;;  %v1235_v25 = vsub.f32 1.0, %v1667_v18 }
 0x113   : > { %1356 = vst.msk [vmem:[%s1914_s17 + $0xa8] sm:$0xff] %vm1334_vm4, %v1307_v17  ;;  %v1632_v26 = vsel %vm911_vm1, 1.0, %v1725_v9  ;;  %v875_v27 = vsub.f32 %v779_v20, %v827_v39  ;;  %v743_v47 = vmul.f32 128.0, %v627_v10  ;;  %v657_v29 = vadd.f32 %v2136_v35, %v656_v16 }
 0x114   : > { %v1319_v19 = vadd.f32 %v1271_v21, %v1175_v13  ;;  %1139 = vst.msk [vmem:[%s1891_s14 + $0xb4] sm:$0xf] %vm1093_vm3, %v1090_v22  ;;  %v1283_v34 = vmul.f32 %v1235_v25, %v898_v28  ;;  %v1055_v36 = vpack.c.bf16 %v1632_v26, %v1632_v26  ;;  %v1152_v37 = vmul.f32 0.0, %v1632_v26  ;;  %v708_v13 = vld [vmem:[%s1837_s9 + $0x178] sm:$0xff] }
 0x115   : > { %v1200_v38 = vsub.f32 1.0, %v1632_v26  ;;  %vm923_vm2 = vcmp.ge.f32.partialorder %v875_v27, 2e-07  ;;  %v791_v40 = vadd.f32 %v743_v47, %v695_v62  ;;  %v755_v32 = vmul.f32 128.0, %v657_v29 }
 0x116   : > { %1368 = vst.msk [vmem:[%s1914_s17 + $0x108] sm:$0xff] %vm1334_vm4, %v1319_v19  ;;  %v1331_v33 = vadd.f32 %v1283_v34, %v1187_v23  ;;  %v1644_v58 = vsel %vm923_vm2, 1.0, %v1725_v9  ;;  %v851_v41 = vmul.f32 0.0, %v707_v30  ;;  %v569_v42 = vadd.f32 %v2136_v35, %v568_v31 }
 0x117   : > { %1104 = vst.msk [vmem:[%s1891_s14 + $0x28] sm:$0xf] %vm1093_vm3, %v1055_v36  ;;  %v1248_v45 = vmul.f32 %v1200_v38, %v863_v3  ;;  %v1067_v46 = vpack.c.bf16 %v1644_v58, %v1644_v58  ;;  %v1164_v50 = vmul.f32 0.0, %v1644_v58  ;;  %v1212_v48 = vsub.f32 1.0, %v1644_v58 }
 0x118   : > { %1380 = vst.msk [vmem:[%s1914_s17 + $0x168] sm:$0xff] %vm1334_vm4, %v1331_v33  ;;  %v887_v24 = vsub.f32 %v791_v40, %v839_v11  ;;  %v803_v52 = vadd.f32 %v755_v32, %v707_v30  ;;  %v720_v53 = vmul.f32 128.0, %v569_v42  ;;  %v816_v55 = vmul.f32 0.0, %v672_v43 }
 0x119   : > { %v1296_v49 = vadd.f32 %v1248_v45, %v1152_v37  ;;  %1116 = vst.msk [vmem:[%s1891_s14 + $0x58] sm:$0xf] %vm1093_vm3, %v1067_v46  ;;  %v1260_v54 = vmul.f32 %v1212_v48, %v875_v27  ;;  %v599_v60 = vadd.f32 %v2136_v35, %v598_v44  ;;  %v629_v5 = vadd.f32 %v2136_v35, %v628_v51 }
 0x11a   : > { %vm935_vm5 = vcmp.ge.f32.partialorder %v887_v24, 2e-07  ;;  %v899_v39 = vsub.f32 %v803_v52, %v851_v41  ;;  %v768_v0 = vadd.f32 %v720_v53, %v672_v43  ;;  %v828_v62 = vmul.f32 0.0, %v684_v59 }
 0x11b   : > { %1345 = vst.msk [vmem:[%s1914_s17 + $0x50] sm:$0xff] %vm1334_vm4, %v1296_v49  ;;  %v1308_v6 = vadd.f32 %v1260_v54, %v1164_v50  ;;  %v1656_v61 = vsel %vm935_vm5, 1.0, %v1725_v9  ;;  %v732_v14 = vmul.f32 128.0, %v599_v60  ;;  %v840_v57 = vmul.f32 0.0, %v696_v63 }
 0x11c   : > { %v1079_v1 = vpack.c.bf16 %v1656_v61, %v1656_v61  ;;  %v1224_v56 = vsub.f32 1.0, %v1656_v61  ;;  %vm947_vm6 = vcmp.ge.f32.partialorder %v899_v39, 2e-07  ;;  %v864_v3 = vsub.f32 %v768_v0, %v816_v55 }
 0x11d   : > { %1357 = vst.msk [vmem:[%s1914_s17 + $0xb0] sm:$0xff] %vm1334_vm4, %v1308_v6  ;;  %v1668_v28 = vsel %vm947_vm6, 1.0, %v1725_v9  ;;  %v780_v4 = vadd.f32 %v732_v14, %v684_v59  ;;  %v744_v7 = vmul.f32 128.0, %v629_v5  ;;  %v1176_v8 = vmul.f32 0.0, %v1656_v61 }
 0x11e   : > { %1128 = vst.msk [vmem:[%s1891_s14 + $0x88] sm:$0xf] %vm1093_vm3, %v1079_v1  ;;  %v1272_v10 = vmul.f32 %v1224_v56, %v887_v24  ;;  %v1091_v11 = vpack.c.bf16 %v1668_v28, %v1668_v28  ;;  %v1236_v12 = vsub.f32 1.0, %v1668_v28  ;;  %vm912_vm7 = vcmp.ge.f32.partialorder %v864_v3, 2e-07 }
 0x11f   : > { %v876_v15 = vsub.f32 %v780_v4, %v828_v62  ;;  %v792_v16 = vadd.f32 %v744_v7, %v696_v63  ;;  %v659_v17 = vadd.f32 %v2136_v35, %v658_v2  ;;  %v1188_v20 = vmul.f32 0.0, %v1668_v28 }
 0x120   : > { %v1320_v18 = vadd.f32 %v1272_v10, %v1176_v8  ;;  %1140 = vst.msk [vmem:[%s1891_s14 + $0xb8] sm:$0xf] %vm1093_vm3, %v1091_v11  ;;  %v1284_v21 = vmul.f32 %v1236_v12, %v899_v39  ;;  %v1633_v22 = vsel %vm912_vm7, 1.0, %v1725_v9  ;;  %v852_v26 = vmul.f32 0.0, %v708_v13 }
 0x121   : > { %v1056_v23 = vpack.c.bf16 %v1633_v22, %v1633_v22  ;;  %v1201_v25 = vsub.f32 1.0, %v1633_v22  ;;  %vm924_vm8 = vcmp.ge.f32.partialorder %v876_v15, 2e-07  ;;  %v888_v29 = vsub.f32 %v792_v16, %v840_v57 }
 0x122   : > { %1369 = vst.msk [vmem:[%s1914_s17 + $0x110] sm:$0xff] %vm1334_vm4, %v1320_v18  ;;  %v1332_v27 = vadd.f32 %v1284_v21, %v1188_v20  ;;  %v1645_v47 = vsel %vm924_vm8, 1.0, %v1725_v9  ;;  %v756_v35 = vmul.f32 128.0, %v659_v17  ;;  %v1153_v30 = vmul.f32 0.0, %v1633_v22 }
 0x123   : > { %1105 = vst.msk [vmem:[%s1891_s14 + $0x2c] sm:$0xf] %vm1093_vm3, %v1056_v23  ;;  %v1249_v31 = vmul.f32 %v1201_v25, %v864_v3  ;;  %v1068_v19 = vpack.c.bf16 %v1645_v47, %v1645_v47  ;;  %v1213_v34 = vsub.f32 1.0, %v1645_v47  ;;  %vm936_vm9 = vcmp.ge.f32.partialorder %v888_v29, 2e-07 }
 0x124   : > { %1381 = vst.msk [vmem:[%s1914_s17 + $0x170] sm:$0xff] %vm1334_vm4, %v1332_v27  ;;  %v804_v36 = vadd.f32 %v756_v35, %v708_v13  ;;  %v1165_v38 = vmul.f32 0.0, %v1645_v47  ;;  %v1657_v32 = vsel %vm936_vm9, 1.0, %v1725_v9 }
 0x125   : > { %v1297_v37 = vadd.f32 %v1249_v31, %v1153_v30  ;;  %1117 = vst.msk [vmem:[%s1891_s14 + $0x5c] sm:$0xf] %vm1093_vm3, %v1068_v19  ;;  %v1261_v40 = vmul.f32 %v1213_v34, %v876_v15  ;;  %v1080_v33 = vpack.c.bf16 %v1657_v32, %v1657_v32  ;;  %v1225_v58 = vsub.f32 1.0, %v1657_v32 }
 0x126   : > { %v900_v41 = vsub.f32 %v804_v36, %v852_v26  ;;  %v1177_v43 = vmul.f32 0.0, %v1657_v32 }
 0x127   : > { %1346 = vst.msk [vmem:[%s1914_s17 + $0x58] sm:$0xff] %vm1334_vm4, %v1297_v37  ;;  %v1309_v42 = vadd.f32 %v1261_v40, %v1165_v38  ;;  %v1273_v44 = vmul.f32 %v1225_v58, %v888_v29 }
 0x128   : > { %1129 = vst.msk [vmem:[%s1891_s14 + $0x8c] sm:$0xf] %vm1093_vm3, %v1080_v33  ;;  %vm948_vm10 = vcmp.ge.f32.partialorder %v900_v41, 2e-07 }
 0x129   : > { %1358 = vst.msk [vmem:[%s1914_s17 + $0xb8] sm:$0xff] %vm1334_vm4, %v1309_v42  ;;  %v1669_v45 = vsel %vm948_vm10, 1.0, %v1725_v9  ;;  %v1321_v46 = vadd.f32 %v1273_v44, %v1177_v43 }
 0x12a   : > { %v1092_v50 = vpack.c.bf16 %v1669_v45, %v1669_v45  ;;  %v1237_v48 = vsub.f32 1.0, %v1669_v45  ;;  %v1189_v51 = vmul.f32 0.0, %v1669_v45 }
 0x12b   : > { %1370 = vst.msk [vmem:[%s1914_s17 + $0x118] sm:$0xff] %vm1334_vm4, %v1321_v46 }
 0x12c   : > { %v1285_v24 = vmul.f32 %v1237_v48, %v900_v41  ;;  %1141 = vst.msk [vmem:[%s1891_s14 + $0xbc] sm:$0xf] %vm1093_vm3, %v1092_v50 }
 0x12e   : > { %v1333_v52 = vadd.f32 %v1285_v24, %v1189_v51 }
 0x130   : > { %1382 = vst.msk [vmem:[%s1914_s17 + $0x178] sm:$0xff] %vm1334_vm4, %v1333_v52 }
 0x131 PF: > { %s16_s18 = sadd.s32 1, %s1722_s18  }
 0x132   : > { %p13_p4 = scmp.ge.s32.totalorder %s16_s18, 5  }
 0x134   :  { %15 = sbr.rel (!%p13_p4) target bundleno = 1 (0x1), region = 81 }

// kernel: closed_call.29
= control target key start
LH: loop header
LB: loop body
LE: loop exit
PB: predicated region body
PF: predicated region fallthrough
CT: control target
= control target key end

     0   :  { %vm484_vm0 = vcmask 1041408   ;;  %vm459_vm1 = vcmask 949248   ;;  %vm844_vm3 = vcmask 404480   ;;  %vm925_vm4 = vcmask 408576   ;;  %s1831_s1 = inlined_call_operand.vmem [shape: bf16[500,50], index: 1, kind: input, shape index: {}]   ;;  %s1832_s0 = inlined_call_operand.vmem [shape: bf16[128,500], index: 0, kind: input, shape index: {}]   ;;  %s1833_s2 = inlined_call_operand.vmem [shape: f32[1,50], index: 2, kind: input, shape index: {}]   ;;  %s1834_s3 = inlined_call_operand.vmem [shape: f32[128,50], index: 3, kind: input, shape index: {}]   ;;  %s1835_s4 = inlined_call_operand.vmem [shape: bf16[128,50], index: 4, kind: output, shape index: {0}]   ;;  %s1836_s5 = inlined_call_operand.vmem [shape: f32[128,50], index: 5, kind: output, shape index: {1}]  }
   0x1   :  { %v1265_v0 = vld [vmem:[%s1831_s1 + $0x38] sm:$0xff]  ;;  %v1264_v5 = vld [vmem:[%s1831_s1 + $0x30] sm:$0xff]  ;;  %v1263_v10 = vld [vmem:[%s1831_s1 + $0x28] sm:$0xff] }
   0x2   :  { %v1273_v1 = vld [vmem:[%s1831_s1 + $0x78] sm:$0xff]  ;;  %488 = vmatpush.bf16.msra.mxu0 %v1265_v0  ;;  %v1272_v6 = vld [vmem:[%s1831_s1 + $0x70] sm:$0xff]  ;;  %v1271_v11 = vld [vmem:[%s1831_s1 + $0x68] sm:$0xff] }
   0x3   :  { %v1281_v2 = vld [vmem:[%s1831_s1 + $0xb8] sm:$0xff]  ;;  %537 = vmatpush.bf16.msra.mxu1 %v1273_v1  ;;  %v1280_v7 = vld [vmem:[%s1831_s1 + $0xb0] sm:$0xff]  ;;  %v1279_v13 = vld [vmem:[%s1831_s1 + $0xa8] sm:$0xff] }
   0x4   :  { %v113_v3 = vld [vmem:[%s1831_s1 + $0xf8] sm:$0x3]  ;;  %586 = vmatpush.bf16.msra.mxu2 %v1281_v2  ;;  %v1288_v12 = vld [vmem:[%s1831_s1 + $0xf0] sm:$0xff]  ;;  %v1262_v14 = vld [vmem:[%s1831_s1 + $0x20] sm:$0xff] }
   0x5   :  { %v395_v4 = vunpack.c.l.b16 %v113_v3  ;;  %v1270_v15 = vld [vmem:[%s1831_s1 + $0x60] sm:$0xff]  ;;  %v1287_v16 = vld [vmem:[%s1831_s1 + $0xe8] sm:$0xff]  ;;  %v1261_v18 = vld [vmem:[%s1831_s1 + $0x18] sm:$0xff] }
   0x6   :  { %489 = vmatpush.bf16.msra.mxu0 %v1264_v5  ;;  %v1278_v17 = vld [vmem:[%s1831_s1 + $0xa0] sm:$0xff]  ;;  %v1269_v19 = vld [vmem:[%s1831_s1 + $0x58] sm:$0xff]  ;;  %v1260_v22 = vld [vmem:[%s1831_s1 + $0x10] sm:$0xff] }
   0x7   :  { %v427_v8 = vpack.c.b16 %v395_v4, %v395_v4  ;;  %538 = vmatpush.bf16.msra.mxu1 %v1272_v6  ;;  %v1286_v20 = vld [vmem:[%s1831_s1 + $0xe0] sm:$0xff]  ;;  %v1277_v21 = vld [vmem:[%s1831_s1 + $0x98] sm:$0xff]  ;;  %v1268_v23 = vld [vmem:[%s1831_s1 + $0x50] sm:$0xff] }
   0x8   :  { %587 = vmatpush.bf16.msra.mxu2 %v1280_v7  ;;  %v1285_v24 = vld [vmem:[%s1831_s1 + $0xd8] sm:$0xff]  ;;  %v1276_v25 = vld [vmem:[%s1831_s1 + $0x90] sm:$0xff]  ;;  %v1259_v26 = vld [vmem:[%s1831_s1 + $0x8] sm:$0xff] }
   0x9   :  { %v486_v9 = vsel %vm484_vm0, %v427_v8, 0  ;;  %v1267_v27 = vld [vmem:[%s1831_s1 + $0x48] sm:$0xff]  ;;  %v1284_v28 = vld [vmem:[%s1831_s1 + $0xd0] sm:$0xff]  ;;  %v1258_v31 = vld [vmem:[%s1831_s1] sm:$0xff] }
   0xa   :  { %635 = vmatpush.bf16.msra.mxu3 %v486_v9  ;;  %490 = vmatpush.bf16.msra.mxu0 %v1263_v10  ;;  %v1275_v29 = vld [vmem:[%s1831_s1 + $0x88] sm:$0xff]  ;;  %v1266_v32 = vld [vmem:[%s1831_s1 + $0x40] sm:$0xff]  ;;  %v1228_v34 = vld [vmem:[%s1832_s0 + $0xc] sm:$0xf0] }
   0xb   :  { %539 = vmatpush.bf16.msra.mxu1 %v1271_v11  ;;  %v1283_v30 = vld [vmem:[%s1831_s1 + $0xc8] sm:$0xff]  ;;  %v952_v33 = vld [vmem:[%s1832_s0] sm:$0xf]  ;;  %v1226_v35 = vld [vmem:[%s1832_s0 + $0x4] sm:$0xf] }
   0xc   :  { %588 = vmatpush.bf16.msra.mxu2 %v1279_v13  ;;  %v954_v36 = vld [vmem:[%s1832_s0 + $0x10] sm:$0xf0]  ;;  %v1274_v37 = vld [vmem:[%s1831_s1 + $0x80] sm:$0xff]  ;;  %v960_v38 = vld [vmem:[%s1832_s0 + $0x8] sm:$0xf]  ;;  %v953_v40 = vor.u32 %v1228_v34, %v952_v33 }
   0xd   :  { %v1229_v39 = vld [vmem:[%s1832_s0 + $0x14] sm:$0xf0]  ;;  %v957_v41 = vor.u32 %v1226_v35, %v954_v36  ;;  %v1282_v43 = vld [vmem:[%s1831_s1 + $0xc0] sm:$0xff]  ;;  %v1227_v44 = vld [vmem:[%s1832_s0 + $0xc] sm:$0xf] }
   0xe   :  { %636 = vmatpush.bf16.msra.mxu3 %v1288_v12  ;;  %491 = vmatpush.bf16.msra.mxu0 %v1262_v14  ;;  %v961_v42 = vor.u32 %v1229_v39, %v960_v38  ;;  %v962_v45 = vld [vmem:[%s1832_s0 + $0x18] sm:$0xf0]  ;;  %v968_v47 = vld [vmem:[%s1832_s0 + $0x20] sm:$0xf]  ;;  %v1232_v48 = vld [vmem:[%s1832_s0 + $0x2c] sm:$0xf0] }
   0xf   :  { %540 = vmatpush.bf16.msra.mxu1 %v1270_v15  ;;  %v965_v46 = vor.u32 %v1227_v44, %v962_v45  ;;  %v1230_v49 = vld [vmem:[%s1832_s0 + $0x24] sm:$0xf]  ;;  %v970_v50 = vld [vmem:[%s1832_s0 + $0x30] sm:$0xf0]  ;;  %v976_v51 = vld [vmem:[%s1832_s0 + $0x28] sm:$0xf]  ;;  %v969_v53 = vor.u32 %v1232_v48, %v968_v47 }
  0x10   :  { %589 = vmatpush.bf16.msra.mxu2 %v1278_v17  ;;  %v1233_v52 = vld [vmem:[%s1832_s0 + $0x34] sm:$0xf0]  ;;  %v973_v54 = vor.u32 %v1230_v49, %v970_v50  ;;  %v1231_v56 = vld [vmem:[%s1832_s0 + $0x2c] sm:$0xf]  ;;  %v978_v57 = vld [vmem:[%s1832_s0 + $0x38] sm:$0xf0] }
  0x11   :  { %v977_v55 = vor.u32 %v1233_v52, %v976_v51  ;;  %v981_v58 = vor.u32 %v1231_v56, %v978_v57  ;;  %v984_v59 = vld [vmem:[%s1832_s0 + $0x40] sm:$0xf]  ;;  %v1236_v60 = vld [vmem:[%s1832_s0 + $0x4c] sm:$0xf0]  ;;  %v1234_v61 = vld [vmem:[%s1832_s0 + $0x44] sm:$0xf] }
  0x12   :  { %637 = vmatpush.bf16.msra.mxu3 %v1287_v16  ;;  %492 = vmatpush.bf16.msra.mxu0 %v1261_v18  ;;  %v986_v62 = vld [vmem:[%s1832_s0 + $0x50] sm:$0xf0]  ;;  %v992_v63 = vld [vmem:[%s1832_s0 + $0x48] sm:$0xf]  ;;  %v1237_v0 = vld [vmem:[%s1832_s0 + $0x54] sm:$0xf0]  ;;  %v985_v1 = vor.u32 %v1236_v60, %v984_v59 }
  0x13   :  { %541 = vmatpush.bf16.msra.mxu1 %v1269_v19  ;;  %v989_v2 = vor.u32 %v1234_v61, %v986_v62  ;;  %v993_v3 = vor.u32 %v1237_v0, %v992_v63  ;;  %v1235_v4 = vld [vmem:[%s1832_s0 + $0x4c] sm:$0xf]  ;;  %v994_v5 = vld [vmem:[%s1832_s0 + $0x58] sm:$0xf0]  ;;  %v1000_v7 = vld [vmem:[%s1832_s0 + $0x60] sm:$0xf] }
  0x14   :  { %590 = vmatpush.bf16.msra.mxu2 %v1277_v21  ;;  %v997_v6 = vor.u32 %v1235_v4, %v994_v5  ;;  %v1240_v8 = vld [vmem:[%s1832_s0 + $0x6c] sm:$0xf0]  ;;  %v1238_v9 = vld [vmem:[%s1832_s0 + $0x64] sm:$0xf]  ;;  %v1002_v10 = vld [vmem:[%s1832_s0 + $0x70] sm:$0xf0] }
  0x15   :  { %v1008_v11 = vld [vmem:[%s1832_s0 + $0x68] sm:$0xf]  ;;  %v1241_v12 = vld [vmem:[%s1832_s0 + $0x74] sm:$0xf0]  ;;  %v1001_v13 = vor.u32 %v1240_v8, %v1000_v7  ;;  %v1005_v14 = vor.u32 %v1238_v9, %v1002_v10  ;;  %v1239_v16 = vld [vmem:[%s1832_s0 + $0x6c] sm:$0xf] }
  0x16   :  { %638 = vmatpush.bf16.msra.mxu3 %v1286_v20  ;;  %493 = vmatpush.bf16.msra.mxu0 %v1260_v22  ;;  %v1009_v15 = vor.u32 %v1241_v12, %v1008_v11  ;;  %v1010_v17 = vld [vmem:[%s1832_s0 + $0x78] sm:$0xf0]  ;;  %v1016_v19 = vld [vmem:[%s1832_s0 + $0x80] sm:$0xf]  ;;  %v1244_v20 = vld [vmem:[%s1832_s0 + $0x8c] sm:$0xf0] }
  0x17   :  { %542 = vmatpush.bf16.msra.mxu1 %v1268_v23  ;;  %v1013_v18 = vor.u32 %v1239_v16, %v1010_v17  ;;  %v1242_v21 = vld [vmem:[%s1832_s0 + $0x84] sm:$0xf]  ;;  %v1018_v22 = vld [vmem:[%s1832_s0 + $0x90] sm:$0xf0]  ;;  %v1024_v23 = vld [vmem:[%s1832_s0 + $0x88] sm:$0xf] }
  0x18   :  { %591 = vmatpush.bf16.msra.mxu2 %v1276_v25  ;;  %v1017_v25 = vor.u32 %v1244_v20, %v1016_v19  ;;  %v1246_v33 = vld [vmem:[%s1832_s0 + $0xa4] sm:$0xf]  ;;  %v1034_v34 = vld [vmem:[%s1832_s0 + $0xb0] sm:$0xf0]  ;;  %v1040_v35 = vld [vmem:[%s1832_s0 + $0xa8] sm:$0xf] }
  0x19   :  { %v1249_v36 = vld [vmem:[%s1832_s0 + $0xb4] sm:$0xf0]  ;;  %v1037_v38 = vor.u32 %v1246_v33, %v1034_v34  ;;  %v1252_v44 = vld [vmem:[%s1832_s0 + $0xcc] sm:$0xf0]  ;;  %v1250_v45 = vld [vmem:[%s1832_s0 + $0xc4] sm:$0xf] }
  0x1a   :  { %639 = vmatpush.bf16.msra.mxu3 %v1285_v24  ;;  %494 = vmatpush.bf16.msra.mxu0 %v1259_v26  ;;  %v1245_v24 = vld [vmem:[%s1832_s0 + $0x94] sm:$0xf0]  ;;  %v1021_v26 = vor.u32 %v1242_v21, %v1018_v22  ;;  %v1041_v39 = vor.u32 %v1249_v36, %v1040_v35  ;;  %v1056_v47 = vld [vmem:[%s1832_s0 + $0xc8] sm:$0xf]  ;;  %v1251_v52 = vld [vmem:[%s1832_s0 + $0xcc] sm:$0xf] }
  0x1b   :  { %543 = vmatpush.bf16.msra.mxu1 %v1267_v27  ;;  %v1025_v27 = vor.u32 %v1245_v24, %v1024_v23  ;;  %v1253_v48 = vld [vmem:[%s1832_s0 + $0xd4] sm:$0xf0]  ;;  %v1256_v56 = vld [vmem:[%s1832_s0 + $0xec] sm:$0xf0]  ;;  %v1254_v57 = vld [vmem:[%s1832_s0 + $0xe4] sm:$0xf] }
  0x1c   :  { %592 = vmatpush.bf16.msra.mxu2 %v1275_v29  ;;  %v1026_v29 = vld [vmem:[%s1832_s0 + $0x98] sm:$0xf0]  ;;  %v1057_v51 = vor.u32 %v1253_v48, %v1056_v47  ;;  %v1072_v59 = vld [vmem:[%s1832_s0 + $0xe8] sm:$0xf]  ;;  %v1257_v60 = vld [vmem:[%s1832_s0 + $0xf4] sm:$0xf0] }
  0x1d   :  { %v1073_v63 = vor.u32 %v1257_v60, %v1072_v59  ;;  %v1255_v0 = vld [vmem:[%s1832_s0 + $0xec] sm:$0xf] }
  0x1e   :  { %640 = vmatpush.bf16.msra.mxu3 %v1284_v28  ;;  %495 = vmatpush.bf16.msra.mxu0 %v1258_v31  ;;  %v1243_v28 = vld [vmem:[%s1832_s0 + $0x8c] sm:$0xf]  ;;  %v1032_v31 = vld [vmem:[%s1832_s0 + $0xa0] sm:$0xf] }
  0x1f   :  { %544 = vmatpush.bf16.msra.mxu1 %v1266_v32  ;;  %v1248_v32 = vld [vmem:[%s1832_s0 + $0xac] sm:$0xf0] }
  0x20   :  { %593 = vmatpush.bf16.msra.mxu2 %v1274_v37  ;;  %v1033_v37 = vor.u32 %v1248_v32, %v1032_v31  ;;  %v1291_v32 = vmov 0.0  }
  0x21   :  { %496 = vmatmul.bf16.vlgmr.msra.gmra.mxu0 %v953_v40  ;;  %v1247_v40 = vld [vmem:[%s1832_s0 + $0xac] sm:$0xf] }
  0x22   :  { %641 = vmatpush.bf16.msra.mxu3 %v1283_v30  ;;  %545 = vmatmul.bf16.vlgmr.msra.gmra.mxu1 %v957_v41  ;;  %v1029_v30 = vor.u32 %v1243_v28, %v1026_v29  ;;  %v1042_v41 = vld [vmem:[%s1832_s0 + $0xb8] sm:$0xf0] }
  0x23   :  { %594 = vmatmul.bf16.vlgmr.msra.gmra.mxu2 %v961_v42  ;;  %v1045_v42 = vor.u32 %v1247_v40, %v1042_v41 }
  0x26   :  { %642 = vmatpush.bf16.msra.mxu3 %v1282_v43  ;;  %v1048_v43 = vld [vmem:[%s1832_s0 + $0xc0] sm:$0xf] }
  0x27   :  { %v1049_v49 = vor.u32 %v1252_v44, %v1048_v43 }
  0x29   :  { %1202 = vmatmul.msk.bf16.vlgmr.msra.gmra.mxu3 %vm459_vm1, %v965_v46  ;;  %v1050_v46 = vld [vmem:[%s1832_s0 + $0xd0] sm:$0xf0] }
  0x2a   :  { %v1053_v50 = vor.u32 %v1250_v45, %v1050_v46 }
  0x31   :  { %501 = vmatmul.bf16.gmra.mxu0 %v969_v53  ;;  %v1058_v53 = vld [vmem:[%s1832_s0 + $0xd8] sm:$0xf0] }
  0x32   :  { %550 = vmatmul.bf16.gmra.mxu1 %v973_v54  ;;  %v1061_v54 = vor.u32 %v1251_v52, %v1058_v53 }
  0x33   :  { %599 = vmatmul.bf16.gmra.mxu2 %v977_v55  ;;  %v1064_v55 = vld [vmem:[%s1832_s0 + $0xe0] sm:$0xf] }
  0x34   :  { %v1065_v61 = vor.u32 %v1256_v56, %v1064_v55 }
  0x39   :  { %1203 = vmatmul.msk.bf16.gmra.mxu3 %vm459_vm1, %v981_v58  ;;  %v1066_v58 = vld [vmem:[%s1832_s0 + $0xf0] sm:$0xf0] }
  0x3a   :  { %v1069_v62 = vor.u32 %v1254_v57, %v1066_v58 }
  0x41   :  { %506 = vmatmul.bf16.gmra.mxu0 %v985_v1  ;;  %v1074_v1 = vld [vmem:[%s1832_s0 + $0xf8] sm:$0xf0] }
  0x42   :  { %555 = vmatmul.bf16.gmra.mxu1 %v989_v2  ;;  %v1077_v2 = vor.u32 %v1255_v0, %v1074_v1 }
  0x43   :  { %604 = vmatmul.bf16.gmra.mxu2 %v993_v3  ;;  %v1621_v3 = vld [vmem:[%s1833_s2] ss:$0 sm:$0xff] }
  0x49   :  { %1204 = vmatmul.msk.bf16.gmra.mxu3 %vm459_vm1, %v997_v6 }
  0x51   :  { %511 = vmatmul.bf16.gmra.mxu0 %v1001_v13 }
  0x52   :  { %560 = vmatmul.bf16.gmra.mxu1 %v1005_v14 }
  0x53   :  { %609 = vmatmul.bf16.gmra.mxu2 %v1009_v15  ;;  %v700_v15 = vld [vmem:[%s1834_s3] sm:$0xff] }
  0x54   :  { %v748_v20 = vmul.f32 0.0, %v700_v15 }
  0x59   :  { %1205 = vmatmul.msk.bf16.gmra.mxu3 %vm459_vm1, %v1013_v18 }
  0x61   :  { %516 = vmatmul.bf16.gmra.mxu0 %v1017_v25 }
  0x62   :  { %565 = vmatmul.bf16.gmra.mxu1 %v1021_v26 }
  0x63   :  { %614 = vmatmul.bf16.gmra.mxu2 %v1025_v27 }
  0x69   :  { %1206 = vmatmul.msk.bf16.gmra.mxu3 %vm459_vm1, %v1029_v30  ;;  %v701_v30 = vld [vmem:[%s1834_s3 + $0x8] sm:$0xff] }
  0x71   :  { %521 = vmatmul.bf16.gmra.mxu0 %v1033_v37 }
  0x72   :  { %570 = vmatmul.bf16.gmra.mxu1 %v1037_v38  ;;  %v749_v38 = vmul.f32 0.0, %v701_v30 }
  0x73   :  { %619 = vmatmul.bf16.gmra.mxu2 %v1041_v39 }
  0x79   :  { %1207 = vmatmul.msk.bf16.gmra.mxu3 %vm459_vm1, %v1045_v42 }
  0x81   :  { %526 = vmatmul.bf16.gmra.mxu0 %v1049_v49 }
  0x82   :  { %575 = vmatmul.bf16.gmra.mxu1 %v1053_v50  ;;  %v702_v50 = vld [vmem:[%s1834_s3 + $0x10] sm:$0xff] }
  0x83   :  { %624 = vmatmul.bf16.gmra.mxu2 %v1057_v51  ;;  %v750_v53 = vmul.f32 0.0, %v702_v50 }
  0x89   :  { %1208 = vmatmul.msk.bf16.gmra.mxu3 %vm459_vm1, %v1061_v54 }
  0x91   :  { %531 = vmatmul.bf16.gmra.mxu0 %v1065_v61 }
  0x92   :  { %580 = vmatmul.bf16.gmra.mxu1 %v1069_v62 }
  0x93   :  { %629 = vmatmul.bf16.gmra.mxu2 %v1073_v63 }
  0x99   :  { %1209 = vmatmul.msk.bf16.gmra.mxu3 %vm459_vm1, %v1077_v2 }
  0x9e   :  { %v497_v4 = vpop.f32.mrf.mxu0 }
  0x9f   :  { %v546_v5 = vpop.f32.mrf.mxu1  ;;  %v498_v6 = vadd.f32 %v1621_v3, %v497_v4 }
  0xa1   :  { %v547_v7 = vadd.f32 %v546_v5, %v498_v6 }
  0xa6   :  { %v595_v8 = vpop.f32.mrf.mxu2  ;;  %v499_v10 = vpop.f32.mrf.mxu0 }
  0xa7   :  { %v596_v9 = vadd.f32 %v595_v8, %v547_v7  ;;  %v548_v11 = vpop.f32.mrf.mxu1  ;;  %v500_v13 = vadd.f32 %v1621_v3, %v499_v10  ;;  %v703_v8 = vld [vmem:[%s1834_s3 + $0x18] sm:$0xff] }
  0xa9   :  { %v549_v18 = vadd.f32 %v548_v11, %v500_v13 }
  0xac   :  { %v644_v12 = vpop.f32.mrf.mxu3 }
  0xad   :  { %v645_v14 = vadd.f32 %v644_v12, %v596_v9 }
  0xae   :  { %v597_v17 = vpop.f32.mrf.mxu2  ;;  %v502_v21 = vpop.f32.mrf.mxu0 }
  0xaf   :  { %v684_v16 = vmul.f32 10.0, %v645_v14  ;;  %v551_v22 = vpop.f32.mrf.mxu1  ;;  %v503_v23 = vadd.f32 %v1621_v3, %v502_v21  ;;  %v598_v25 = vadd.f32 %v597_v17, %v549_v18 }
  0xb1   :  { %v716_v19 = vmul.f32 128.0, %v684_v16  ;;  %v552_v29 = vadd.f32 %v551_v22, %v503_v23 }
  0xb3   :  { %v732_v24 = vadd.f32 %v716_v19, %v700_v15  ;;  %v751_v15 = vmul.f32 0.0, %v703_v8 }
  0xb4   :  { %v646_v26 = vpop.f32.mrf.mxu3 }
  0xb5   :  { %v764_v27 = vsub.f32 %v732_v24, %v748_v20  ;;  %v647_v28 = vadd.f32 %v646_v26, %v598_v25 }
  0xb6   :  { %v600_v34 = vpop.f32.mrf.mxu2  ;;  %v504_v39 = vpop.f32.mrf.mxu0 }
  0xb7   :  { %vm780_vm2 = vcmp.ge.f32.partialorder %v764_v27, 2e-07  ;;  %v685_v31 = vmul.f32 10.0, %v647_v28  ;;  %v553_v40 = vpop.f32.mrf.mxu1  ;;  %v601_v41 = vadd.f32 %v600_v34, %v552_v29  ;;  %v505_v48 = vadd.f32 %v1621_v3, %v504_v39 }
  0xb8   :  { %v1210_v33 = vsel %vm780_vm2, 1.0, %v1291_v32 }
  0xb9   :  { %v828_v35 = vpack.c.bf16 %v1210_v33, %v1210_v33  ;;  %v877_v36 = vsub.f32 1.0, %v1210_v33  ;;  %v717_v37 = vmul.f32 128.0, %v685_v31  ;;  %v861_v42 = vmul.f32 0.0, %v1210_v33 }
  0xba   :  { %v554_v57 = vadd.f32 %v553_v40, %v505_v48 }
  0xbb   :  { %845 = vst.msk [vmem:[%s1835_s4] sm:$0xf] %vm844_vm3, %v828_v35  ;;  %v893_v43 = vmul.f32 %v877_v36, %v764_v27  ;;  %v733_v44 = vadd.f32 %v717_v37, %v701_v30  ;;  %v704_v27 = vld [vmem:[%s1834_s3 + $0x20] sm:$0xff] }
  0xbc   :  { %v649_v45 = vpop.f32.mrf.mxu3  ;;  %v752_v30 = vmul.f32 0.0, %v704_v27 }
  0xbd   :  { %v909_v46 = vadd.f32 %v893_v43, %v861_v42  ;;  %v765_v47 = vsub.f32 %v733_v44, %v749_v38  ;;  %v650_v49 = vadd.f32 %v649_v45, %v601_v41 }
  0xbe   :  { %v602_v54 = vpop.f32.mrf.mxu2  ;;  %v507_v59 = vpop.f32.mrf.mxu0 }
  0xbf   :  { %926 = vst.msk [vmem:[%s1836_s5] sm:$0xff] %vm925_vm4, %v909_v46  ;;  %vm781_vm5 = vcmp.ge.f32.partialorder %v765_v47, 2e-07  ;;  %v686_v51 = vmul.f32 10.0, %v650_v49  ;;  %v556_v60 = vpop.f32.mrf.mxu1  ;;  %v508_v61 = vadd.f32 %v1621_v3, %v507_v59  ;;  %v603_v1 = vadd.f32 %v602_v54, %v554_v57  ;;  %v705_v49 = vld [vmem:[%s1834_s3 + $0x28] sm:$0xff] }
  0xc0   :  { %v1211_v52 = vsel %vm781_vm5, 1.0, %v1291_v32 }
  0xc1   :  { %v829_v55 = vpack.c.bf16 %v1211_v52, %v1211_v52  ;;  %v878_v56 = vsub.f32 1.0, %v1211_v52  ;;  %v718_v58 = vmul.f32 128.0, %v686_v51  ;;  %v862_v62 = vmul.f32 0.0, %v1211_v52 }
  0xc2   :  { %v557_v7 = vadd.f32 %v556_v60, %v508_v61 }
  0xc3   :  { %846 = vst.msk [vmem:[%s1835_s4 + $0x4] sm:$0xf] %vm844_vm3, %v829_v55  ;;  %v894_v63 = vmul.f32 %v878_v56, %v765_v47  ;;  %v734_v0 = vadd.f32 %v718_v58, %v702_v50  ;;  %v753_v56 = vmul.f32 0.0, %v705_v49 }
  0xc4   :  { %v651_v2 = vpop.f32.mrf.mxu3 }
  0xc5   :  { %v910_v4 = vadd.f32 %v894_v63, %v862_v62  ;;  %v766_v5 = vsub.f32 %v734_v0, %v750_v53  ;;  %v652_v6 = vadd.f32 %v651_v2, %v603_v1 }
  0xc6   :  { %v605_v11 = vpop.f32.mrf.mxu2  ;;  %v509_v16 = vpop.f32.mrf.mxu0 }
  0xc7   :  { %927 = vst.msk [vmem:[%s1836_s5 + $0x8] sm:$0xff] %vm925_vm4, %v910_v4  ;;  %vm782_vm6 = vcmp.ge.f32.partialorder %v766_v5, 2e-07  ;;  %v687_v9 = vmul.f32 10.0, %v652_v6  ;;  %v558_v17 = vpop.f32.mrf.mxu1  ;;  %v606_v18 = vadd.f32 %v605_v11, %v557_v7  ;;  %v510_v25 = vadd.f32 %v1621_v3, %v509_v16 }
  0xc8   :  { %v1212_v10 = vsel %vm782_vm6, 1.0, %v1291_v32 }
  0xc9   :  { %v830_v12 = vpack.c.bf16 %v1212_v10, %v1212_v10  ;;  %v879_v13 = vsub.f32 1.0, %v1212_v10  ;;  %v719_v14 = vmul.f32 128.0, %v687_v9  ;;  %v863_v19 = vmul.f32 0.0, %v1212_v10 }
  0xca   :  { %v559_v35 = vadd.f32 %v558_v17, %v510_v25 }
  0xcb   :  { %847 = vst.msk [vmem:[%s1835_s4 + $0x8] sm:$0xf] %vm844_vm3, %v830_v12  ;;  %v895_v20 = vmul.f32 %v879_v13, %v766_v5  ;;  %v735_v21 = vadd.f32 %v719_v14, %v703_v8  ;;  %v706_v5 = vld [vmem:[%s1834_s3 + $0x30] sm:$0xff] }
  0xcc   :  { %v654_v22 = vpop.f32.mrf.mxu3  ;;  %v754_v8 = vmul.f32 0.0, %v706_v5 }
  0xcd   :  { %v911_v23 = vadd.f32 %v895_v20, %v863_v19  ;;  %v767_v24 = vsub.f32 %v735_v21, %v751_v15  ;;  %v655_v26 = vadd.f32 %v654_v22, %v606_v18 }
  0xce   :  { %v607_v31 = vpop.f32.mrf.mxu2  ;;  %v512_v37 = vpop.f32.mrf.mxu0 }
  0xcf   :  { %928 = vst.msk [vmem:[%s1836_s5 + $0x10] sm:$0xff] %vm925_vm4, %v911_v23  ;;  %vm783_vm7 = vcmp.ge.f32.partialorder %v767_v24, 2e-07  ;;  %v688_v28 = vmul.f32 10.0, %v655_v26  ;;  %v561_v38 = vpop.f32.mrf.mxu1  ;;  %v513_v39 = vadd.f32 %v1621_v3, %v512_v37  ;;  %v608_v43 = vadd.f32 %v607_v31, %v559_v35  ;;  %v707_v26 = vld [vmem:[%s1834_s3 + $0x38] sm:$0xff] }
  0xd0   :  { %v1213_v29 = vsel %vm783_vm7, 1.0, %v1291_v32 }
  0xd1   :  { %v831_v33 = vpack.c.bf16 %v1213_v29, %v1213_v29  ;;  %v880_v34 = vsub.f32 1.0, %v1213_v29  ;;  %v720_v36 = vmul.f32 128.0, %v688_v28  ;;  %v864_v40 = vmul.f32 0.0, %v1213_v29 }
  0xd2   :  { %v562_v48 = vadd.f32 %v561_v38, %v513_v39 }
  0xd3   :  { %848 = vst.msk [vmem:[%s1835_s4 + $0xc] sm:$0xf] %vm844_vm3, %v831_v33  ;;  %v896_v41 = vmul.f32 %v880_v34, %v767_v24  ;;  %v736_v42 = vadd.f32 %v720_v36, %v704_v27  ;;  %v755_v34 = vmul.f32 0.0, %v707_v26 }
  0xd4   :  { %v656_v44 = vpop.f32.mrf.mxu3 }
  0xd5   :  { %v912_v45 = vadd.f32 %v896_v41, %v864_v40  ;;  %v768_v46 = vsub.f32 %v736_v42, %v752_v30  ;;  %v657_v47 = vadd.f32 %v656_v44, %v608_v43 }
  0xd6   :  { %v610_v52 = vpop.f32.mrf.mxu2  ;;  %v514_v57 = vpop.f32.mrf.mxu0 }
  0xd7   :  { %929 = vst.msk [vmem:[%s1836_s5 + $0x18] sm:$0xff] %vm925_vm4, %v912_v45  ;;  %vm784_vm8 = vcmp.ge.f32.partialorder %v768_v46, 2e-07  ;;  %v689_v50 = vmul.f32 10.0, %v657_v47  ;;  %v563_v58 = vpop.f32.mrf.mxu1  ;;  %v611_v59 = vadd.f32 %v610_v52, %v562_v48  ;;  %v515_v2 = vadd.f32 %v1621_v3, %v514_v57 }
  0xd8   :  { %v1214_v51 = vsel %vm784_vm8, 1.0, %v1291_v32 }
  0xd9   :  { %v832_v53 = vpack.c.bf16 %v1214_v51, %v1214_v51  ;;  %v881_v54 = vsub.f32 1.0, %v1214_v51  ;;  %v721_v55 = vmul.f32 128.0, %v689_v50  ;;  %v865_v60 = vmul.f32 0.0, %v1214_v51 }
  0xda   :  { %v564_v12 = vadd.f32 %v563_v58, %v515_v2 }
  0xdb   :  { %849 = vst.msk [vmem:[%s1835_s4 + $0x10] sm:$0xf] %vm844_vm3, %v832_v53  ;;  %v897_v61 = vmul.f32 %v881_v54, %v768_v46  ;;  %v737_v62 = vadd.f32 %v721_v55, %v705_v49  ;;  %v708_v46 = vld [vmem:[%s1834_s3 + $0x40] sm:$0xff] }
  0xdc   :  { %v659_v63 = vpop.f32.mrf.mxu3  ;;  %v756_v49 = vmul.f32 0.0, %v708_v46 }
  0xdd   :  { %v913_v0 = vadd.f32 %v897_v61, %v865_v60  ;;  %v769_v1 = vsub.f32 %v737_v62, %v753_v56  ;;  %v660_v4 = vadd.f32 %v659_v63, %v611_v59 }
  0xde   :  { %v612_v9 = vpop.f32.mrf.mxu2  ;;  %v517_v14 = vpop.f32.mrf.mxu0 }
  0xdf   :  { %930 = vst.msk [vmem:[%s1836_s5 + $0x20] sm:$0xff] %vm925_vm4, %v913_v0  ;;  %vm785_vm9 = vcmp.ge.f32.partialorder %v769_v1, 2e-07  ;;  %v690_v6 = vmul.f32 10.0, %v660_v4  ;;  %v566_v15 = vpop.f32.mrf.mxu1  ;;  %v518_v16 = vadd.f32 %v1621_v3, %v517_v14  ;;  %v613_v20 = vadd.f32 %v612_v9, %v564_v12  ;;  %v709_v4 = vld [vmem:[%s1834_s3 + $0x48] sm:$0xff] }
  0xe0   :  { %v1215_v7 = vsel %vm785_vm9, 1.0, %v1291_v32 }
  0xe1   :  { %v833_v10 = vpack.c.bf16 %v1215_v7, %v1215_v7  ;;  %v882_v11 = vsub.f32 1.0, %v1215_v7  ;;  %v722_v13 = vmul.f32 128.0, %v690_v6  ;;  %v866_v17 = vmul.f32 0.0, %v1215_v7 }
  0xe2   :  { %v567_v25 = vadd.f32 %v566_v15, %v518_v16 }
  0xe3   :  { %850 = vst.msk [vmem:[%s1835_s4 + $0x14] sm:$0xf] %vm844_vm3, %v833_v10  ;;  %v898_v18 = vmul.f32 %v882_v11, %v769_v1  ;;  %v738_v19 = vadd.f32 %v722_v13, %v706_v5  ;;  %v757_v11 = vmul.f32 0.0, %v709_v4 }
  0xe4   :  { %v661_v21 = vpop.f32.mrf.mxu3 }
  0xe5   :  { %v914_v22 = vadd.f32 %v898_v18, %v866_v17  ;;  %v770_v23 = vsub.f32 %v738_v19, %v754_v8  ;;  %v662_v24 = vadd.f32 %v661_v21, %v613_v20 }
  0xe6   :  { %v615_v29 = vpop.f32.mrf.mxu2  ;;  %v519_v35 = vpop.f32.mrf.mxu0 }
  0xe7   :  { %931 = vst.msk [vmem:[%s1836_s5 + $0x28] sm:$0xff] %vm925_vm4, %v914_v22  ;;  %vm786_vm10 = vcmp.ge.f32.partialorder %v770_v23, 2e-07  ;;  %v691_v27 = vmul.f32 10.0, %v662_v24  ;;  %v568_v36 = vpop.f32.mrf.mxu1  ;;  %v616_v37 = vadd.f32 %v615_v29, %v567_v25  ;;  %v520_v44 = vadd.f32 %v1621_v3, %v519_v35 }
  0xe8   :  { %v1216_v28 = vsel %vm786_vm10, 1.0, %v1291_v32 }
  0xe9   :  { %v834_v30 = vpack.c.bf16 %v1216_v28, %v1216_v28  ;;  %v883_v31 = vsub.f32 1.0, %v1216_v28  ;;  %v723_v33 = vmul.f32 128.0, %v691_v27  ;;  %v867_v38 = vmul.f32 0.0, %v1216_v28 }
  0xea   :  { %v569_v53 = vadd.f32 %v568_v36, %v520_v44 }
  0xeb   :  { %851 = vst.msk [vmem:[%s1835_s4 + $0x18] sm:$0xf] %vm844_vm3, %v834_v30  ;;  %v899_v39 = vmul.f32 %v883_v31, %v770_v23  ;;  %v739_v40 = vadd.f32 %v723_v33, %v707_v26  ;;  %v710_v23 = vld [vmem:[%s1834_s3 + $0x50] sm:$0xff] }
  0xec   :  { %v664_v41 = vpop.f32.mrf.mxu3  ;;  %v758_v26 = vmul.f32 0.0, %v710_v23 }
  0xed   :  { %v915_v42 = vadd.f32 %v899_v39, %v867_v38  ;;  %v771_v43 = vsub.f32 %v739_v40, %v755_v34  ;;  %v665_v45 = vadd.f32 %v664_v41, %v616_v37 }
  0xee   :  { %v617_v50 = vpop.f32.mrf.mxu2  ;;  %v522_v55 = vpop.f32.mrf.mxu0 }
  0xef   :  { %932 = vst.msk [vmem:[%s1836_s5 + $0x30] sm:$0xff] %vm925_vm4, %v915_v42  ;;  %vm787_vm11 = vcmp.ge.f32.partialorder %v771_v43, 2e-07  ;;  %v692_v47 = vmul.f32 10.0, %v665_v45  ;;  %v571_v56 = vpop.f32.mrf.mxu1  ;;  %v523_v57 = vadd.f32 %v1621_v3, %v522_v55  ;;  %v618_v61 = vadd.f32 %v617_v50, %v569_v53  ;;  %v711_v45 = vld [vmem:[%s1834_s3 + $0x58] sm:$0xff] }
  0xf0   :  { %v1217_v48 = vsel %vm787_vm11, 1.0, %v1291_v32 }
  0xf1   :  { %v835_v51 = vpack.c.bf16 %v1217_v48, %v1217_v48  ;;  %v884_v52 = vsub.f32 1.0, %v1217_v48  ;;  %v724_v54 = vmul.f32 128.0, %v692_v47  ;;  %v868_v58 = vmul.f32 0.0, %v1217_v48 }
  0xf2   :  { %v572_v2 = vadd.f32 %v571_v56, %v523_v57 }
  0xf3   :  { %852 = vst.msk [vmem:[%s1835_s4 + $0x1c] sm:$0xf] %vm844_vm3, %v835_v51  ;;  %v900_v59 = vmul.f32 %v884_v52, %v771_v43  ;;  %v740_v60 = vadd.f32 %v724_v54, %v708_v46  ;;  %v759_v52 = vmul.f32 0.0, %v711_v45 }
  0xf4   :  { %v666_v62 = vpop.f32.mrf.mxu3 }
  0xf5   :  { %v916_v63 = vadd.f32 %v900_v59, %v868_v58  ;;  %v772_v0 = vsub.f32 %v740_v60, %v756_v49  ;;  %v667_v1 = vadd.f32 %v666_v62, %v618_v61 }
  0xf6   :  { %v620_v7 = vpop.f32.mrf.mxu2  ;;  %v524_v12 = vpop.f32.mrf.mxu0 }
  0xf7   :  { %933 = vst.msk [vmem:[%s1836_s5 + $0x38] sm:$0xff] %vm925_vm4, %v916_v63  ;;  %vm788_vm12 = vcmp.ge.f32.partialorder %v772_v0, 2e-07  ;;  %v693_v5 = vmul.f32 10.0, %v667_v1  ;;  %v573_v13 = vpop.f32.mrf.mxu1  ;;  %v621_v14 = vadd.f32 %v620_v7, %v572_v2  ;;  %v525_v21 = vadd.f32 %v1621_v3, %v524_v12 }
  0xf8   :  { %v1218_v6 = vsel %vm788_vm12, 1.0, %v1291_v32 }
  0xf9   :  { %v836_v8 = vpack.c.bf16 %v1218_v6, %v1218_v6  ;;  %v885_v9 = vsub.f32 1.0, %v1218_v6  ;;  %v725_v10 = vmul.f32 128.0, %v693_v5  ;;  %v869_v15 = vmul.f32 0.0, %v1218_v6 }
  0xfa   :  { %v574_v30 = vadd.f32 %v573_v13, %v525_v21 }
  0xfb   :  { %853 = vst.msk [vmem:[%s1835_s4 + $0x20] sm:$0xf] %vm844_vm3, %v836_v8  ;;  %v901_v16 = vmul.f32 %v885_v9, %v772_v0  ;;  %v741_v17 = vadd.f32 %v725_v10, %v709_v4  ;;  %v712_v0 = vld [vmem:[%s1834_s3 + $0x60] sm:$0xff] }
  0xfc   :  { %v669_v18 = vpop.f32.mrf.mxu3  ;;  %v760_v4 = vmul.f32 0.0, %v712_v0 }
  0xfd   :  { %v917_v19 = vadd.f32 %v901_v16, %v869_v15  ;;  %v773_v20 = vsub.f32 %v741_v17, %v757_v11  ;;  %v670_v22 = vadd.f32 %v669_v18, %v621_v14 }
  0xfe   :  { %v622_v27 = vpop.f32.mrf.mxu2  ;;  %v527_v33 = vpop.f32.mrf.mxu0 }
  0xff   :  { %934 = vst.msk [vmem:[%s1836_s5 + $0x40] sm:$0xff] %vm925_vm4, %v917_v19  ;;  %vm789_vm13 = vcmp.ge.f32.partialorder %v773_v20, 2e-07  ;;  %v694_v24 = vmul.f32 10.0, %v670_v22  ;;  %v576_v34 = vpop.f32.mrf.mxu1  ;;  %v528_v35 = vadd.f32 %v1621_v3, %v527_v33  ;;  %v623_v39 = vadd.f32 %v622_v27, %v574_v30  ;;  %v713_v22 = vld [vmem:[%s1834_s3 + $0x68] sm:$0xff] }
 0x100   :  { %v1219_v25 = vsel %vm789_vm13, 1.0, %v1291_v32 }
 0x101   :  { %v837_v28 = vpack.c.bf16 %v1219_v25, %v1219_v25  ;;  %v886_v29 = vsub.f32 1.0, %v1219_v25  ;;  %v726_v31 = vmul.f32 128.0, %v694_v24  ;;  %v870_v36 = vmul.f32 0.0, %v1219_v25 }
 0x102   :  { %v577_v44 = vadd.f32 %v576_v34, %v528_v35 }
 0x103   :  { %854 = vst.msk [vmem:[%s1835_s4 + $0x24] sm:$0xf] %vm844_vm3, %v837_v28  ;;  %v902_v37 = vmul.f32 %v886_v29, %v773_v20  ;;  %v742_v38 = vadd.f32 %v726_v31, %v710_v23  ;;  %v761_v29 = vmul.f32 0.0, %v713_v22 }
 0x104   :  { %v671_v40 = vpop.f32.mrf.mxu3 }
 0x105   :  { %v918_v41 = vadd.f32 %v902_v37, %v870_v36  ;;  %v774_v42 = vsub.f32 %v742_v38, %v758_v26  ;;  %v672_v43 = vadd.f32 %v671_v40, %v623_v39 }
 0x106   :  { %v625_v48 = vpop.f32.mrf.mxu2  ;;  %v529_v53 = vpop.f32.mrf.mxu0 }
 0x107   :  { %935 = vst.msk [vmem:[%s1836_s5 + $0x48] sm:$0xff] %vm925_vm4, %v918_v41  ;;  %vm790_vm14 = vcmp.ge.f32.partialorder %v774_v42, 2e-07  ;;  %v695_v46 = vmul.f32 10.0, %v672_v43  ;;  %v626_v54 = vadd.f32 %v625_v48, %v577_v44  ;;  %v578_v58 = vpop.f32.mrf.mxu1  ;;  %v530_v62 = vadd.f32 %v1621_v3, %v529_v53  ;;  %v714_v41 = vld [vmem:[%s1834_s3 + $0x70] sm:$0xff] }
 0x108   :  { %v1220_v47 = vsel %vm790_vm14, 1.0, %v1291_v32 }
 0x109   :  { %v838_v49 = vpack.c.bf16 %v1220_v47, %v1220_v47  ;;  %v887_v50 = vsub.f32 1.0, %v1220_v47  ;;  %v727_v51 = vmul.f32 128.0, %v695_v46  ;;  %v871_v55 = vmul.f32 0.0, %v1220_v47 }
 0x10a   :  { %v579_v8 = vadd.f32 %v578_v58, %v530_v62  ;;  %v715_v58 = vld [vmem:[%s1834_s3 + $0x78] sm:$0xff] }
 0x10b   :  { %855 = vst.msk [vmem:[%s1835_s4 + $0x28] sm:$0xf] %vm844_vm3, %v838_v49  ;;  %v903_v56 = vmul.f32 %v887_v50, %v774_v42  ;;  %v743_v57 = vadd.f32 %v727_v51, %v711_v45  ;;  %v762_v45 = vmul.f32 0.0, %v714_v41 }
 0x10c   :  { %v674_v59 = vpop.f32.mrf.mxu3 }
 0x10d   :  { %v919_v60 = vadd.f32 %v903_v56, %v871_v55  ;;  %v775_v61 = vsub.f32 %v743_v57, %v759_v52  ;;  %v675_v63 = vadd.f32 %v674_v59, %v626_v54 }
 0x10e   :  { %v627_v5 = vpop.f32.mrf.mxu2  ;;  %v532_v10 = vpop.f32.mrf.mxu0 }
 0x10f   :  { %936 = vst.msk [vmem:[%s1836_s5 + $0x50] sm:$0xff] %vm925_vm4, %v919_v60  ;;  %vm791_vm15 = vcmp.ge.f32.partialorder %v775_v61, 2e-07  ;;  %v696_v1 = vmul.f32 10.0, %v675_v63  ;;  %v533_v11 = vadd.f32 %v1621_v3, %v532_v10  ;;  %v628_v15 = vadd.f32 %v627_v5, %v579_v8  ;;  %v581_v19 = vpop.f32.mrf.mxu1 }
 0x110   :  { %v1221_v2 = vsel %vm791_vm15, 1.0, %v1291_v32 }
 0x111   :  { %v839_v6 = vpack.c.bf16 %v1221_v2, %v1221_v2  ;;  %v888_v7 = vsub.f32 1.0, %v1221_v2  ;;  %v728_v9 = vmul.f32 128.0, %v696_v1  ;;  %v872_v12 = vmul.f32 0.0, %v1221_v2 }
 0x112   :  { %v582_v21 = vadd.f32 %v581_v19, %v533_v11 }
 0x113   :  { %856 = vst.msk [vmem:[%s1835_s4 + $0x2c] sm:$0xf] %vm844_vm3, %v839_v6  ;;  %v904_v13 = vmul.f32 %v888_v7, %v775_v61  ;;  %v744_v14 = vadd.f32 %v728_v9, %v712_v0  ;;  %v763_v0 = vmul.f32 0.0, %v715_v58 }
 0x114   :  { %v676_v16 = vpop.f32.mrf.mxu3 }
 0x115   :  { %v920_v17 = vadd.f32 %v904_v13, %v872_v12  ;;  %v776_v18 = vsub.f32 %v744_v14, %v760_v4  ;;  %v677_v20 = vadd.f32 %v676_v16, %v628_v15 }
 0x116   :  { %v630_v25 = vpop.f32.mrf.mxu2  ;;  %v534_v31 = vpop.f32.mrf.mxu0 }
 0x117   :  { %937 = vst.msk [vmem:[%s1836_s5 + $0x58] sm:$0xff] %vm925_vm4, %v920_v17  ;;  %vm792_vm0 = vcmp.ge.f32.partialorder %v776_v18, 2e-07  ;;  %v697_v23 = vmul.f32 10.0, %v677_v20  ;;  %v631_v30 = vadd.f32 %v630_v25, %v582_v21  ;;  %v535_v39 = vadd.f32 %v1621_v3, %v534_v31  ;;  %v583_v44 = vpop.f32.mrf.mxu1 }
 0x118   :  { %v1222_v24 = vsel %vm792_vm0, 1.0, %v1291_v32 }
 0x119   :  { %v840_v26 = vpack.c.bf16 %v1222_v24, %v1222_v24  ;;  %v889_v27 = vsub.f32 1.0, %v1222_v24  ;;  %v729_v28 = vmul.f32 128.0, %v697_v23  ;;  %v873_v33 = vmul.f32 0.0, %v1222_v24 }
 0x11a   :  { %v584_v3 = vadd.f32 %v583_v44, %v535_v39 }
 0x11b   :  { %857 = vst.msk [vmem:[%s1835_s4 + $0x30] sm:$0xf] %vm844_vm3, %v840_v26  ;;  %v905_v34 = vmul.f32 %v889_v27, %v776_v18  ;;  %v745_v35 = vadd.f32 %v729_v28, %v713_v22 }
 0x11c   :  { %v679_v36 = vpop.f32.mrf.mxu3 }
 0x11d   :  { %v921_v37 = vadd.f32 %v905_v34, %v873_v33  ;;  %v777_v38 = vsub.f32 %v745_v35, %v761_v29  ;;  %v680_v40 = vadd.f32 %v679_v36, %v631_v30 }
 0x11e   :  { %v632_v46 = vpop.f32.mrf.mxu2 }
 0x11f   :  { %938 = vst.msk [vmem:[%s1836_s5 + $0x60] sm:$0xff] %vm925_vm4, %v921_v37  ;;  %vm793_vm1 = vcmp.ge.f32.partialorder %v777_v38, 2e-07  ;;  %v698_v42 = vmul.f32 10.0, %v680_v40  ;;  %v633_v53 = vadd.f32 %v632_v46, %v584_v3 }
 0x120   :  { %v1223_v43 = vsel %vm793_vm1, 1.0, %v1291_v32 }
 0x121   :  { %v841_v47 = vpack.c.bf16 %v1223_v43, %v1223_v43  ;;  %v890_v48 = vsub.f32 1.0, %v1223_v43  ;;  %v730_v49 = vmul.f32 128.0, %v698_v42  ;;  %v874_v50 = vmul.f32 0.0, %v1223_v43 }
 0x123   :  { %858 = vst.msk [vmem:[%s1835_s4 + $0x34] sm:$0xf] %vm844_vm3, %v841_v47  ;;  %v906_v51 = vmul.f32 %v890_v48, %v777_v38  ;;  %v746_v52 = vadd.f32 %v730_v49, %v714_v41 }
 0x124   :  { %v681_v54 = vpop.f32.mrf.mxu3 }
 0x125   :  { %v922_v55 = vadd.f32 %v906_v51, %v874_v50  ;;  %v778_v56 = vsub.f32 %v746_v52, %v762_v45  ;;  %v682_v57 = vadd.f32 %v681_v54, %v633_v53 }
 0x127   :  { %939 = vst.msk [vmem:[%s1836_s5 + $0x68] sm:$0xff] %vm925_vm4, %v922_v55  ;;  %vm794_vm2 = vcmp.ge.f32.partialorder %v778_v56, 2e-07  ;;  %v699_v59 = vmul.f32 10.0, %v682_v57 }
 0x128   :  { %v1224_v60 = vsel %vm794_vm2, 1.0, %v1291_v32 }
 0x129   :  { %v842_v61 = vpack.c.bf16 %v1224_v60, %v1224_v60  ;;  %v891_v62 = vsub.f32 1.0, %v1224_v60  ;;  %v731_v63 = vmul.f32 128.0, %v699_v59  ;;  %v875_v1 = vmul.f32 0.0, %v1224_v60 }
 0x12b   :  { %859 = vst.msk [vmem:[%s1835_s4 + $0x38] sm:$0xf] %vm844_vm3, %v842_v61  ;;  %v907_v2 = vmul.f32 %v891_v62, %v778_v56  ;;  %v747_v4 = vadd.f32 %v731_v63, %v715_v58 }
 0x12d   :  { %v923_v5 = vadd.f32 %v907_v2, %v875_v1  ;;  %v779_v6 = vsub.f32 %v747_v4, %v763_v0 }
 0x12f   :  { %940 = vst.msk [vmem:[%s1836_s5 + $0x70] sm:$0xff] %vm925_vm4, %v923_v5  ;;  %vm795_vm5 = vcmp.ge.f32.partialorder %v779_v6, 2e-07 }
 0x130   :  { %v1225_v7 = vsel %vm795_vm5, 1.0, %v1291_v32 }
 0x131   :  { %v843_v8 = vpack.c.bf16 %v1225_v7, %v1225_v7  ;;  %v892_v9 = vsub.f32 1.0, %v1225_v7  ;;  %v876_v10 = vmul.f32 0.0, %v1225_v7 }
 0x133   :  { %860 = vst.msk [vmem:[%s1835_s4 + $0x3c] sm:$0xf] %vm844_vm3, %v843_v8  ;;  %v908_v11 = vmul.f32 %v892_v9, %v779_v6 }
 0x135   :  { %v924_v12 = vadd.f32 %v908_v11, %v876_v10 }
 0x137   :  { %941 = vst.msk [vmem:[%s1836_s5 + $0x78] sm:$0xff] %vm925_vm4, %v924_v12 }

// kernel: closed_call.30
= control target key start
LH: loop header
LB: loop body
LE: loop exit
PB: predicated region body
PF: predicated region fallthrough
CT: control target
= control target key end

     0   :  { %vm42_vm0 = vcmask 1043456   ;;  %vm43_vm1 = vcmask 588804   ;;  %s90_s0 = inlined_call_operand.vmem [shape: bf16[8,200], index: 0, kind: input, shape index: {}]   ;;  %s91_s1 = inlined_call_operand.vmem [shape: bf16[8,200], index: 1, kind: input, shape index: {}]   ;;  %s92_s2 = inlined_call_operand.vmem [shape: bf16[8,200], index: 2, kind: input, shape index: {}]   ;;  %s93_s3 = inlined_call_operand.vmem [shape: bf16[8,200], index: 3, kind: input, shape index: {}]   ;;  %s94_s4 = inlined_call_operand.vmem [shape: bf16[8,200], index: 4, kind: output, shape index: {}]  }
   0x1   :  { %v17_v0 = vld [vmem:[%s90_s0] sm:$0xff]  ;;  %vm44_vm2 = vmor %vm43_vm1, %vm42_vm0 }
   0x2   :  { %v18_v1 = vld [vmem:[%s91_s1] sm:$0xff]  ;;  %v19_v3 = vunpack.c.l.bf16 %v17_v0  ;;  %v20_v4 = vunpack.c.h.bf16 %v17_v0 }
   0x3   :  { %v26_v2 = vld [vmem:[%s92_s2] sm:$0xff]  ;;  %v21_v5 = vunpack.c.l.bf16 %v18_v1  ;;  %v22_v6 = vunpack.c.h.bf16 %v18_v1 }
   0x4   :  { %v27_v7 = vld [vmem:[%s93_s3] sm:$0xff]  ;;  %v28_v8 = vunpack.c.l.bf16 %v26_v2  ;;  %v29_v9 = vunpack.c.h.bf16 %v26_v2 }
   0x5   :  { %v30_v10 = vunpack.c.l.bf16 %v27_v7  ;;  %v31_v11 = vunpack.c.h.bf16 %v27_v7  ;;  %v23_v12 = vmax.f32 %v19_v3, %v21_v5  ;;  %v24_v13 = vmax.f32 %v20_v4, %v22_v6 }
   0x7   :  { %v32_v14 = vmax.f32 %v28_v8, %v30_v10  ;;  %v33_v15 = vmax.f32 %v29_v9, %v31_v11 }
   0x9   :  { %v39_v16 = vmax.f32 %v23_v12, %v32_v14  ;;  %v40_v17 = vmax.f32 %v24_v13, %v33_v15 }
   0xb   :  { %v41_v18 = vpack.c.bf16 %v40_v17, %v39_v16 }
   0xd   :  { %45 = vst.msk [vmem:[%s94_s4] sm:$0xff] %vm44_vm2, %v41_v18 }

// kernel: closed_call.31
= control target key start
LH: loop header
LB: loop body
LE: loop exit
PB: predicated region body
PF: predicated region fallthrough
CT: control target
= control target key end

     0   :  { %vm1256_vm0 = vcmask 261120   ;;  %vm1635_vm1 = vcmask 1041408   ;;  %vm1637_vm2 = vcmask 1045508   ;;  %vm1639_vm3 = vcmask 1043456   ;;  %s4622_s1 = inlined_call_operand.vmem [shape: bf16[800,500], index: 1, kind: input, shape index: {}]   ;;  %s4623_s0 = inlined_call_operand.vmem [shape: bf16[2,800], index: 0, kind: input, shape index: {}]   ;;  %s4624_s2 = inlined_call_operand.vmem [shape: f32[1,500], index: 2, kind: input, shape index: {}]   ;;  %s4625_s4 = inlined_call_operand.vmem [shape: bf16[500,10], index: 4, kind: input, shape index: {}]   ;;  %s4626_s3 = inlined_call_operand.vmem [shape: f32[2,500], index: 3, kind: input, shape index: {}]   ;;  %s4627_s7 = inlined_call_operand.vmem [shape: f32[2,500], index: 7, kind: output, shape index: {0}]   ;;  %s4628_s5 = inlined_call_operand.vmem [shape: f32[2,10], index: 5, kind: input, shape index: {}]   ;;  %s4629_s6 = inlined_call_operand.vmem [shape: f32[2,10], index: 6, kind: input, shape index: {}]   ;;  %s4630_s9 = inlined_call_operand.vmem [shape: f32[2,10], index: 9, kind: output, shape index: {2}]   ;;  %s4631_s8 = inlined_call_operand.vmem [shape: f32[2,10], index: 8, kind: output, shape index: {1}]  }
   0x1   :  { %v2122_v0 = vld [vmem:[%s4622_s1 + $0xe0] sm:$0xf]  ;;  %v2968_v1 = vld [vmem:[%s4622_s1 + $0xec] sm:$0xf0]  ;;  %vm1652_vm4 = vcmask 1043458   ;;  %vm1655_vm8 = vcmask 949254  }
   0x2   :  { %v2250_v2 = vld [vmem:[%s4622_s1 + $0x1e0] sm:$0xf]  ;;  %v2123_v3 = vor.u32 %v2968_v1, %v2122_v0  ;;  %v3000_v4 = vld [vmem:[%s4622_s1 + $0x1ec] sm:$0xf0]  ;;  %vm1653_vm5 = vmor %vm1652_vm4, %vm1635_vm1  ;;  %vm1926_vm10 = vcmask 949248   ;;  %vm1991_vm11 = vcmask 74752  }
   0x3   :  { %v2378_v5 = vld [vmem:[%s4622_s1 + $0x2e0] sm:$0xf]  ;;  %v3032_v6 = vld [vmem:[%s4622_s1 + $0x2ec] sm:$0xf0]  ;;  %v2251_v7 = vor.u32 %v3000_v4, %v2250_v2  ;;  %vm1654_vm7 = vmor %vm1637_vm2, %vm1653_vm5 }
   0x4   :  { %v2379_v8 = vor.u32 %v3032_v6, %v2378_v5  ;;  %v2506_v9 = vld [vmem:[%s4622_s1 + $0x3e0] sm:$0xf]  ;;  %v3064_v10 = vld [vmem:[%s4622_s1 + $0x3ec] sm:$0xf0]  ;;  %1259 = vmatpush.bf16.msra.mxu0 %v2123_v3  ;;  %vm1656_vm9 = vmor %vm1655_vm8, %vm1654_vm7 }
   0x5   :  { %v2106_v11 = vld [vmem:[%s4622_s1 + $0xc0] sm:$0xf]  ;;  %v2507_v12 = vor.u32 %v3064_v10, %v2506_v9  ;;  %v2964_v13 = vld [vmem:[%s4622_s1 + $0xcc] sm:$0xf0]  ;;  %1272 = vmatpush.bf16.msra.mxu1 %v2251_v7 }
   0x6   :  { %v2234_v14 = vld [vmem:[%s4622_s1 + $0x1c0] sm:$0xf]  ;;  %v2996_v15 = vld [vmem:[%s4622_s1 + $0x1cc] sm:$0xf0]  ;;  %1285 = vmatpush.bf16.msra.mxu2 %v2379_v8  ;;  %v2107_v16 = vor.u32 %v2964_v13, %v2106_v11 }
   0x7   :  { %v2235_v17 = vor.u32 %v2996_v15, %v2234_v14  ;;  %v2362_v18 = vld [vmem:[%s4622_s1 + $0x2c0] sm:$0xf]  ;;  %v3028_v19 = vld [vmem:[%s4622_s1 + $0x2cc] sm:$0xf0]  ;;  %1298 = vmatpush.bf16.msra.mxu3 %v2507_v12 }
   0x8   :  { %v2490_v20 = vld [vmem:[%s4622_s1 + $0x3c0] sm:$0xf]  ;;  %v2363_v21 = vor.u32 %v3028_v19, %v2362_v18  ;;  %v3060_v22 = vld [vmem:[%s4622_s1 + $0x3cc] sm:$0xf0]  ;;  %1260 = vmatpush.bf16.msra.mxu0 %v2107_v16 }
   0x9   :  { %v2090_v23 = vld [vmem:[%s4622_s1 + $0xa0] sm:$0xf]  ;;  %v2960_v24 = vld [vmem:[%s4622_s1 + $0xac] sm:$0xf0]  ;;  %v2491_v25 = vor.u32 %v3060_v22, %v2490_v20  ;;  %1273 = vmatpush.bf16.msra.mxu1 %v2235_v17 }
   0xa   :  { %v2218_v26 = vld [vmem:[%s4622_s1 + $0x1a0] sm:$0xf]  ;;  %v2992_v27 = vld [vmem:[%s4622_s1 + $0x1ac] sm:$0xf0]  ;;  %v2091_v29 = vor.u32 %v2960_v24, %v2090_v23  ;;  %1286 = vmatpush.bf16.msra.mxu2 %v2363_v21 }
   0xb   :  { %v2346_v28 = vld [vmem:[%s4622_s1 + $0x2a0] sm:$0xf]  ;;  %v3024_v30 = vld [vmem:[%s4622_s1 + $0x2ac] sm:$0xf0]  ;;  %v2219_v33 = vor.u32 %v2992_v27, %v2218_v26  ;;  %1299 = vmatpush.bf16.msra.mxu3 %v2491_v25 }
   0xc   :  { %v2474_v31 = vld [vmem:[%s4622_s1 + $0x3a0] sm:$0xf]  ;;  %v3056_v32 = vld [vmem:[%s4622_s1 + $0x3ac] sm:$0xf0]  ;;  %v2347_v34 = vor.u32 %v3024_v30, %v2346_v28  ;;  %1261 = vmatpush.bf16.msra.mxu0 %v2091_v29 }
   0xd   :  { %v2074_v35 = vld [vmem:[%s4622_s1 + $0x80] sm:$0xf]  ;;  %v2956_v36 = vld [vmem:[%s4622_s1 + $0x8c] sm:$0xf0]  ;;  %v2475_v38 = vor.u32 %v3056_v32, %v2474_v31  ;;  %1274 = vmatpush.bf16.msra.mxu1 %v2219_v33 }
   0xe   :  { %v2202_v37 = vld [vmem:[%s4622_s1 + $0x180] sm:$0xf]  ;;  %v2988_v39 = vld [vmem:[%s4622_s1 + $0x18c] sm:$0xf0]  ;;  %v2075_v44 = vor.u32 %v2956_v36, %v2074_v35  ;;  %1287 = vmatpush.bf16.msra.mxu2 %v2347_v34 }
   0xf   :  { %v2330_v40 = vld [vmem:[%s4622_s1 + $0x280] sm:$0xf]  ;;  %v3020_v41 = vld [vmem:[%s4622_s1 + $0x28c] sm:$0xf0]  ;;  %v2203_v45 = vor.u32 %v2988_v39, %v2202_v37  ;;  %1300 = vmatpush.bf16.msra.mxu3 %v2475_v38  ;;  %v2966_v38 = vld [vmem:[%s4622_s1 + $0xe4] sm:$0xf] }
  0x10   :  { %v2458_v42 = vld [vmem:[%s4622_s1 + $0x380] sm:$0xf]  ;;  %v3052_v43 = vld [vmem:[%s4622_s1 + $0x38c] sm:$0xf0]  ;;  %v2331_v46 = vor.u32 %v3020_v41, %v2330_v40  ;;  %1262 = vmatpush.bf16.msra.mxu0 %v2075_v44  ;;  %v2124_v39 = vld [vmem:[%s4622_s1 + $0xf0] sm:$0xf0] }
  0x11   :  { %v2058_v47 = vld [vmem:[%s4622_s1 + $0x60] sm:$0xf]  ;;  %v2952_v48 = vld [vmem:[%s4622_s1 + $0x6c] sm:$0xf0]  ;;  %v2459_v50 = vor.u32 %v3052_v43, %v2458_v42  ;;  %1275 = vmatpush.bf16.msra.mxu1 %v2203_v45 }
  0x12   :  { %v2186_v49 = vld [vmem:[%s4622_s1 + $0x160] sm:$0xf]  ;;  %v2984_v51 = vld [vmem:[%s4622_s1 + $0x16c] sm:$0xf0]  ;;  %v2059_v56 = vor.u32 %v2952_v48, %v2058_v47  ;;  %1288 = vmatpush.bf16.msra.mxu2 %v2331_v46 }
  0x13   :  { %v2314_v52 = vld [vmem:[%s4622_s1 + $0x260] sm:$0xf]  ;;  %v3016_v53 = vld [vmem:[%s4622_s1 + $0x26c] sm:$0xf0]  ;;  %v2187_v57 = vor.u32 %v2984_v51, %v2186_v49  ;;  %1301 = vmatpush.bf16.msra.mxu3 %v2459_v50  ;;  %v2127_v49 = vor.u32 %v2966_v38, %v2124_v39  ;;  %v2962_v51 = vld [vmem:[%s4622_s1 + $0xc4] sm:$0xf] }
  0x14   :  { %v2442_v54 = vld [vmem:[%s4622_s1 + $0x360] sm:$0xf]  ;;  %v3048_v55 = vld [vmem:[%s4622_s1 + $0x36c] sm:$0xf0]  ;;  %v2315_v58 = vor.u32 %v3016_v53, %v2314_v52  ;;  %1263 = vmatpush.bf16.msra.mxu0 %v2059_v56  ;;  %v2108_v52 = vld [vmem:[%s4622_s1 + $0xd0] sm:$0xf0] }
  0x15   :  { %v2042_v59 = vld [vmem:[%s4622_s1 + $0x40] sm:$0xf]  ;;  %v2948_v60 = vld [vmem:[%s4622_s1 + $0x4c] sm:$0xf0]  ;;  %v2443_v62 = vor.u32 %v3048_v55, %v2442_v54  ;;  %1276 = vmatpush.bf16.msra.mxu1 %v2187_v57  ;;  %v2998_v54 = vld [vmem:[%s4622_s1 + $0x1e4] sm:$0xf] }
  0x16   :  { %v2170_v61 = vld [vmem:[%s4622_s1 + $0x140] sm:$0xf]  ;;  %v2980_v63 = vld [vmem:[%s4622_s1 + $0x14c] sm:$0xf0]  ;;  %v2043_v4 = vor.u32 %v2948_v60, %v2042_v59  ;;  %1289 = vmatpush.bf16.msra.mxu2 %v2315_v58  ;;  %v2252_v55 = vld [vmem:[%s4622_s1 + $0x1f0] sm:$0xf0] }
  0x17   :  { %v2298_v0 = vld [vmem:[%s4622_s1 + $0x240] sm:$0xf]  ;;  %v3012_v1 = vld [vmem:[%s4622_s1 + $0x24c] sm:$0xf0]  ;;  %v2171_v5 = vor.u32 %v2980_v63, %v2170_v61  ;;  %1302 = vmatpush.bf16.msra.mxu3 %v2443_v62 }
  0x18   :  { %v2426_v2 = vld [vmem:[%s4622_s1 + $0x340] sm:$0xf]  ;;  %v3044_v3 = vld [vmem:[%s4622_s1 + $0x34c] sm:$0xf0]  ;;  %v2299_v6 = vor.u32 %v3012_v1, %v2298_v0  ;;  %1264 = vmatpush.bf16.msra.mxu0 %v2043_v4  ;;  %v2111_v0 = vor.u32 %v2962_v51, %v2108_v52  ;;  %v2255_v1 = vor.u32 %v2998_v54, %v2252_v55  ;;  %v2958_v4 = vld [vmem:[%s4622_s1 + $0xa4] sm:$0xf] }
  0x19   :  { %v2026_v7 = vld [vmem:[%s4622_s1 + $0x20] sm:$0xf]  ;;  %v2944_v8 = vld [vmem:[%s4622_s1 + $0x2c] sm:$0xf0]  ;;  %v2427_v10 = vor.u32 %v3044_v3, %v2426_v2  ;;  %1277 = vmatpush.bf16.msra.mxu1 %v2171_v5  ;;  %v2092_v5 = vld [vmem:[%s4622_s1 + $0xb0] sm:$0xf0] }
  0x1a   :  { %v2154_v9 = vld [vmem:[%s4622_s1 + $0x120] sm:$0xf]  ;;  %v2976_v11 = vld [vmem:[%s4622_s1 + $0x12c] sm:$0xf0]  ;;  %v2027_v17 = vor.u32 %v2944_v8, %v2026_v7  ;;  %1290 = vmatpush.bf16.msra.mxu2 %v2299_v6  ;;  %v2994_v6 = vld [vmem:[%s4622_s1 + $0x1c4] sm:$0xf] }
  0x1b   :  { %v2282_v12 = vld [vmem:[%s4622_s1 + $0x220] sm:$0xf]  ;;  %v3008_v13 = vld [vmem:[%s4622_s1 + $0x22c] sm:$0xf0]  ;;  %v2155_v21 = vor.u32 %v2976_v11, %v2154_v9  ;;  %1303 = vmatpush.bf16.msra.mxu3 %v2427_v10  ;;  %v2236_v7 = vld [vmem:[%s4622_s1 + $0x1d0] sm:$0xf0] }
  0x1c   :  { %v2410_v14 = vld [vmem:[%s4622_s1 + $0x320] sm:$0xf]  ;;  %v3040_v15 = vld [vmem:[%s4622_s1 + $0x32c] sm:$0xf0]  ;;  %v2283_v22 = vor.u32 %v3008_v13, %v2282_v12  ;;  %1265 = vmatpush.bf16.msra.mxu0 %v2027_v17  ;;  %v2095_v12 = vor.u32 %v2958_v4, %v2092_v5  ;;  %v2239_v13 = vor.u32 %v2994_v6, %v2236_v7  ;;  %v2076_v17 = vld [vmem:[%s4622_s1 + $0x90] sm:$0xf0] }
  0x1d   :  { %v2010_v16 = vld [vmem:[%s4622_s1] sm:$0xf]  ;;  %v2940_v18 = vld [vmem:[%s4622_s1 + $0xc] sm:$0xf0]  ;;  %v2411_v26 = vor.u32 %v3040_v15, %v2410_v14  ;;  %1278 = vmatpush.bf16.msra.mxu1 %v2155_v21  ;;  %v2942_v54 = vld [vmem:[%s4622_s1 + $0x24] sm:$0xf] }
  0x1e   :  { %v2138_v19 = vld [vmem:[%s4622_s1 + $0x100] sm:$0xf]  ;;  %v2972_v20 = vld [vmem:[%s4622_s1 + $0x10c] sm:$0xf0]  ;;  %v2011_v32 = vor.u32 %v2940_v18, %v2010_v16  ;;  %1291 = vmatpush.bf16.msra.mxu2 %v2283_v22  ;;  %v2954_v16 = vld [vmem:[%s4622_s1 + $0x84] sm:$0xf] }
  0x1f   :  { %v2266_v23 = vld [vmem:[%s4622_s1 + $0x200] sm:$0xf]  ;;  %v3004_v24 = vld [vmem:[%s4622_s1 + $0x20c] sm:$0xf0]  ;;  %v2139_v36 = vor.u32 %v2972_v20, %v2138_v19  ;;  %1304 = vmatpush.bf16.msra.mxu3 %v2411_v26  ;;  %v2990_v18 = vld [vmem:[%s4622_s1 + $0x1a4] sm:$0xf] }
  0x20   :  { %v30_v25 = vld [vmem:[%s4623_s0] sm:$0x7f]  ;;  %v3036_v28 = vld [vmem:[%s4622_s1 + $0x30c] sm:$0xf0]  ;;  %v2267_v37 = vor.u32 %v3004_v24, %v2266_v23  ;;  %1266 = vmatpush.bf16.msra.mxu0 %v2011_v32  ;;  %v2220_v19 = vld [vmem:[%s4622_s1 + $0x1b0] sm:$0xf0]  ;;  %v2079_v24 = vor.u32 %v2954_v16, %v2076_v17 }
  0x21   :  { %v2394_v27 = vld [vmem:[%s4622_s1 + $0x300] sm:$0xf]  ;;  %242 = vst [vmem:[#allocation1] ss:$9 sm:$0xff] %v30_v25  ;;  %v3096_v30 = vld [vmem:[%s4622_s1 + $0x4ec] sm:$0xf0]  ;;  %1279 = vmatpush.bf16.msra.mxu1 %v2139_v36  ;;  %v2223_v25 = vor.u32 %v2990_v18, %v2220_v19 }
  0x22   :  { %v2634_v29 = vld [vmem:[%s4622_s1 + $0x4e0] sm:$0xf]  ;;  %v3128_v33 = vld [vmem:[%s4622_s1 + $0x5ec] sm:$0xf0]  ;;  %v2395_v40 = vor.u32 %v3036_v28, %v2394_v27  ;;  %1292 = vmatpush.bf16.msra.mxu2 %v2267_v37  ;;  %v2950_v28 = vld [vmem:[%s4622_s1 + $0x64] sm:$0xf] }
  0x23   :  { %v2762_v31 = vld [vmem:[%s4622_s1 + $0x5e0] sm:$0xf]  ;;  %v3136_v35 = vld [vmem:[%s4622_s1 + $0x62c] sm:$0xf0]  ;;  %v2635_v41 = vor.u32 %v3096_v30, %v2634_v29  ;;  %v2060_v29 = vld [vmem:[%s4622_s1 + $0x70] sm:$0xf0] }
  0x24   :  { %v2794_v34 = vld [vmem:[%s4622_s1 + $0x620] sm:$0xf]  ;;  %v3092_v43 = vld [vmem:[%s4622_s1 + $0x4cc] sm:$0xf0]  ;;  %v2763_v44 = vor.u32 %v3128_v33, %v2762_v31  ;;  %1305 = vmatpush.bf16.msra.mxu3 %v2395_v40  ;;  %v2986_v30 = vld [vmem:[%s4622_s1 + $0x184] sm:$0xf]  ;;  %v2063_v36 = vor.u32 %v2950_v28, %v2060_v29 }
  0x25   :  { %v2618_v42 = vld [vmem:[%s4622_s1 + $0x4c0] sm:$0xf]  ;;  %v2795_v45 = vor.u32 %v3136_v35, %v2794_v34  ;;  %v3124_v47 = vld [vmem:[%s4622_s1 + $0x5cc] sm:$0xf0]  ;;  %1311 = vmatpush.bf16.msrb.mxu0 %v2635_v41  ;;  %v2204_v31 = vld [vmem:[%s4622_s1 + $0x190] sm:$0xf0] }
  0x26   :  { %v2746_v46 = vld [vmem:[%s4622_s1 + $0x5c0] sm:$0xf]  ;;  %v3132_v50 = vld [vmem:[%s4622_s1 + $0x60c] sm:$0xf0]  ;;  %v2619_v56 = vor.u32 %v3092_v43, %v2618_v42  ;;  %1324 = vmatpush.bf16.msrb.mxu1 %v2763_v44  ;;  %v2207_v37 = vor.u32 %v2986_v30, %v2204_v31  ;;  %v2946_v40 = vld [vmem:[%s4622_s1 + $0x44] sm:$0xf] }
  0x27   :  { %v2778_v48 = vld [vmem:[%s4622_s1 + $0x600] sm:$0xf]  ;;  %1343 = vmatpush.bf16.msrb.mxu2 %v2795_v45  ;;  %v2747_v59 = vor.u32 %v3124_v47, %v2746_v46  ;;  %v3088_v62 = vld [vmem:[%s4622_s1 + $0x4ac] sm:$0xf0]  ;;  %v2044_v41 = vld [vmem:[%s4622_s1 + $0x50] sm:$0xf0] }
  0x28   :  { %v3471_v53 = vld [vmem:[#allocation1 + $0x12] sm:$0xff]  ;;  %v3479_v57 = vld [vmem:[#allocation1] sm:$0xff]  ;;  %v2779_v60 = vor.u32 %v3132_v50, %v2778_v48  ;;  %v3489_v63 = vld [vmem:[#allocation1 + $0x9] sm:$0xff]  ;;  %1350 = vmatpush.bf16.msrb.mxu3 %v2127_v49  ;;  %v2047_v49 = vor.u32 %v2946_v40, %v2044_v41 }
  0x29   :  { %v3481_v58 = vld [vmem:[#allocation1 + $0x1b] sm:$0xff]  ;;  %1293 = vmatmul.bf16.vlgmr.msra.gmra.mxu2 %v3471_v53  ;;  %v3120_v3 = vld [vmem:[%s4622_s1 + $0x5ac] sm:$0xf0]  ;;  %1267 = vmatmul.bf16.vlgmr.msra.gmra.mxu0 %v3479_v57  ;;  %v2982_v42 = vld [vmem:[%s4622_s1 + $0x164] sm:$0xf] }
  0x2a   :  { %v2602_v61 = vld [vmem:[%s4622_s1 + $0x4a0] sm:$0xf]  ;;  %1306 = vmatmul.bf16.vlgmr.msra.gmra.mxu3 %v3481_v58  ;;  %1312 = vmatpush.bf16.msrb.mxu0 %v2619_v56  ;;  %v3084_v11 = vld [vmem:[%s4622_s1 + $0x48c] sm:$0xf0]  ;;  %v2188_v43 = vld [vmem:[%s4622_s1 + $0x170] sm:$0xf0] }
  0x2b   :  { %v2730_v2 = vld [vmem:[%s4622_s1 + $0x5a0] sm:$0xf]  ;;  %v2603_v8 = vor.u32 %v3088_v62, %v2602_v61  ;;  %1280 = vmatmul.bf16.vlgmr.msra.gmra.mxu1 %v3489_v63  ;;  %1344 = vmatpush.bf16.msrb.mxu2 %v2779_v60  ;;  %v3116_v15 = vld [vmem:[%s4622_s1 + $0x58c] sm:$0xf0]  ;;  %v3585_v45 = vld [vmem:[#allocation1 + $0x36] sm:$0xff]  ;;  %v2191_v50 = vor.u32 %v2982_v42, %v2188_v43 }
  0x2c   :  { %1325 = vmatpush.bf16.msrb.mxu1 %v2747_v59  ;;  %v2731_v9 = vor.u32 %v3120_v3, %v2730_v2  ;;  %v2586_v10 = vld [vmem:[%s4622_s1 + $0x480] sm:$0xf]  ;;  %1351 = vmatpush.bf16.msrb.mxu3 %v2111_v0  ;;  %v3080_v23 = vld [vmem:[%s4622_s1 + $0x46c] sm:$0xf0]  ;;  %v2028_v55 = vld [vmem:[%s4622_s1 + $0x30] sm:$0xf0] }
  0x2d   :  { %v2714_v14 = vld [vmem:[%s4622_s1 + $0x580] sm:$0xf]  ;;  %v2587_v20 = vor.u32 %v3084_v11, %v2586_v10  ;;  %v3112_v27 = vld [vmem:[%s4622_s1 + $0x56c] sm:$0xf0]  ;;  %v2978_v56 = vld [vmem:[%s4622_s1 + $0x144] sm:$0xf]  ;;  %v2031_v4 = vor.u32 %v2942_v54, %v2028_v55 }
  0x2e   :  { %1313 = vmatpush.bf16.msrb.mxu0 %v2603_v8  ;;  %v2715_v21 = vor.u32 %v3116_v15, %v2714_v14  ;;  %v2570_v22 = vld [vmem:[%s4622_s1 + $0x460] sm:$0xf]  ;;  %v3076_v35 = vld [vmem:[%s4622_s1 + $0x44c] sm:$0xf0]  ;;  %v2172_v59 = vld [vmem:[%s4622_s1 + $0x150] sm:$0xf0] }
  0x2f   :  { %1363 = vmatpush.bf16.msra.mxu2 %v2255_v1  ;;  %v2698_v26 = vld [vmem:[%s4622_s1 + $0x560] sm:$0xf]  ;;  %v2571_v32 = vor.u32 %v3080_v23, %v2570_v22  ;;  %v3108_v39 = vld [vmem:[%s4622_s1 + $0x54c] sm:$0xf0]  ;;  %v2938_v3 = vld [vmem:[%s4622_s1 + $0x4] sm:$0xf]  ;;  %v2175_v5 = vor.u32 %v2978_v56, %v2172_v59 }
  0x30   :  { %1326 = vmatpush.bf16.msrb.mxu1 %v2731_v9  ;;  %1352 = vmatpush.bf16.msrb.mxu3 %v2095_v12  ;;  %v2699_v33 = vor.u32 %v3112_v27, %v2698_v26  ;;  %v2554_v34 = vld [vmem:[%s4622_s1 + $0x440] sm:$0xf]  ;;  %v3072_v48 = vld [vmem:[%s4622_s1 + $0x42c] sm:$0xf0]  ;;  %v2012_v6 = vld [vmem:[%s4622_s1 + $0x10] sm:$0xf0] }
  0x31   :  { %v2682_v38 = vld [vmem:[%s4622_s1 + $0x540] sm:$0xf]  ;;  %v2555_v44 = vor.u32 %v3076_v35, %v2554_v34  ;;  %v3104_v52 = vld [vmem:[%s4622_s1 + $0x52c] sm:$0xf0]  ;;  %v3030_v7 = vld [vmem:[%s4622_s1 + $0x2e4] sm:$0xf]  ;;  %v2015_v18 = vor.u32 %v2938_v3, %v2012_v6 }
  0x32   :  { %1314 = vmatpush.bf16.msrb.mxu0 %v2587_v20  ;;  %v2683_v46 = vor.u32 %v3108_v39, %v2682_v38  ;;  %v2538_v47 = vld [vmem:[%s4622_s1 + $0x420] sm:$0xf]  ;;  %v3068_v62 = vld [vmem:[%s4622_s1 + $0x40c] sm:$0xf0]  ;;  %v2380_v8 = vld [vmem:[%s4622_s1 + $0x2f0] sm:$0xf0] }
  0x33   :  { %1364 = vmatpush.bf16.msra.mxu2 %v2239_v13  ;;  %v2666_v51 = vld [vmem:[%s4622_s1 + $0x520] sm:$0xf]  ;;  %v2539_v60 = vor.u32 %v3072_v48, %v2538_v47  ;;  %v3100_v2 = vld [vmem:[%s4622_s1 + $0x50c] sm:$0xf0]  ;;  %v2974_v9 = vld [vmem:[%s4622_s1 + $0x124] sm:$0xf]  ;;  %v2383_v17 = vor.u32 %v3030_v7, %v2380_v8 }
  0x34   :  { %1327 = vmatpush.bf16.msrb.mxu1 %v2715_v21  ;;  %1353 = vmatpush.bf16.msrb.mxu3 %v2079_v24  ;;  %v2522_v61 = vld [vmem:[%s4622_s1 + $0x400] sm:$0xf]  ;;  %v2667_v0 = vor.u32 %v3104_v52, %v2666_v51  ;;  %v2156_v10 = vld [vmem:[%s4622_s1 + $0x130] sm:$0xf0]  ;;  %v3062_v11 = vld [vmem:[%s4622_s1 + $0x3e4] sm:$0xf] }
  0x35   :  { %v2650_v1 = vld [vmem:[%s4622_s1 + $0x500] sm:$0xf]  ;;  %v2523_v12 = vor.u32 %v3068_v62, %v2522_v61  ;;  %v2508_v13 = vld [vmem:[%s4622_s1 + $0x3f0] sm:$0xf0]  ;;  %v3094_v14 = vld [vmem:[%s4622_s1 + $0x4e4] sm:$0xf]  ;;  %v2159_v19 = vor.u32 %v2974_v9, %v2156_v10 }
  0x36   :  { %1315 = vmatpush.bf16.msrb.mxu0 %v2571_v32  ;;  %v2636_v15 = vld [vmem:[%s4622_s1 + $0x4f0] sm:$0xf0]  ;;  %v2651_v16 = vor.u32 %v3100_v2, %v2650_v1  ;;  %v3026_v20 = vld [vmem:[%s4622_s1 + $0x2c4] sm:$0xf]  ;;  %v2511_v22 = vor.u32 %v3062_v11, %v2508_v13 }
  0x37   :  { %1365 = vmatpush.bf16.msra.mxu2 %v2223_v25  ;;  %v2364_v21 = vld [vmem:[%s4622_s1 + $0x2d0] sm:$0xf0]  ;;  %v2639_v23 = vor.u32 %v3094_v14, %v2636_v15  ;;  %v3661_v24 = vld [vmem:[#allocation1 + $0x24] sm:$0xff] }
  0x38   :  { %1328 = vmatpush.bf16.msrb.mxu1 %v2699_v33  ;;  %1354 = vmatpush.bf16.msrb.mxu3 %v2063_v36  ;;  %v2970_v25 = vld [vmem:[%s4622_s1 + $0x104] sm:$0xf]  ;;  %v2140_v26 = vld [vmem:[%s4622_s1 + $0x110] sm:$0xf0]  ;;  %v2367_v32 = vor.u32 %v3026_v20, %v2364_v21 }
  0x39   :  { %2808 = vmatmul.msk.bf16.vlgmr.msrb.gmra.mxu2 %vm1256_vm0, %v3585_v45  ;;  %v3058_v27 = vld [vmem:[%s4622_s1 + $0x3c4] sm:$0xf]  ;;  %v2492_v28 = vld [vmem:[%s4622_s1 + $0x3d0] sm:$0xf0]  ;;  %v2143_v35 = vor.u32 %v2970_v25, %v2140_v26 }
  0x3a   :  { %1316 = vmatpush.bf16.msrb.mxu0 %v2555_v44  ;;  %v3090_v29 = vld [vmem:[%s4622_s1 + $0x4c4] sm:$0xf]  ;;  %v2620_v30 = vld [vmem:[%s4622_s1 + $0x4d0] sm:$0xf0]  ;;  %v2495_v38 = vor.u32 %v3058_v27, %v2492_v28 }
  0x3b   :  { %1366 = vmatpush.bf16.msra.mxu2 %v2207_v37  ;;  %v3681_v31 = vld [vmem:[#allocation1 + $0x2d] sm:$0xff]  ;;  %v3126_v33 = vld [vmem:[%s4622_s1 + $0x5e4] sm:$0xf]  ;;  %v2623_v39 = vor.u32 %v3090_v29, %v2620_v30 }
  0x3c   :  { %1329 = vmatpush.bf16.msrb.mxu1 %v2683_v46  ;;  %1355 = vmatpush.bf16.msrb.mxu3 %v2047_v49  ;;  %v2764_v34 = vld [vmem:[%s4622_s1 + $0x5f0] sm:$0xf0]  ;;  %v3022_v36 = vld [vmem:[%s4622_s1 + $0x2a4] sm:$0xf] }
  0x3d   :  { %v2348_v37 = vld [vmem:[%s4622_s1 + $0x2b0] sm:$0xf0]  ;;  %v3054_v40 = vld [vmem:[%s4622_s1 + $0x3a4] sm:$0xf]  ;;  %v2767_v41 = vor.u32 %v3126_v33, %v2764_v34 }
  0x3e   :  { %1317 = vmatpush.bf16.msrb.mxu0 %v2539_v60  ;;  %v2476_v42 = vld [vmem:[%s4622_s1 + $0x3b0] sm:$0xf0]  ;;  %v3086_v43 = vld [vmem:[%s4622_s1 + $0x4a4] sm:$0xf]  ;;  %v2351_v46 = vor.u32 %v3022_v36, %v2348_v37 }
  0x3f   :  { %1367 = vmatpush.bf16.msra.mxu2 %v2191_v50  ;;  %v2604_v44 = vld [vmem:[%s4622_s1 + $0x4b0] sm:$0xf0]  ;;  %v3122_v47 = vld [vmem:[%s4622_s1 + $0x5c4] sm:$0xf]  ;;  %v2479_v51 = vor.u32 %v3054_v40, %v2476_v42 }
  0x40   :  { %1330 = vmatpush.bf16.msrb.mxu1 %v2667_v0  ;;  %1356 = vmatpush.bf16.msrb.mxu3 %v2031_v4  ;;  %v2748_v48 = vld [vmem:[%s4622_s1 + $0x5d0] sm:$0xf0]  ;;  %v3018_v49 = vld [vmem:[%s4622_s1 + $0x284] sm:$0xf]  ;;  %v2607_v52 = vor.u32 %v3086_v43, %v2604_v44 }
  0x41   :  { %v2332_v50 = vld [vmem:[%s4622_s1 + $0x290] sm:$0xf0]  ;;  %v3050_v54 = vld [vmem:[%s4622_s1 + $0x384] sm:$0xf]  ;;  %v2751_v55 = vor.u32 %v3122_v47, %v2748_v48  ;;  %v3033_v47 = vld [vmem:[%s4622_s1 + $0x2f4] sm:$0xf0] }
  0x42   :  { %1318 = vmatpush.bf16.msrb.mxu0 %v2523_v12  ;;  %v2460_v56 = vld [vmem:[%s4622_s1 + $0x390] sm:$0xf0]  ;;  %v3082_v59 = vld [vmem:[%s4622_s1 + $0x484] sm:$0xf]  ;;  %v2335_v61 = vor.u32 %v3018_v49, %v2332_v50 }
  0x43   :  { %1368 = vmatpush.bf16.msra.mxu2 %v2175_v5  ;;  %v2588_v60 = vld [vmem:[%s4622_s1 + $0x490] sm:$0xf0]  ;;  %v3118_v62 = vld [vmem:[%s4622_s1 + $0x5a4] sm:$0xf]  ;;  %v2463_v3 = vor.u32 %v3050_v54, %v2460_v56 }
  0x44   :  { %1331 = vmatpush.bf16.msrb.mxu1 %v2651_v16  ;;  %1357 = vmatpush.bf16.msrb.mxu3 %v2015_v18  ;;  %v2732_v0 = vld [vmem:[%s4622_s1 + $0x5b0] sm:$0xf0]  ;;  %v3014_v1 = vld [vmem:[%s4622_s1 + $0x264] sm:$0xf]  ;;  %v2591_v4 = vor.u32 %v3082_v59, %v2588_v60  ;;  %v2130_v59 = vld [vmem:[%s4622_s1 + $0xe8] sm:$0xf] }
  0x45   :  { %1319 = vmatmul.bf16.vlgmr.msrb.gmra.mxu0 %v3661_v24  ;;  %v2316_v2 = vld [vmem:[%s4622_s1 + $0x270] sm:$0xf0]  ;;  %v3046_v5 = vld [vmem:[%s4622_s1 + $0x364] sm:$0xf]  ;;  %v2735_v6 = vor.u32 %v3118_v62, %v2732_v0  ;;  %v2969_v60 = vld [vmem:[%s4622_s1 + $0xf4] sm:$0xf0] }
  0x46   :  { %1376 = vmatpush.bf16.msra.mxu0 %v2383_v17  ;;  %v2444_v7 = vld [vmem:[%s4622_s1 + $0x370] sm:$0xf0]  ;;  %v3078_v8 = vld [vmem:[%s4622_s1 + $0x464] sm:$0xf]  ;;  %v2319_v10 = vor.u32 %v3014_v1, %v2316_v2 }
  0x47   :  { %1369 = vmatpush.bf16.msra.mxu2 %v2159_v19  ;;  %1332 = vmatmul.bf16.vlgmr.msrb.gmra.mxu1 %v3681_v31  ;;  %v2572_v9 = vld [vmem:[%s4622_s1 + $0x470] sm:$0xf0]  ;;  %v3114_v11 = vld [vmem:[%s4622_s1 + $0x584] sm:$0xf]  ;;  %v2447_v15 = vor.u32 %v3046_v5, %v2444_v7  ;;  %v2370_v5 = vld [vmem:[%s4622_s1 + $0x2c8] sm:$0xf]  ;;  %v2131_v7 = vor.u32 %v2969_v60, %v2130_v59 }
  0x48   :  { %1389 = vmatpush.bf16.msra.mxu1 %v2511_v22  ;;  %1402 = vmatpush.bf16.msra.mxu3 %v2639_v23  ;;  %v2716_v12 = vld [vmem:[%s4622_s1 + $0x590] sm:$0xf0]  ;;  %v3010_v13 = vld [vmem:[%s4622_s1 + $0x244] sm:$0xf]  ;;  %v2575_v16 = vor.u32 %v3078_v8, %v2572_v9  ;;  %v3053_v59 = vld [vmem:[%s4622_s1 + $0x394] sm:$0xf0] }
  0x49   :  { %1358 = vmatmul.bf16.vlgmr.msrb.gmra.mxu3 %v3479_v57  ;;  %v2300_v14 = vld [vmem:[%s4622_s1 + $0x250] sm:$0xf0]  ;;  %v3042_v17 = vld [vmem:[%s4622_s1 + $0x344] sm:$0xf]  ;;  %v2719_v18 = vor.u32 %v3114_v11, %v2716_v12  ;;  %v2965_v11 = vld [vmem:[%s4622_s1 + $0xd4] sm:$0xf0] }
  0x4a   :  { %1377 = vmatpush.bf16.msra.mxu0 %v2367_v32  ;;  %v2428_v19 = vld [vmem:[%s4622_s1 + $0x350] sm:$0xf0]  ;;  %v3074_v20 = vld [vmem:[%s4622_s1 + $0x444] sm:$0xf]  ;;  %v2303_v22 = vor.u32 %v3010_v13, %v2300_v14  ;;  %v2258_v12 = vld [vmem:[%s4622_s1 + $0x1e8] sm:$0xf] }
  0x4b   :  { %1370 = vmatpush.bf16.msra.mxu2 %v2143_v35  ;;  %v2556_v21 = vld [vmem:[%s4622_s1 + $0x450] sm:$0xf0]  ;;  %v3110_v23 = vld [vmem:[%s4622_s1 + $0x564] sm:$0xf]  ;;  %v2431_v28 = vor.u32 %v3042_v17, %v2428_v19  ;;  %v3001_v13 = vld [vmem:[%s4622_s1 + $0x1f4] sm:$0xf0] }
  0x4c   :  { %1390 = vmatpush.bf16.msra.mxu1 %v2495_v38  ;;  %1403 = vmatpush.bf16.msra.mxu3 %v2623_v39  ;;  %v2700_v25 = vld [vmem:[%s4622_s1 + $0x570] sm:$0xf0]  ;;  %v3006_v26 = vld [vmem:[%s4622_s1 + $0x224] sm:$0xf]  ;;  %v2559_v29 = vor.u32 %v3074_v20, %v2556_v21  ;;  %v2514_v14 = vld [vmem:[%s4622_s1 + $0x3e8] sm:$0xf] }
  0x4d   :  { %v2284_v27 = vld [vmem:[%s4622_s1 + $0x230] sm:$0xf0]  ;;  %v3038_v30 = vld [vmem:[%s4622_s1 + $0x324] sm:$0xf]  ;;  %v2703_v32 = vor.u32 %v3110_v23, %v2700_v25  ;;  %v2354_v19 = vld [vmem:[%s4622_s1 + $0x2a8] sm:$0xf] }
  0x4e   :  { %1378 = vmatpush.bf16.msra.mxu0 %v2351_v46  ;;  %1371 = vmatmul.bf16.vlgmr.msra.gmra.mxu2 %v3489_v63  ;;  %v2412_v33 = vld [vmem:[%s4622_s1 + $0x330] sm:$0xf0]  ;;  %v3070_v34 = vld [vmem:[%s4622_s1 + $0x424] sm:$0xf]  ;;  %v2287_v36 = vor.u32 %v3006_v26, %v2284_v27  ;;  %v2386_v46 = vld [vmem:[%s4622_s1 + $0x2e8] sm:$0xf] }
  0x4f   :  { %1415 = vmatpush.bf16.msrb.mxu2 %v2767_v41  ;;  %v2540_v35 = vld [vmem:[%s4622_s1 + $0x430] sm:$0xf0]  ;;  %v3106_v37 = vld [vmem:[%s4622_s1 + $0x544] sm:$0xf]  ;;  %v2415_v42 = vor.u32 %v3038_v30, %v2412_v33  ;;  %v3025_v20 = vld [vmem:[%s4622_s1 + $0x2b4] sm:$0xf0] }
  0x50   :  { %1391 = vmatpush.bf16.msra.mxu1 %v2479_v51  ;;  %1404 = vmatpush.bf16.msra.mxu3 %v2607_v52  ;;  %v2684_v38 = vld [vmem:[%s4622_s1 + $0x550] sm:$0xf0]  ;;  %v3002_v39 = vld [vmem:[%s4622_s1 + $0x204] sm:$0xf]  ;;  %v2543_v43 = vor.u32 %v3070_v34, %v2540_v35  ;;  %v2098_v23 = vld [vmem:[%s4622_s1 + $0xa8] sm:$0xf] }
  0x51   :  { %v2268_v40 = vld [vmem:[%s4622_s1 + $0x210] sm:$0xf0]  ;;  %v3034_v41 = vld [vmem:[%s4622_s1 + $0x304] sm:$0xf]  ;;  %v2687_v48 = vor.u32 %v3106_v37, %v2684_v38  ;;  %v2961_v26 = vld [vmem:[%s4622_s1 + $0xb4] sm:$0xf0] }
  0x52   :  { %1379 = vmatpush.bf16.msra.mxu0 %v2335_v61  ;;  %v2396_v44 = vld [vmem:[%s4622_s1 + $0x310] sm:$0xf0]  ;;  %v3066_v49 = vld [vmem:[%s4622_s1 + $0x404] sm:$0xf]  ;;  %v2271_v52 = vor.u32 %v3002_v39, %v2268_v40  ;;  %v2387_v61 = vor.u32 %v3033_v47, %v2386_v46  ;;  %v2242_v27 = vld [vmem:[%s4622_s1 + $0x1c8] sm:$0xf]  ;;  %v2099_v35 = vor.u32 %v2961_v26, %v2098_v23 }
  0x53   :  { %1416 = vmatpush.bf16.msrb.mxu2 %v2751_v55  ;;  %v2524_v50 = vld [vmem:[%s4622_s1 + $0x410] sm:$0xf0]  ;;  %v3102_v51 = vld [vmem:[%s4622_s1 + $0x524] sm:$0xf]  ;;  %v2399_v62 = vor.u32 %v3034_v41, %v2396_v44  ;;  %v3061_v30 = vld [vmem:[%s4622_s1 + $0x3d4] sm:$0xf0] }
  0x54   :  { %1392 = vmatpush.bf16.msra.mxu1 %v2463_v3  ;;  %1405 = vmatpush.bf16.msra.mxu3 %v2591_v4  ;;  %v2668_v54 = vld [vmem:[%s4622_s1 + $0x530] sm:$0xf0]  ;;  %v3134_v55 = vld [vmem:[%s4622_s1 + $0x624] sm:$0xf]  ;;  %v2527_v0 = vor.u32 %v3066_v49, %v2524_v50  ;;  %v2338_v33 = vld [vmem:[%s4622_s1 + $0x288] sm:$0xf] }
  0x55   :  { %v2796_v56 = vld [vmem:[%s4622_s1 + $0x630] sm:$0xf0]  ;;  %v3098_v1 = vld [vmem:[%s4622_s1 + $0x504] sm:$0xf]  ;;  %v2671_v2 = vor.u32 %v3102_v51, %v2668_v54  ;;  %v3021_v34 = vld [vmem:[%s4622_s1 + $0x294] sm:$0xf0] }
  0x56   :  { %1380 = vmatpush.bf16.msra.mxu0 %v2319_v10  ;;  %v2799_v3 = vor.u32 %v3134_v55, %v2796_v56  ;;  %v2652_v4 = vld [vmem:[%s4622_s1 + $0x510] sm:$0xf0]  ;;  %v3130_v8 = vld [vmem:[%s4622_s1 + $0x604] sm:$0xf]  ;;  %v2114_v10 = vld [vmem:[%s4622_s1 + $0xc8] sm:$0xf]  ;;  %v2339_v44 = vor.u32 %v3021_v34, %v2338_v33 }
  0x57   :  { %1417 = vmatpush.bf16.msrb.mxu2 %v2735_v6  ;;  %v3029_v6 = vld [vmem:[%s4622_s1 + $0x2d4] sm:$0xf0]  ;;  %v2780_v9 = vld [vmem:[%s4622_s1 + $0x610] sm:$0xf0]  ;;  %v2655_v17 = vor.u32 %v3098_v1, %v2652_v4  ;;  %v2115_v21 = vor.u32 %v2965_v11, %v2114_v10  ;;  %v2082_v37 = vld [vmem:[%s4622_s1 + $0x88] sm:$0xf] }
  0x58   :  { %1393 = vmatpush.bf16.msra.mxu1 %v2447_v15  ;;  %1406 = vmatpush.bf16.msra.mxu3 %v2575_v16  ;;  %v3065_v15 = vld [vmem:[%s4622_s1 + $0x3f4] sm:$0xf0]  ;;  %v2371_v16 = vor.u32 %v3029_v6, %v2370_v5  ;;  %v2226_v40 = vld [vmem:[%s4622_s1 + $0x1a8] sm:$0xf] }
  0x59   :  { %v2515_v25 = vor.u32 %v3065_v15, %v2514_v14  ;;  %v2957_v39 = vld [vmem:[%s4622_s1 + $0x94] sm:$0xf0]  ;;  %v2322_v46 = vld [vmem:[%s4622_s1 + $0x268] sm:$0xf] }
  0x5a   :  { %1381 = vmatpush.bf16.msra.mxu0 %v2303_v22  ;;  %v2259_v22 = vor.u32 %v3001_v13, %v2258_v12  ;;  %v2993_v41 = vld [vmem:[%s4622_s1 + $0x1b4] sm:$0xf0]  ;;  %v2066_v50 = vld [vmem:[%s4622_s1 + $0x68] sm:$0xf] }
  0x5b   :  { %1418 = vmatpush.bf16.msrb.mxu2 %v2719_v18  ;;  %v2783_v18 = vor.u32 %v3130_v8, %v2780_v9  ;;  %v3017_v47 = vld [vmem:[%s4622_s1 + $0x274] sm:$0xf0]  ;;  %v2227_v49 = vor.u32 %v2993_v41, %v2226_v40  ;;  %v2210_v54 = vld [vmem:[%s4622_s1 + $0x188] sm:$0xf] }
  0x5c   :  { %1394 = vmatpush.bf16.msra.mxu1 %v2431_v28  ;;  %1407 = vmatpush.bf16.msra.mxu3 %v2559_v29  ;;  %v2997_v28 = vld [vmem:[%s4622_s1 + $0x1d4] sm:$0xf0]  ;;  %v2498_v29 = vld [vmem:[%s4622_s1 + $0x3c8] sm:$0xf]  ;;  %v2323_v60 = vor.u32 %v3017_v47, %v2322_v46 }
  0x5d   :  { %v2499_v38 = vor.u32 %v3061_v30, %v2498_v29  ;;  %v2989_v55 = vld [vmem:[%s4622_s1 + $0x194] sm:$0xf0]  ;;  %v2466_v56 = vld [vmem:[%s4622_s1 + $0x388] sm:$0xf] }
  0x5e   :  { %1382 = vmatpush.bf16.msra.mxu0 %v2287_v36  ;;  %v2243_v36 = vor.u32 %v2997_v28, %v2242_v27  ;;  %v2211_v1 = vor.u32 %v2989_v55, %v2210_v54  ;;  %v2949_v4 = vld [vmem:[%s4622_s1 + $0x54] sm:$0xf0]  ;;  %v2194_v5 = vld [vmem:[%s4622_s1 + $0x168] sm:$0xf]  ;;  %v2260_v54 = vld [vmem:[%s4622_s1 + $0x1f8] sm:$0xf0] }
  0x5f   :  { %1419 = vmatpush.bf16.msrb.mxu2 %v2703_v32  ;;  %v2355_v32 = vor.u32 %v3025_v20, %v2354_v19  ;;  %v2985_v6 = vld [vmem:[%s4622_s1 + $0x174] sm:$0xf0]  ;;  %v2290_v10 = vld [vmem:[%s4622_s1 + $0x228] sm:$0xf] }
  0x60   :  { %1395 = vmatpush.bf16.msra.mxu1 %v2415_v42  ;;  %1408 = vmatpush.bf16.msra.mxu3 %v2543_v43  ;;  %v2482_v42 = vld [vmem:[%s4622_s1 + $0x3a8] sm:$0xf]  ;;  %v3057_v43 = vld [vmem:[%s4622_s1 + $0x3b4] sm:$0xf0]  ;;  %v2195_v13 = vor.u32 %v2985_v6, %v2194_v5  ;;  %v2995_v5 = vld [vmem:[%s4622_s1 + $0x1cc] sm:$0xf] }
  0x61   :  { %v2483_v51 = vor.u32 %v3057_v43, %v2482_v42  ;;  %v3049_v8 = vld [vmem:[%s4622_s1 + $0x374] sm:$0xf0]  ;;  %v2034_v14 = vld [vmem:[%s4622_s1 + $0x28] sm:$0xf]  ;;  %v2244_v6 = vld [vmem:[%s4622_s1 + $0x1d8] sm:$0xf0] }
  0x62   :  { %1383 = vmatpush.bf16.msra.mxu0 %v2271_v52  ;;  %v2953_v52 = vld [vmem:[%s4622_s1 + $0x74] sm:$0xf0]  ;;  %v2434_v19 = vld [vmem:[%s4622_s1 + $0x348] sm:$0xf] }
  0x63   :  { %1420 = vmatpush.bf16.msrb.mxu2 %v2687_v48  ;;  %v2083_v48 = vor.u32 %v2957_v39, %v2082_v37  ;;  %v3009_v11 = vld [vmem:[%s4622_s1 + $0x234] sm:$0xf0]  ;;  %v2274_v23 = vld [vmem:[%s4622_s1 + $0x208] sm:$0xf] }
  0x64   :  { %1396 = vmatpush.bf16.msra.mxu1 %v2399_v62  ;;  %1409 = vmatpush.bf16.msra.mxu3 %v2527_v0  ;;  %v3013_v62 = vld [vmem:[%s4622_s1 + $0x254] sm:$0xf0]  ;;  %v2067_v0 = vor.u32 %v2953_v52, %v2066_v50  ;;  %v2802_v29 = vld [vmem:[%s4622_s1 + $0x628] sm:$0xf]  ;;  %v2999_v52 = vld [vmem:[%s4622_s1 + $0x1ec] sm:$0xf] }
  0x65   :  { %1384 = vmatmul.bf16.vlgmr.msra.gmra.mxu0 %v3471_v53  ;;  %v3045_v20 = vld [vmem:[%s4622_s1 + $0x354] sm:$0xf0]  ;;  %v2162_v33 = vld [vmem:[%s4622_s1 + $0x128] sm:$0xf] }
  0x66   :  { %1467 = vmatpush.bf16.msrb.mxu0 %v2387_v61  ;;  %v2306_v61 = vld [vmem:[%s4622_s1 + $0x248] sm:$0xf]  ;;  %v2941_v28 = vld [vmem:[%s4622_s1 + $0x14] sm:$0xf0] }
  0x67   :  { %1421 = vmatpush.bf16.msrb.mxu2 %v2671_v2  ;;  %1410 = vmatmul.bf16.vlgmr.msra.gmra.mxu3 %v3661_v24  ;;  %v2050_v2 = vld [vmem:[%s4622_s1 + $0x48] sm:$0xf]  ;;  %v2307_v9 = vor.u32 %v3013_v62, %v2306_v61  ;;  %v3137_v30 = vld [vmem:[%s4622_s1 + $0x634] sm:$0xf0]  ;;  %v2967_v61 = vld [vmem:[%s4622_s1 + $0xec] sm:$0xf] }
  0x68   :  { %1434 = vmatpush.bf16.msrb.mxu3 %v2799_v3  ;;  %1441 = vmatpush.bf16.msrb.mxu1 %v2131_v7  ;;  %v2467_v3 = vor.u32 %v3053_v59, %v2466_v56  ;;  %v2450_v7 = vld [vmem:[%s4622_s1 + $0x368] sm:$0xf]  ;;  %v2051_v12 = vor.u32 %v2949_v4, %v2050_v2  ;;  %v2977_v34 = vld [vmem:[%s4622_s1 + $0x134] sm:$0xf0]  ;;  %v2803_v40 = vor.u32 %v3137_v30, %v2802_v29  ;;  %v2132_v62 = vld [vmem:[%s4622_s1 + $0xf8] sm:$0xf0] }
  0x69   :  { %1397 = vmatmul.bf16.vlgmr.msra.gmra.mxu1 %v3481_v58  ;;  %v2451_v15 = vor.u32 %v3049_v8, %v2450_v7  ;;  %v2642_v37 = vld [vmem:[%s4622_s1 + $0x4e8] sm:$0xf]  ;;  %v2973_v42 = vld [vmem:[%s4622_s1 + $0x114] sm:$0xf0]  ;;  %v2263_v2 = vor.u32 %v2999_v52, %v2260_v54  ;;  %v2135_v8 = vor.u32 %v2967_v61, %v2132_v62  ;;  %v2979_v52 = vld [vmem:[%s4622_s1 + $0x14c] sm:$0xf] }
  0x6a   :  { %1468 = vmatpush.bf16.msrb.mxu0 %v2371_v16  ;;  %v2945_v16 = vld [vmem:[%s4622_s1 + $0x34] sm:$0xf0]  ;;  %v2146_v41 = vld [vmem:[%s4622_s1 + $0x108] sm:$0xf]  ;;  %v2180_v54 = vld [vmem:[%s4622_s1 + $0x158] sm:$0xf0] }
  0x6b   :  { %1422 = vmatpush.bf16.msrb.mxu2 %v2655_v17  ;;  %v2178_v17 = vld [vmem:[%s4622_s1 + $0x148] sm:$0xf]  ;;  %v2035_v26 = vor.u32 %v2945_v16, %v2034_v14  ;;  %v3093_v56 = vld [vmem:[%s4622_s1 + $0x4d4] sm:$0xf0]  ;;  %v2247_v14 = vor.u32 %v2995_v5, %v2244_v6  ;;  %v2991_v16 = vld [vmem:[%s4622_s1 + $0x1ac] sm:$0xf] }
  0x6c   :  { %1435 = vmatpush.bf16.msrb.mxu3 %v2783_v18  ;;  %1442 = vmatpush.bf16.msrb.mxu1 %v2115_v21  ;;  %v2981_v18 = vld [vmem:[%s4622_s1 + $0x154] sm:$0xf0]  ;;  %v2291_v21 = vor.u32 %v3009_v11, %v2290_v10  ;;  %v2402_v46 = vld [vmem:[%s4622_s1 + $0x308] sm:$0xf]  ;;  %v2164_v5 = vld [vmem:[%s4622_s1 + $0x138] sm:$0xf0] }
  0x6d   :  { %v2179_v27 = vor.u32 %v2981_v18, %v2178_v17  ;;  %v2786_v47 = vld [vmem:[%s4622_s1 + $0x608] sm:$0xf]  ;;  %v3089_v10 = vld [vmem:[%s4622_s1 + $0x4b4] sm:$0xf0]  ;;  %v2228_v17 = vld [vmem:[%s4622_s1 + $0x1b8] sm:$0xf0] }
  0x6e   :  { %1423 = vmatmul.bf16.vlgmr.msrb.gmra.mxu2 %v3681_v31  ;;  %1469 = vmatpush.bf16.msrb.mxu0 %v2355_v32  ;;  %v2435_v32 = vor.u32 %v3045_v20, %v2434_v19  ;;  %v2626_v55 = vld [vmem:[%s4622_s1 + $0x4c8] sm:$0xf]  ;;  %v3085_v20 = vld [vmem:[%s4622_s1 + $0x494] sm:$0xf0] }
  0x6f   :  { %1480 = vmatpush.bf16.msra.mxu2 %v2515_v25  ;;  %v3005_v25 = vld [vmem:[%s4622_s1 + $0x214] sm:$0xf0]  ;;  %v2770_v59 = vld [vmem:[%s4622_s1 + $0x5e8] sm:$0xf]  ;;  %v2627_v4 = vor.u32 %v3093_v56, %v2626_v55 }
  0x70   :  { %1454 = vmatpush.bf16.msra.mxu3 %v2259_v22  ;;  %1443 = vmatpush.bf16.msrb.mxu1 %v2099_v35  ;;  %v2018_v22 = vld [vmem:[%s4622_s1 + $0x8] sm:$0xf]  ;;  %v2275_v39 = vor.u32 %v3005_v25, %v2274_v23  ;;  %v2959_v23 = vld [vmem:[%s4622_s1 + $0xac] sm:$0xf]  ;;  %v2100_v25 = vld [vmem:[%s4622_s1 + $0xb8] sm:$0xf0] }
  0x71   :  { %v2418_v35 = vld [vmem:[%s4622_s1 + $0x328] sm:$0xf]  ;;  %v2019_v43 = vor.u32 %v2941_v28, %v2018_v22  ;;  %v3121_v22 = vld [vmem:[%s4622_s1 + $0x5b4] sm:$0xf0]  ;;  %v2212_v28 = vld [vmem:[%s4622_s1 + $0x198] sm:$0xf0]  ;;  %v2103_v30 = vor.u32 %v2959_v23, %v2100_v25 }
  0x72   :  { %1470 = vmatpush.bf16.msrb.mxu0 %v2339_v44  ;;  %v2163_v44 = vor.u32 %v2977_v34, %v2162_v33  ;;  %v2754_v11 = vld [vmem:[%s4622_s1 + $0x5c8] sm:$0xf]  ;;  %v3117_v34 = vld [vmem:[%s4622_s1 + $0x594] sm:$0xf0]  ;;  %v2939_v25 = vld [vmem:[%s4622_s1 + $0xc] sm:$0xf] }
  0x73   :  { %1481 = vmatpush.bf16.msra.mxu2 %v2499_v38  ;;  %v3097_v38 = vld [vmem:[%s4622_s1 + $0x4f4] sm:$0xf0]  ;;  %v2722_v33 = vld [vmem:[%s4622_s1 + $0x588] sm:$0xf] }
  0x74   :  { %1455 = vmatpush.bf16.msra.mxu3 %v2243_v36  ;;  %1444 = vmatpush.bf16.msrb.mxu1 %v2083_v48  ;;  %v3041_v36 = vld [vmem:[%s4622_s1 + $0x334] sm:$0xf0]  ;;  %v2643_v50 = vor.u32 %v3097_v38, %v2642_v37  ;;  %v2690_v61 = vld [vmem:[%s4622_s1 + $0x548] sm:$0xf] }
  0x75   :  { %v3133_v48 = vld [vmem:[%s4622_s1 + $0x614] sm:$0xf0] }
  0x76   :  { %1471 = vmatpush.bf16.msrb.mxu0 %v2323_v60  ;;  %v3129_v60 = vld [vmem:[%s4622_s1 + $0x5f4] sm:$0xf0] }
  0x77   :  { %1482 = vmatpush.bf16.msra.mxu2 %v2483_v51  ;;  %2809 = vmatmul.msk.bf16.vlgmr.msrb.gmra.mxu3 %vm1256_vm0, %v3585_v45  ;;  %v3037_v51 = vld [vmem:[%s4622_s1 + $0x314] sm:$0xf0]  ;;  %v2771_v7 = vor.u32 %v3129_v60, %v2770_v59  ;;  %v2546_v59 = vld [vmem:[%s4622_s1 + $0x428] sm:$0xf] }
  0x78   :  { %1456 = vmatpush.bf16.msra.mxu3 %v2227_v49  ;;  %1445 = vmatpush.bf16.msrb.mxu1 %v2067_v0  ;;  %v2419_v49 = vor.u32 %v3041_v36, %v2418_v35  ;;  %v2787_v0 = vor.u32 %v3133_v48, %v2786_v47  ;;  %v2955_v35 = vld [vmem:[%s4622_s1 + $0x8c] sm:$0xf]  ;;  %v2084_v36 = vld [vmem:[%s4622_s1 + $0x98] sm:$0xf0]  ;;  %v3113_v47 = vld [vmem:[%s4622_s1 + $0x574] sm:$0xf0] }
  0x79   :  { %v2951_v48 = vld [vmem:[%s4622_s1 + $0x6c] sm:$0xf]  ;;  %v3073_v60 = vld [vmem:[%s4622_s1 + $0x434] sm:$0xf0] }
  0x7a   :  { %1472 = vmatpush.bf16.msrb.mxu0 %v2307_v9  ;;  %v2610_v9 = vld [vmem:[%s4622_s1 + $0x4a8] sm:$0xf]  ;;  %v3109_v62 = vld [vmem:[%s4622_s1 + $0x554] sm:$0xf0] }
  0x7b   :  { %1483 = vmatpush.bf16.msra.mxu2 %v2467_v3  ;;  %v2403_v3 = vor.u32 %v3037_v51, %v2402_v46  ;;  %v2706_v46 = vld [vmem:[%s4622_s1 + $0x568] sm:$0xf]  ;;  %v2691_v6 = vor.u32 %v3109_v62, %v2690_v61 }
  0x7c   :  { %1457 = vmatpush.bf16.msra.mxu3 %v2211_v1  ;;  %1446 = vmatpush.bf16.msrb.mxu1 %v2051_v12  ;;  %v2147_v1 = vor.u32 %v2973_v42, %v2146_v41  ;;  %v3125_v12 = vld [vmem:[%s4622_s1 + $0x5d4] sm:$0xf0]  ;;  %v2723_v41 = vor.u32 %v3117_v34, %v2722_v33  ;;  %v2087_v42 = vor.u32 %v2955_v35, %v2084_v36  ;;  %v3123_v36 = vld [vmem:[%s4622_s1 + $0x5cc] sm:$0xf] }
  0x7d   :  { %v2755_v18 = vor.u32 %v3125_v12, %v2754_v11  ;;  %v2707_v55 = vor.u32 %v3113_v47, %v2706_v46  ;;  %v2943_v11 = vld [vmem:[%s4622_s1 + $0x2c] sm:$0xf]  ;;  %v2036_v12 = vld [vmem:[%s4622_s1 + $0x38] sm:$0xf0] }
  0x7e   :  { %1473 = vmatpush.bf16.msrb.mxu0 %v2291_v21  ;;  %v2738_v21 = vld [vmem:[%s4622_s1 + $0x5a8] sm:$0xf]  ;;  %v3091_v46 = vld [vmem:[%s4622_s1 + $0x4cc] sm:$0xf] }
  0x7f   :  { %1484 = vmatpush.bf16.msra.mxu2 %v2451_v15  ;;  %v2611_v15 = vor.u32 %v3089_v10, %v2610_v9  ;;  %v2739_v29 = vor.u32 %v3121_v22, %v2738_v21  ;;  %v2674_v9 = vld [vmem:[%s4622_s1 + $0x528] sm:$0xf]  ;;  %v3105_v10 = vld [vmem:[%s4622_s1 + $0x534] sm:$0xf0]  ;;  %v3127_v21 = vld [vmem:[%s4622_s1 + $0x5ec] sm:$0xf] }
  0x80   :  { %1458 = vmatpush.bf16.msra.mxu3 %v2195_v13  ;;  %1447 = vmatpush.bf16.msrb.mxu1 %v2035_v26  ;;  %v2116_v13 = vld [vmem:[%s4622_s1 + $0xd8] sm:$0xf0]  ;;  %v2231_v26 = vor.u32 %v2991_v16, %v2228_v17  ;;  %v2658_v16 = vld [vmem:[%s4622_s1 + $0x508] sm:$0xf]  ;;  %v2971_v17 = vld [vmem:[%s4622_s1 + $0x10c] sm:$0xf] }
  0x81   :  { %v2772_v22 = vld [vmem:[%s4622_s1 + $0x5f8] sm:$0xf0]  ;;  %v3170_v62 = vld [vmem:[#allocation1 + $0x9] sm:$0xff] }
  0x82   :  { %1474 = vmatpush.bf16.msrb.mxu0 %v2275_v39  ;;  %v2983_v39 = vld [vmem:[%s4622_s1 + $0x16c] sm:$0xf]  ;;  %v2775_v33 = vor.u32 %v3127_v21, %v2772_v22 }
  0x83   :  { %1485 = vmatpush.bf16.msra.mxu2 %v2435_v32  ;;  %v3081_v32 = vld [vmem:[%s4622_s1 + $0x474] sm:$0xf0] }
  0x84   :  { %1459 = vmatpush.bf16.msra.mxu3 %v2179_v27  ;;  %1448 = vmatpush.bf16.msrb.mxu1 %v2019_v43  ;;  %v2562_v43 = vld [vmem:[%s4622_s1 + $0x448] sm:$0xf] }
  0x85   :  { %1475 = vmatmul.bf16.vlgmr.msrb.gmra.mxu0 %v3471_v53  ;;  %v2963_v53 = vld [vmem:[%s4622_s1 + $0xcc] sm:$0xf] }
  0x86   :  { %1525 = vmatpush.bf16.msra.mxu0 %v2803_v40  ;;  %v2119_v19 = vor.u32 %v2963_v53, %v2116_v13  ;;  %v2196_v40 = vld [vmem:[%s4622_s1 + $0x178] sm:$0xf0]  ;;  %v3031_v53 = vld [vmem:[%s4622_s1 + $0x2ec] sm:$0xf] }
  0x87   :  { %1486 = vmatpush.bf16.msra.mxu2 %v2419_v49  ;;  %1449 = vmatmul.bf16.vlgmr.msrb.gmra.mxu1 %v3479_v57  ;;  %v2594_v57 = vld [vmem:[%s4622_s1 + $0x488] sm:$0xf]  ;;  %v2068_v49 = vld [vmem:[%s4622_s1 + $0x78] sm:$0xf0] }
  0x88   :  { %1460 = vmatpush.bf16.msra.mxu3 %v2163_v44  ;;  %1493 = vmatpush.bf16.msra.mxu1 %v2643_v50  ;;  %v2595_v27 = vor.u32 %v3085_v20, %v2594_v57  ;;  %v3077_v44 = vld [vmem:[%s4622_s1 + $0x454] sm:$0xf0]  ;;  %v2199_v50 = vor.u32 %v2983_v39, %v2196_v40  ;;  %v2071_v56 = vor.u32 %v2951_v48, %v2068_v49  ;;  %v2388_v13 = vld [vmem:[%s4622_s1 + $0x2f8] sm:$0xf0]  ;;  %v3023_v40 = vld [vmem:[%s4622_s1 + $0x2ac] sm:$0xf] }
  0x89   :  { %v2563_v51 = vor.u32 %v3077_v44, %v2562_v43  ;;  %v2039_v57 = vor.u32 %v2943_v11, %v2036_v12  ;;  %v3101_v20 = vld [vmem:[%s4622_s1 + $0x514] sm:$0xf0]  ;;  %v2391_v23 = vor.u32 %v3031_v53, %v2388_v13  ;;  %v3059_v43 = vld [vmem:[%s4622_s1 + $0x3cc] sm:$0xf]  ;;  %v2500_v44 = vld [vmem:[%s4622_s1 + $0x3d8] sm:$0xf0] }
  0x8a   :  { %1526 = vmatpush.bf16.msra.mxu0 %v2787_v0  ;;  %v2947_v0 = vld [vmem:[%s4622_s1 + $0x4c] sm:$0xf]  ;;  %v2659_v34 = vor.u32 %v3101_v20, %v2658_v16  ;;  %v4321_v48 = vld [vmem:[%s4624_s2] sm:$0xf]  ;;  %v2468_v11 = vld [vmem:[%s4622_s1 + $0x398] sm:$0xf0] }
  0x8b   :  { %1487 = vmatpush.bf16.msra.mxu2 %v2403_v3  ;;  %v2547_v3 = vor.u32 %v3073_v60, %v2546_v59  ;;  %v3119_v49 = vld [vmem:[%s4622_s1 + $0x5ac] sm:$0xf]  ;;  %v2484_v60 = vld [vmem:[%s4622_s1 + $0x3b8] sm:$0xf0]  ;;  %v233_v61 = vperm.slane %v4321_v48, 0 }
  0x8c   :  { %1461 = vmatpush.bf16.msra.mxu3 %v2147_v1  ;;  %1494 = vmatpush.bf16.msra.mxu1 %v2627_v4  ;;  %v2052_v1 = vld [vmem:[%s4622_s1 + $0x58] sm:$0xf0]  ;;  %v2975_v4 = vld [vmem:[%s4622_s1 + $0x12c] sm:$0xf] }
  0x8d   :  { %v3055_v59 = vld [vmem:[%s4622_s1 + $0x3ac] sm:$0xf] }
  0x8e   :  { %1545 = vmatpush.bf16.msrb.mxu0 %v2263_v2  ;;  %1488 = vmatmul.bf16.vlgmr.msra.gmra.mxu2 %v3481_v58  ;;  %v2578_v58 = vld [vmem:[%s4622_s1 + $0x468] sm:$0xf]  ;;  %v2183_v2 = vor.u32 %v2979_v52, %v2180_v54  ;;  %v2503_v52 = vor.u32 %v3059_v43, %v2500_v44  ;;  %v3019_v54 = vld [vmem:[%s4622_s1 + $0x28c] sm:$0xf]  ;;  %v2564_v44 = vld [vmem:[%s4622_s1 + $0x458] sm:$0xf0] }
  0x8f   :  { %1532 = vmatpush.bf16.msrb.mxu2 %v2135_v8  ;;  %1462 = vmatmul.bf16.vlgmr.msra.gmra.mxu3 %v3489_v63  ;;  %v2987_v63 = vld [vmem:[%s4622_s1 + $0x18c] sm:$0xf]  ;;  %v2579_v38 = vor.u32 %v3081_v32, %v2578_v58  ;;  %v3069_v8 = vld [vmem:[%s4622_s1 + $0x414] sm:$0xf0]  ;;  %v2644_v32 = vld [vmem:[%s4622_s1 + $0x4f8] sm:$0xf0] }
  0x90   :  { %1506 = vmatpush.bf16.msrb.mxu3 %v2771_v7  ;;  %1495 = vmatpush.bf16.msra.mxu1 %v2611_v15  ;;  %v2215_v37 = vor.u32 %v2987_v63, %v2212_v28  ;;  %v2055_v7 = vor.u32 %v2947_v0, %v2052_v1  ;;  %v2372_v63 = vld [vmem:[%s4622_s1 + $0x2d8] sm:$0xf0]  ;;  %v3063_v28 = vld [vmem:[%s4622_s1 + $0x3ec] sm:$0xf] }
  0x91   :  { %v3095_v58 = vld [vmem:[%s4622_s1 + $0x4ec] sm:$0xf]  ;;  %v2612_v1 = vld [vmem:[%s4622_s1 + $0x4b8] sm:$0xf0] }
  0x92   :  { %1546 = vmatpush.bf16.msrb.mxu0 %v2247_v14  ;;  %v2167_v14 = vor.u32 %v2975_v4, %v2164_v5  ;;  %v3087_v0 = vld [vmem:[%s4622_s1 + $0x4ac] sm:$0xf] }
  0x93   :  { %1533 = vmatpush.bf16.msrb.mxu2 %v2119_v19  ;;  %v2675_v19 = vor.u32 %v3105_v10, %v2674_v9  ;;  %v3115_v4 = vld [vmem:[%s4622_s1 + $0x58c] sm:$0xf]  ;;  %v2324_v9 = vld [vmem:[%s4622_s1 + $0x278] sm:$0xf0] }
  0x94   :  { %1507 = vmatpush.bf16.msrb.mxu3 %v2755_v18  ;;  %1496 = vmatpush.bf16.msra.mxu1 %v2595_v27  ;;  %v2148_v18 = vld [vmem:[%s4622_s1 + $0x118] sm:$0xf0]  ;;  %v3027_v27 = vld [vmem:[%s4622_s1 + $0x2cc] sm:$0xf] }
  0x95   :  { %2810 = vmatmul.msk.bf16.vlgmr.msra.gmra.mxu0 %vm1256_vm0, %v3585_v45  ;;  %v2530_v45 = vld [vmem:[%s4622_s1 + $0x408] sm:$0xf]  ;;  %v3051_v10 = vld [vmem:[%s4622_s1 + $0x38c] sm:$0xf] }
  0x96   :  { %1547 = vmatpush.bf16.msrb.mxu0 %v2231_v26  ;;  %v2531_v15 = vor.u32 %v3069_v8, %v2530_v45  ;;  %v2020_v26 = vld [vmem:[%s4622_s1 + $0x18] sm:$0xf0]  ;;  %v2615_v8 = vor.u32 %v3087_v0, %v2612_v1  ;;  %v3083_v13 = vld [vmem:[%s4622_s1 + $0x48c] sm:$0xf] }
  0x97   :  { %1534 = vmatpush.bf16.msrb.mxu2 %v2103_v30  ;;  %v2151_v30 = vor.u32 %v2971_v17, %v2148_v18  ;;  %v2023_v35 = vor.u32 %v2939_v25, %v2020_v26  ;;  %v3111_v17 = vld [vmem:[%s4622_s1 + $0x56c] sm:$0xf]  ;;  %v2708_v18 = vld [vmem:[%s4622_s1 + $0x578] sm:$0xf0] }
  0x98   :  { %1508 = vmatpush.bf16.msrb.mxu3 %v2739_v29  ;;  %1497 = vmatpush.bf16.msra.mxu1 %v2579_v38  ;;  %v2516_v29 = vld [vmem:[%s4622_s1 + $0x3f8] sm:$0xf0]  ;;  %v2375_v38 = vor.u32 %v3027_v27, %v2372_v63  ;;  %v3011_v20 = vld [vmem:[%s4622_s1 + $0x24c] sm:$0xf] }
  0x99   :  { %v2519_v39 = vor.u32 %v3063_v28, %v2516_v29  ;;  %v3047_v25 = vld [vmem:[%s4622_s1 + $0x36c] sm:$0xf]  ;;  %v2452_v26 = vld [vmem:[%s4622_s1 + $0x378] sm:$0xf0]  ;;  %v2711_v28 = vor.u32 %v3111_v17, %v2708_v18  ;;  %v3172_v17 = vld [vmem:[#allocation1 + $0x12] sm:$0xff] }
  0x9a   :  { %1548 = vmatpush.bf16.msrb.mxu0 %v2215_v37  ;;  %v2756_v37 = vld [vmem:[%s4622_s1 + $0x5d8] sm:$0xf0]  ;;  %v3079_v27 = vld [vmem:[%s4622_s1 + $0x46c] sm:$0xf] }
  0x9b   :  { %1535 = vmatpush.bf16.msrb.mxu2 %v2087_v42  ;;  %v2356_v42 = vld [vmem:[%s4622_s1 + $0x2b8] sm:$0xf0]  ;;  %v2759_v47 = vor.u32 %v3123_v36, %v2756_v37  ;;  %v3007_v36 = vld [vmem:[%s4622_s1 + $0x22c] sm:$0xf] }
  0x9c   :  { %1509 = vmatpush.bf16.msrb.mxu3 %v2723_v41  ;;  %1498 = vmatpush.bf16.msra.mxu1 %v2563_v51  ;;  %v2647_v41 = vor.u32 %v3095_v58, %v2644_v32  ;;  %v2359_v51 = vor.u32 %v3023_v40, %v2356_v42  ;;  %v2580_v63 = vld [vmem:[%s4622_s1 + $0x478] sm:$0xf0]  ;;  %v3107_v58 = vld [vmem:[%s4622_s1 + $0x54c] sm:$0xf] }
  0x9d   :  { %v2692_v32 = vld [vmem:[%s4622_s1 + $0x558] sm:$0xf0]  ;;  %v3043_v40 = vld [vmem:[%s4622_s1 + $0x34c] sm:$0xf] }
  0x9e   :  { %1549 = vmatpush.bf16.msrb.mxu0 %v2199_v50  ;;  %v2740_v50 = vld [vmem:[%s4622_s1 + $0x5b8] sm:$0xf0]  ;;  %v3075_v43 = vld [vmem:[%s4622_s1 + $0x44c] sm:$0xf] }
  0x9f   :  { %1536 = vmatpush.bf16.msrb.mxu2 %v2071_v56  ;;  %v3135_v0 = vld [vmem:[%s4622_s1 + $0x62c] sm:$0xf]  ;;  %v2804_v1 = vld [vmem:[%s4622_s1 + $0x638] sm:$0xf0] }
  0xa0   :  { %1510 = vmatpush.bf16.msrb.mxu3 %v2707_v55  ;;  %1499 = vmatpush.bf16.msra.mxu1 %v2547_v3  ;;  %v2340_v55 = vld [vmem:[%s4622_s1 + $0x298] sm:$0xf0]  ;;  %v3171_v3 = vld [vmem:[#allocation1] sm:$0xff]  ;;  %v3173_v18 = vld [vmem:[#allocation1 + $0x2d] sm:$0xff] }
  0xa1   :  { %v2343_v5 = vor.u32 %v3019_v54, %v2340_v55  ;;  %v2567_v55 = vor.u32 %v3075_v43, %v2564_v44 }
  0xa2   :  { %1550 = vmatpush.bf16.msrb.mxu0 %v2183_v2  ;;  %v2743_v2 = vor.u32 %v3119_v49, %v2740_v50 }
  0xa3   :  { %1537 = vmatpush.bf16.msrb.mxu2 %v2055_v7  ;;  %v3015_v7 = vld [vmem:[%s4622_s1 + $0x26c] sm:$0xf] }
  0xa4   :  { %1511 = vmatpush.bf16.msrb.mxu3 %v2691_v6  ;;  %1500 = vmatpush.bf16.msra.mxu1 %v2531_v15  ;;  %v2487_v6 = vor.u32 %v3055_v59, %v2484_v60  ;;  %v2420_v59 = vld [vmem:[%s4622_s1 + $0x338] sm:$0xf0]  ;;  %v3071_v60 = vld [vmem:[%s4622_s1 + $0x42c] sm:$0xf] }
  0xa6   :  { %1551 = vmatpush.bf16.msrb.mxu0 %v2167_v14  ;;  %v1268_v45 = vpop.f32.mrf.mxu0  ;;  %v2596_v14 = vld [vmem:[%s4622_s1 + $0x498] sm:$0xf0] }
  0xa7   :  { %1538 = vmatpush.bf16.msrb.mxu2 %v2039_v57  ;;  %1501 = vmatmul.bf16.vlgmr.msra.gmra.mxu1 %v3661_v24  ;;  %v2628_v24 = vld [vmem:[%s4622_s1 + $0x4d8] sm:$0xf0]  ;;  %v1269_v12 = vadd.f32 %v1268_v45, %v233_v61  ;;  %v2471_v57 = vor.u32 %v3051_v10, %v2468_v11  ;;  %v2599_v22 = vor.u32 %v3083_v13, %v2596_v14  ;;  %v3035_v45 = vld [vmem:[%s4622_s1 + $0x30c] sm:$0xf] }
  0xa8   :  { %1512 = vmatpush.bf16.msrb.mxu3 %v2675_v19  ;;  %1558 = vmatpush.bf16.msrb.mxu1 %v2391_v23  ;;  %v2631_v56 = vor.u32 %v3091_v46, %v2628_v24  ;;  %v1281_v53 = vpop.f32.mrf.mxu1  ;;  %v2327_v19 = vor.u32 %v3015_v7, %v2324_v9  ;;  %v2308_v23 = vld [vmem:[%s4622_s1 + $0x258] sm:$0xf0]  ;;  %v2695_v46 = vor.u32 %v3107_v58, %v2692_v32  ;;  %v3103_v24 = vld [vmem:[%s4622_s1 + $0x52c] sm:$0xf] }
  0xa9   :  { %v1282_v16 = vadd.f32 %v1281_v53, %v1269_v12  ;;  %v2548_v61 = vld [vmem:[%s4622_s1 + $0x438] sm:$0xf0]  ;;  %v2807_v7 = vor.u32 %v3135_v0, %v2804_v1  ;;  %v3067_v9 = vld [vmem:[%s4622_s1 + $0x40c] sm:$0xf] }
  0xaa   :  { %1552 = vmatpush.bf16.msrb.mxu0 %v2151_v30  ;;  %v2532_v10 = vld [vmem:[%s4622_s1 + $0x418] sm:$0xf0]  ;;  %v3131_v12 = vld [vmem:[%s4622_s1 + $0x60c] sm:$0xf] }
  0xab   :  { %1539 = vmatpush.bf16.msrb.mxu2 %v2023_v35  ;;  %v2788_v53 = vld [vmem:[%s4622_s1 + $0x618] sm:$0xf0]  ;;  %v2535_v14 = vor.u32 %v3067_v9, %v2532_v10 }
  0xac   :  { %1513 = vmatpush.bf16.msrb.mxu3 %v2659_v34  ;;  %1559 = vmatpush.bf16.msrb.mxu1 %v2375_v38  ;;  %v1294_v21 = vpop.f32.mrf.mxu2  ;;  %v2455_v34 = vor.u32 %v3047_v25, %v2452_v26  ;;  %v2583_v38 = vor.u32 %v3079_v27, %v2580_v63  ;;  %v234_v26 = vperm.slane %v4321_v48, 1  ;;  %v3176_v58 = vld [vmem:[#allocation1 + $0x36] sm:$0xff] }
  0xad   :  { %1553 = vmatmul.bf16.vlgmr.msrb.gmra.mxu0 %v3170_v62  ;;  %v1295_v29 = vadd.f32 %v1294_v21, %v1282_v16  ;;  %v1307_v30 = vpop.f32.mrf.mxu3  ;;  %v3145_v10 = vld [vmem:[%s4625_s4 + $0x38] sm:$0xff] }
  0xae   :  { %1597 = vmatpush.bf16.msra.mxu0 %v2775_v33  ;;  %1540 = vmatmul.bf16.vlgmr.msrb.gmra.mxu2 %v3171_v3  ;;  %v2311_v33 = vor.u32 %v3011_v20, %v2308_v23  ;;  %v1270_v37 = vpop.f32.mrf.mxu0  ;;  %v3099_v3 = vld [vmem:[%s4622_s1 + $0x50c] sm:$0xf] }
  0xaf   :  { %1584 = vmatpush.bf16.msra.mxu2 %v2647_v41  ;;  %1514 = vmatmul.bf16.vlgmr.msrb.gmra.mxu3 %v3681_v31  ;;  %v2724_v31 = vld [vmem:[%s4622_s1 + $0x598] sm:$0xf0]  ;;  %v4403_v35 = vadd.f32 %v1307_v30, %v1295_v29 }
  0xb0   :  { %1571 = vmatpush.bf16.msra.mxu3 %v2519_v39  ;;  %1560 = vmatpush.bf16.msrb.mxu1 %v2359_v51  ;;  %v2727_v15 = vor.u32 %v3115_v4, %v2724_v31  ;;  %v2292_v39 = vld [vmem:[%s4622_s1 + $0x238] sm:$0xf0]  ;;  %v1283_v42 = vpop.f32.mrf.mxu1  ;;  %v3003_v51 = vld [vmem:[%s4622_s1 + $0x20c] sm:$0xf] }
  0xb1   :  { %v2436_v41 = vld [vmem:[%s4622_s1 + $0x358] sm:$0xf0]  ;;  %v2295_v49 = vor.u32 %v3007_v36, %v2292_v39 }
  0xb2   :  { %1598 = vmatpush.bf16.msra.mxu0 %v2759_v47  ;;  %v2676_v47 = vld [vmem:[%s4622_s1 + $0x538] sm:$0xf0]  ;;  %v2439_v50 = vor.u32 %v3043_v40, %v2436_v41 }
  0xb3   :  { %1585 = vmatpush.bf16.msra.mxu2 %v2631_v56  ;;  %v3039_v56 = vld [vmem:[%s4622_s1 + $0x32c] sm:$0xf]  ;;  %v2679_v62 = vor.u32 %v3103_v24, %v2676_v47  ;;  %v2660_v4 = vld [vmem:[%s4622_s1 + $0x518] sm:$0xf0] }
  0xb4   :  { %1572 = vmatpush.bf16.msra.mxu3 %v2503_v52  ;;  %1561 = vmatpush.bf16.msrb.mxu1 %v2343_v5  ;;  %v2276_v52 = vld [vmem:[%s4622_s1 + $0x218] sm:$0xf0]  ;;  %v1296_v54 = vpop.f32.mrf.mxu2  ;;  %v2423_v5 = vor.u32 %v3039_v56, %v2420_v59  ;;  %v2663_v11 = vor.u32 %v3099_v3, %v2660_v4 }
  0xb5   :  { %v2279_v31 = vor.u32 %v3003_v51, %v2276_v52 }
  0xb6   :  { %1599 = vmatpush.bf16.msra.mxu0 %v2743_v2  ;;  %v1309_v2 = vpop.f32.mrf.mxu3 }
  0xb7   :  { %1586 = vmatpush.bf16.msra.mxu2 %v2615_v8  ;;  %v2404_v8 = vld [vmem:[%s4622_s1 + $0x318] sm:$0xf0] }
  0xb8   :  { %1573 = vmatpush.bf16.msra.mxu3 %v2487_v6  ;;  %1562 = vmatpush.bf16.msrb.mxu1 %v2327_v19  ;;  %v2551_v6 = vor.u32 %v3071_v60, %v2548_v61  ;;  %v2407_v13 = vor.u32 %v3035_v45, %v2404_v8  ;;  %v3174_v19 = vld [vmem:[#allocation1 + $0x1b] sm:$0xff] }
  0xba   :  { %1600 = vmatpush.bf16.msra.mxu0 %v2727_v15  ;;  %v2791_v15 = vor.u32 %v3131_v12, %v2788_v53  ;;  %v3161_v12 = vld [vmem:[%s4625_s4 + $0xb8] sm:$0xff] }
  0xbb   :  { %1587 = vmatpush.bf16.msra.mxu2 %v2599_v22 }
  0xbc   :  { %1574 = vmatpush.bf16.msra.mxu3 %v2471_v57  ;;  %1563 = vmatpush.bf16.msrb.mxu1 %v2311_v33  ;;  %v1346_v16 = vpop.f32.mrf.mxu2  ;;  %v3175_v57 = vld [vmem:[#allocation1 + $0x24] sm:$0xff] }
  0xbe   :  { %1601 = vmatpush.bf16.msra.mxu0 %v2711_v28 }
  0xbf   :  { %1588 = vmatpush.bf16.msra.mxu2 %v2583_v38 }
  0xc0   :  { %1575 = vmatpush.bf16.msra.mxu3 %v2455_v34  ;;  %1564 = vmatpush.bf16.msrb.mxu1 %v2295_v49 }
  0xc2   :  { %1602 = vmatpush.bf16.msra.mxu0 %v2695_v46  ;;  %v1320_v20 = vpop.f32.mrf.mxu0 }
  0xc3   :  { %1589 = vmatpush.bf16.msra.mxu2 %v2567_v55  ;;  %v1321_v22 = vadd.f32 %v1320_v20, %v4403_v35  ;;  %v3151_v20 = vld [vmem:[%s4625_s4 + $0x68] sm:$0xff] }
  0xc4   :  { %1576 = vmatpush.bf16.msra.mxu3 %v2439_v50  ;;  %1565 = vmatpush.bf16.msrb.mxu1 %v2279_v31  ;;  %v1333_v21 = vpop.f32.mrf.mxu1  ;;  %v1348_v23 = vpop.f32.mrf.mxu2 }
  0xc5   :  { %v1334_v25 = vadd.f32 %v1333_v21, %v1321_v22  ;;  %v3159_v21 = vld [vmem:[%s4625_s4 + $0xa8] sm:$0xff]  ;;  %v235_v23 = vperm.slane %v4321_v48, 2 }
  0xc6   :  { %1603 = vmatpush.bf16.msra.mxu0 %v2679_v62  ;;  %v3167_v22 = vld [vmem:[%s4625_s4 + $0xe8] sm:$0xff] }
  0xc7   :  { %1590 = vmatpush.bf16.msra.mxu2 %v2551_v6  ;;  %1566 = vmatmul.bf16.vlgmr.msrb.gmra.mxu1 %v3172_v17  ;;  %v1347_v27 = vadd.f32 %v1346_v16, %v1334_v25  ;;  %v3144_v16 = vld [vmem:[%s4625_s4 + $0x30] sm:$0xff] }
  0xc8   :  { %1577 = vmatpush.bf16.msra.mxu3 %v2423_v5  ;;  %1616 = vmatpush.bf16.msra.mxu1 %v2807_v7  ;;  %v1736_v7 = vld [vmem:[%s4625_s4 + $0xf8] sm:$0x3]  ;;  %v3152_v17 = vld [vmem:[%s4625_s4 + $0x70] sm:$0xff] }
  0xc9   :  { %v1624_v52 = vmul.f32 128.0, %v1347_v27  ;;  %v1862_v45 = vunpack.c.l.b16 %v1736_v7  ;;  %v3142_v27 = vld [vmem:[%s4625_s4 + $0x20] sm:$0xff] }
  0xca   :  { %1604 = vmatpush.bf16.msra.mxu0 %v2663_v11  ;;  %v1322_v29 = vpop.f32.mrf.mxu0  ;;  %v3153_v11 = vld [vmem:[%s4625_s4 + $0x78] sm:$0xff] }
  0xcb   :  { %1591 = vmatpush.bf16.msra.mxu2 %v2535_v14  ;;  %v1894_v9 = vpack.c.b16 %v1862_v45, %v1862_v45  ;;  %v3166_v29 = vld [vmem:[%s4625_s4 + $0xe0] sm:$0xff] }
  0xcc   :  { %1578 = vmatpush.bf16.msra.mxu3 %v2407_v13  ;;  %1617 = vmatpush.bf16.msra.mxu1 %v2791_v15  ;;  %v1359_v63 = vpop.f32.mrf.mxu3  ;;  %v1335_v30 = vpop.f32.mrf.mxu1 }
  0xcd   :  { %1605 = vmatmul.bf16.vlgmr.msra.gmra.mxu0 %v3173_v18  ;;  %v1360_v28 = vadd.f32 %v1359_v63, %v234_v26  ;;  %v1931_v53 = vsel %vm1635_vm1, %v1894_v9, 0  ;;  %v3160_v18 = vld [vmem:[%s4625_s4 + $0xb0] sm:$0xff]  ;;  %v3150_v63 = vld [vmem:[%s4625_s4 + $0x60] sm:$0xff] }
  0xce   :  { %1592 = vmatmul.bf16.vlgmr.msra.gmra.mxu2 %v3175_v57  ;;  %1972 = vmatpush.bf16.msrb.mxu0 %v1931_v53  ;;  %v3143_v57 = vld [vmem:[%s4625_s4 + $0x28] sm:$0xff] }
  0xcf   :  { %1579 = vmatmul.bf16.vlgmr.msra.gmra.mxu3 %v3174_v19  ;;  %1959 = vmatpush.bf16.msrb.mxu2 %v3161_v12  ;;  %v3168_v19 = vld [vmem:[%s4625_s4 + $0xf0] sm:$0xff]  ;;  %v1623_v12 = vld [vmem:[%s4626_s3] sm:$0xff] }
  0xd0   :  { %1933 = vmatpush.bf16.msrb.mxu3 %v3145_v10  ;;  %1946 = vmatpush.bf16.msrb.mxu1 %v3153_v11 }
  0xd1   :  { %v1372_v32 = vpop.f32.mrf.mxu2 }
  0xd2   :  { %v1373_v33 = vadd.f32 %v1372_v32, %v1360_v28  ;;  %1973 = vmatpush.bf16.msrb.mxu0 %v3168_v19  ;;  %v3158_v28 = vld [vmem:[%s4625_s4 + $0xa0] sm:$0xff]  ;;  %v3149_v32 = vld [vmem:[%s4625_s4 + $0x58] sm:$0xff]  ;;  %v3177_v19 = vmov 0.0  }
  0xd3   :  { %1960 = vmatpush.bf16.msrb.mxu2 %v3160_v18 }
  0xd4   :  { %v1361_v34 = vpop.f32.mrf.mxu3  ;;  %1934 = vmatpush.bf16.msrb.mxu3 %v3144_v16  ;;  %1947 = vmatpush.bf16.msrb.mxu1 %v3152_v17 }
  0xd5   :  { %v3165_v34 = vld [vmem:[%s4625_s4 + $0xd8] sm:$0xff] }
  0xd6   :  { %1974 = vmatpush.bf16.msrb.mxu0 %v3167_v22 }
  0xd7   :  { %2811 = vmatmul.msk.bf16.vlgmr.msra.gmra.mxu1 %vm1256_vm0, %v3176_v58  ;;  %1961 = vmatpush.bf16.msrb.mxu2 %v3159_v21  ;;  %v3141_v58 = vld [vmem:[%s4625_s4 + $0x18] sm:$0xff] }
  0xd8   :  { %1935 = vmatpush.bf16.msrb.mxu3 %v3143_v57  ;;  %1948 = vmatpush.bf16.msrb.mxu1 %v3151_v20 }
  0xd9   :  { %v1374_v36 = vpop.f32.mrf.mxu2 }
  0xda   :  { %1975 = vmatpush.bf16.msrb.mxu0 %v3166_v29 }
  0xdb   :  { %1962 = vmatpush.bf16.msrb.mxu2 %v3158_v28 }
  0xdc   :  { %1936 = vmatpush.bf16.msrb.mxu3 %v3142_v27  ;;  %1949 = vmatpush.bf16.msrb.mxu1 %v3150_v63 }
  0xde   :  { %1976 = vmatpush.bf16.msrb.mxu0 %v3165_v34 }
  0xe0   :  { %1937 = vmatpush.bf16.msrb.mxu3 %v3141_v58  ;;  %1950 = vmatpush.bf16.msrb.mxu1 %v3149_v32 }
  0xe2   :  { %v1385_v37 = vpop.f32.mrf.mxu0 }
  0xe3   :  { %v1386_v38 = vadd.f32 %v1385_v37, %v1373_v33  ;;  %v3157_v33 = vld [vmem:[%s4625_s4 + $0x98] sm:$0xff]  ;;  %v236_v37 = vperm.slane %v4321_v48, 3  ;;  %v3164_v48 = vld [vmem:[%s4625_s4 + $0xd0] sm:$0xff] }
  0xe4   :  { %1963 = vmatpush.bf16.msrb.mxu2 %v3157_v33  ;;  %1977 = vmatpush.bf16.msrb.mxu0 %v3164_v48  ;;  %v1659_v48 = vld [vmem:[%s4629_s6] sm:$0x3] }
  0xe6   :  { %v1398_v39 = vpop.f32.mrf.mxu1 }
  0xe7   :  { %v1399_v35 = vadd.f32 %v1398_v39, %v1386_v38  ;;  %v3140_v38 = vld [vmem:[%s4625_s4 + $0x10] sm:$0xff] }
  0xe8   :  { %v3148_v39 = vld [vmem:[%s4625_s4 + $0x50] sm:$0xff]  ;;  %1938 = vmatpush.bf16.msrb.mxu3 %v3140_v38  ;;  %v1986_v38 = vld [vmem:[%s4628_s5] sm:$0x3] }
  0xe9   :  { %1951 = vmatpush.bf16.msrb.mxu1 %v3148_v39 }
  0xea   :  { %v1411_v40 = vpop.f32.mrf.mxu3  ;;  %v1387_v42 = vpop.f32.mrf.mxu0 }
  0xeb   :  { %v1412_v41 = vadd.f32 %v1411_v40, %v1399_v35  ;;  %v3156_v35 = vld [vmem:[%s4625_s4 + $0x90] sm:$0xff] }
  0xec   :  { %1964 = vmatpush.bf16.msrb.mxu2 %v3156_v35 }
  0xee   :  { %v1400_v43 = vpop.f32.mrf.mxu1 }
  0xf1   :  { %v1424_v44 = vpop.f32.mrf.mxu2 }
  0xf2   :  { %v1425_v46 = vadd.f32 %v1424_v44, %v1412_v41  ;;  %v1413_v24 = vpop.f32.mrf.mxu3  ;;  %v3139_v44 = vld [vmem:[%s4625_s4 + $0x8] sm:$0xff] }
  0xf3   :  { %v3155_v24 = vld [vmem:[%s4625_s4 + $0x88] sm:$0xff]  ;;  %1939 = vmatpush.bf16.msrb.mxu3 %v3139_v44 }
  0xf4   :  { %1965 = vmatpush.bf16.msrb.mxu2 %v3155_v24 }
  0xf9   :  { %v1426_v47 = vpop.f32.mrf.mxu2 }
  0xfa   :  { %v1437_v49 = vpop.f32.mrf.mxu3  ;;  %v3163_v47 = vld [vmem:[%s4625_s4 + $0xc8] sm:$0xff] }
  0xfb   :  { %v1438_v50 = vadd.f32 %v1437_v49, %v1425_v46  ;;  %v3147_v46 = vld [vmem:[%s4625_s4 + $0x48] sm:$0xff]  ;;  %1978 = vmatpush.bf16.msrb.mxu0 %v3163_v47 }
  0xfc   :  { %1952 = vmatpush.bf16.msrb.mxu1 %v3147_v46 }
  0xfd   :  { %v1625_v51 = vmul.f32 128.0, %v1438_v50 }
  0xff   :  { %v1632_v54 = vrot.slane %v1625_v51, 6  ;;  %v3138_v51 = vld [vmem:[%s4625_s4] sm:$0xff] }
 0x100   :  { %1940 = vmatpush.bf16.msrb.mxu3 %v3138_v51 }
 0x101   :  { %v4483_v56 = vsel %vm1635_vm1, %v1624_v52, %v1632_v54  ;;  %v3146_v52 = vld [vmem:[%s4625_s4 + $0x40] sm:$0xff] }
 0x102   :  { %v4480_v55 = vpop.f32.mrf.mxu0  ;;  %v1439_v59 = vpop.f32.mrf.mxu3  ;;  %v3154_v54 = vld [vmem:[%s4625_s4 + $0x80] sm:$0xff]  ;;  %1953 = vmatpush.bf16.msrb.mxu1 %v3146_v52 }
 0x103   :  { %1966 = vmatpush.bf16.msrb.mxu2 %v3154_v54 }
 0x104   :  { %v1450_v60 = vpop.f32.mrf.mxu1 }
 0x105   :  { %v1451_v30 = vadd.f32 %v1450_v60, %v235_v23 }
 0x10a   :  { %v1478_v61 = vpop.f32.mrf.mxu0 }
 0x10c   :  { %v1452_v62 = vpop.f32.mrf.mxu1 }
 0x111   :  { %v4485_v1 = vpop.f32.mrf.mxu2 }
 0x112   :  { %v1463_v0 = vpop.f32.mrf.mxu3  ;;  %v4487_v2 = vpop.f32.mrf.mxu0 }
 0x113   :  { %v1464_v36 = vadd.f32 %v1463_v0, %v1451_v30 }
 0x115   :  { %v1477_v41 = vadd.f32 %v4480_v55, %v1464_v36  ;;  %v3162_v55 = vld [vmem:[%s4625_s4 + $0xc0] sm:$0xff] }
 0x116   :  { %1979 = vmatpush.bf16.msrb.mxu0 %v3162_v55 }
 0x117   :  { %v1490_v49 = vadd.f32 %v4485_v1, %v1477_v41 }
 0x119   :  { %v1491_v4 = vpop.f32.mrf.mxu2 }
 0x11a   :  { %v1465_v3 = vpop.f32.mrf.mxu3  ;;  %v1530_v31 = vpop.f32.mrf.mxu0 }
 0x124   :  { %v4489_v5 = vpop.f32.mrf.mxu1 }
 0x125   :  { %v1503_v59 = vadd.f32 %v4489_v5, %v1490_v49 }
 0x12a   :  { %v4491_v6 = vpop.f32.mrf.mxu0 }
 0x12c   :  { %v1504_v8 = vpop.f32.mrf.mxu1 }
 0x131   :  { %v1541_v14 = vpop.f32.mrf.mxu2 }
 0x132   :  { %v4506_v13 = vpop.f32.mrf.mxu3  ;;  %v1556_v15 = vpop.f32.mrf.mxu0  ;;  %v1542_v42 = vadd.f32 %v1541_v14, %v236_v37 }
 0x133   :  { %v1516_v61 = vadd.f32 %v4506_v13, %v1503_v59  ;;  %v1643_v15 = vmul.f32 0.0, %v1623_v12 }
 0x134   :  { %v1555_v50 = vadd.f32 %v4491_v6, %v1542_v42  ;;  %v1987_v42 = vsub.f32 0.0, %v1986_v38 }
 0x135   :  { %v1529_v31 = vadd.f32 %v4487_v2, %v1516_v61 }
 0x137   :  { %v1626_v8 = vmul.f32 128.0, %v1529_v31 }
 0x139   :  { %v1543_v26 = vpop.f32.mrf.mxu2  ;;  %v1633_v53 = vrot.slane %v1626_v8, 4 }
 0x13a   :  { %v1517_v25 = vpop.f32.mrf.mxu3 }
 0x144   :  { %v1567_v40 = vpop.f32.mrf.mxu1 }
 0x145   :  { %v1568_v62 = vadd.f32 %v1567_v40, %v1555_v50 }
 0x14a   :  { %v1606_v43 = vpop.f32.mrf.mxu0 }
 0x14c   :  { %v1569_v60 = vpop.f32.mrf.mxu1 }
 0x151   :  { %v1593_v4 = vpop.f32.mrf.mxu2 }
 0x152   :  { %v1580_v0 = vpop.f32.mrf.mxu3  ;;  %v1608_v1 = vpop.f32.mrf.mxu0 }
 0x153   :  { %v1581_v3 = vadd.f32 %v1580_v0, %v1568_v62 }
 0x154   :  { %v1619_v45 = vpop.f32.mrf.mxu1 }
 0x155   :  { %v1594_v6 = vadd.f32 %v1593_v4, %v1581_v3 }
 0x157   :  { %v1607_v7 = vadd.f32 %v1606_v43, %v1594_v6 }
 0x159   :  { %v1620_v9 = vadd.f32 %v1619_v45, %v1607_v7  ;;  %v1595_v11 = vpop.f32.mrf.mxu2 }
 0x15a   :  { %v1582_v5 = vpop.f32.mrf.mxu3 }
 0x15b   :  { %v1627_v10 = vmul.f32 128.0, %v1620_v9 }
 0x15c   :  { %v1621_v16 = vpop.f32.mrf.mxu1 }
 0x15d   :  { %v1634_v13 = vrot.slane %v1627_v10, 2 }
 0x15f   :  { %v1638_v14 = vsel %vm1637_vm2, %v1633_v53, %v1634_v13 }
 0x160   :  { %v1640_v2 = vsel %vm1639_vm3, %v4483_v56, %v1638_v14 }
 0x161   :  { %v1642_v17 = vadd.f32 %v1640_v2, %v1623_v12 }
 0x163   :  { %v1644_v18 = vsub.f32 %v1642_v17, %v1643_v15 }
 0x165   :  { %vm1645_vm6 = vcmp.ge.f32.partialorder %v1644_v18, 2e-07 }
 0x166   :  { %v2812_v57 = vsel %vm1645_vm6, 1.0, %v3177_v19 }
 0x167   :  { %v1649_v20 = vsub.f32 1.0, %v2812_v57  ;;  %v1658_v21 = vmax.f32 %v2812_v57, 0.0  ;;  %v1648_v22 = vmul.f32 0.0, %v2812_v57 }
 0x169   :  { %v1650_v23 = vmul.f32 %v1649_v20, %v1644_v18  ;;  %1661 = vst [vmem:[#allocation1] ss:$4 sm:$0xff] %v1658_v21 }
 0x16b   :  { %v1651_v25 = vadd.f32 %v1650_v23, %v1648_v22 }
 0x16d   :  { %1657 = vst.msk [vmem:[%s4627_s7] sm:$0xff] %vm1656_vm9, %v1651_v25 }
 0x170   :  { %v1662_v56 = vld.sshfl [vmem:[#allocation1] sm:$0xff pattern:$0x73625140]  ;;  %v1663_v26 = vld.sshfl [vmem:[#allocation1 + $0x8] sm:$0xff pattern:$0x73625140] }
 0x171   :  { %v1670_v27 = vpack.c.bf16 %v1662_v56, %v1662_v56  ;;  %v1671_v63 = vpack.c.bf16 %v1663_v26, %v1663_v26  ;;  %v1664_v28 = vld.sshfl [vmem:[#allocation1 + $0x10] sm:$0xff pattern:$0x73625140]  ;;  %v1665_v29 = vld.sshfl [vmem:[#allocation1 + $0x18] sm:$0xff pattern:$0x73625140] }
 0x172   :  { %v1672_v30 = vpack.c.bf16 %v1664_v28, %v1664_v28  ;;  %v1673_v58 = vpack.c.bf16 %v1665_v29, %v1665_v29 }
 0x173   :  { %1941 = vmatmul.bf16.vlgmr.msrb.gmra.mxu3 %v1670_v27  ;;  %1954 = vmatmul.bf16.vlgmr.msrb.gmra.mxu1 %v1671_v63 }
 0x174   :  { %1967 = vmatmul.bf16.vlgmr.msrb.gmra.mxu2 %v1672_v30  ;;  %2937 = vmatmul.msk.bf16.vlgmr.msrb.gmra.mxu0 %vm1926_vm10, %v1673_v58 }
 0x1f0   :  { %v1955_v32 = vpop.f32.mrf.mxu1 }
 0x1f1   :  { %v1981_v33 = vpop.f32.mrf.mxu0 }
 0x1f6   :  { %v1942_v34 = vpop.f32.mrf.mxu3 }
 0x1f7   :  { %v1956_v36 = vadd.f32 %v1955_v32, %v1942_v34  ;;  %v1968_v37 = vpop.f32.mrf.mxu2 }
 0x1f8   :  { %v1957_v39 = vpop.f32.mrf.mxu1 }
 0x1f9   :  { %v1969_v35 = vadd.f32 %v1968_v37, %v1956_v36  ;;  %v1983_v40 = vpop.f32.mrf.mxu0 }
 0x1fb   :  { %v1982_v41 = vadd.f32 %v1981_v33, %v1969_v35 }
 0x1fd   :  { %v1985_v43 = vadd.f32 %v1982_v41, %v1659_v48 }
 0x1fe   :  { %v1944_v44 = vpop.f32.mrf.mxu3 }
 0x1ff   :  { %v1988_v46 = vadd.f32 %v1987_v42, %v1985_v43  ;;  %v1993_v24 = vmul.f32 0.2, %v1985_v43  ;;  %v1970_v47 = vpop.f32.mrf.mxu2 }
 0x201   :  { %v1989_v49 = vmul.f32 0.1, %v1988_v46  ;;  %v1994_v50 = vsub.f32 %v1985_v43, %v1993_v24 }
 0x203   :  { %v1990_v51 = vadd.f32 %v1989_v49, %v1986_v38  ;;  %1995 = vst.msk [vmem:[%s4630_s9] sm:$0x3] %vm1991_vm11, %v1994_v50 }
 0x205   :  { %1992 = vst.msk [vmem:[%s4631_s8] sm:$0x3] %vm1991_vm11, %v1990_v51 }

</bundles_post_ra>
